<compile_context>
chip_gen: v7x
topology: tpu7x:2x2x1
jax: 0.10.0
libtpu: 0.0.40
codegen_flags: <defaults>
</compile_context>

<pallas_src>
from functools import partial

import jax
import jax.numpy as jnp
from jax.experimental import pallas as pl
from jax.experimental.pallas import tpu as pltpu


def _round_up(n, m):
    return ((n + m - 1) // m) * m


# ------------------------------ Pallas kernels ------------------------------

def conv1_relu_pool_kernel(x_ref, w_ref, b_ref, o_ref, *, bblk, cout, wq, m):
    """Fused 3x3 conv (Cin=1, stride 1, pad 1) + bias + ReLU + 2x2 maxpool.

    Channel-major, flattened spatial in the lane dim; BBLK images per step.

    x_ref : (bblk, 4, sq_pad) f32 -- (row,col)-parity planes of the zero-padded
            image, each flattened row-major over its (hq, wq) grid.
    w_ref : (cout, 9) f32         -- tap t = 3*dh + dw in the lane dim.
    b_ref : (cout, 1) f32
    o_ref : (bblk, cout, m) bf16  -- pooled output, m = hp*wq flat (row, col);
            column wq-1 of every pooled row is junk (handled by the caller).
    """
    bias = b_ref[...]
    wcols = [w_ref[:, t:t + 1] for t in range(9)]        # 9 x (cout, 1), hoisted
    for b in range(bblk):
        pooled = None
        for ri in range(2):          # conv-output row parity in the pool window
            for rj in range(2):      # conv-output col parity in the pool window
                acc = jnp.zeros((cout, m), jnp.float32)
                for dh in range(3):
                    for dw in range(3):
                        plane = ((ri + dh) % 2) * 2 + (rj + dw) % 2
                        off = ((ri + dh) // 2) * wq + (rj + dw) // 2
                        a = x_ref[b, plane:plane + 1, off:off + m]    # (1, m)
                        # Cin == 1: broadcasted outer product on the VPU beats
                        # a degenerate K=1 MXU matmul.
                        acc = acc + wcols[3 * dh + dw] * a
                pooled = acc if pooled is None else jnp.maximum(pooled, acc)
        o_ref[b] = jnp.maximum(pooled + bias, 0.0).astype(o_ref.dtype)


def conv2_relu_pool_kernel(x_ref, w_ref, b_ref, o_ref, a_ref, *,
                           bblk, cin, cout, wq, m):
    """Fused 3x3 conv + bias + ReLU + 2x2 maxpool via K=9*Cin tap-concat matmuls.

    x_ref : (bblk, 4, cin, sq_pad) bf16 -- parity planes, channel-major.
    w_ref : (cout, 9*cin) bf16          -- K index = (3*dh + dw)*cin + ci.
    b_ref : (cout, 1) f32
    o_ref : (bblk, cout, m) bf16        -- pooled, m = hp*wq (junk col wq-1).
    a_ref : (9*cin, m) bf16 VMEM scratch -- tap-concatenated LHS for one parity.
    """
    bias = b_ref[...]
    w = w_ref[...]                                        # (cout, 9*cin)
    for b in range(bblk):
        pooled = None
        for ri in range(2):
            for rj in range(2):
                # Gather the 9 shifted (cin, m) slices into one (9*cin, m)
                # buffer so the whole parity pass is a single MXU matmul.
                for dh in range(3):
                    for dw in range(3):
                        t = 3 * dh + dw
                        plane = ((ri + dh) % 2) * 2 + (rj + dw) % 2
                        off = ((ri + dh) // 2) * wq + (rj + dw) // 2
                        a_ref[t * cin:(t + 1) * cin, :] = \
                            x_ref[b, plane, :, off:off + m]
                z = jnp.dot(w, a_ref[...], preferred_element_type=jnp.float32)
                pooled = z if pooled is None else jnp.maximum(pooled, z)
        o_ref[b] = jnp.maximum(pooled + bias, 0.0).astype(o_ref.dtype)


def head_kernel(x_ref, wfc_ref, bfc_ref, wout_ref, bout_ref, o_ref):
    """Fused fc (1792->24, junk cols hit zero weights) + ReLU + out + softmax."""
    h = jnp.dot(x_ref[...], wfc_ref[...], preferred_element_type=jnp.float32)
    h = jnp.maximum(h + bfc_ref[...], 0.0)
    # TODO(synk): dropout(p=0.5) is inference-mode identity here; train-mode
    # stochastic masking not implemented.
    logits = jnp.dot(h.astype(jnp.bfloat16), wout_ref[...],
                     preferred_element_type=jnp.float32)
    logits = logits + bout_ref[...]
    mx = jnp.max(logits, axis=-1, keepdims=True)
    e = jnp.exp(logits - mx)
    s = jnp.sum(e, axis=-1, keepdims=True)
    o_ref[...] = (e * pl.reciprocal(s, approx=True)).astype(o_ref.dtype)


# ------------------------------ kernel wrappers ------------------------------

def _conv1_call(planes, w, b, bblk, hp, wq):
    npad, _, sq_pad = planes.shape
    cout = w.shape[0]
    m = hp * wq
    return pl.pallas_call(
        partial(conv1_relu_pool_kernel, bblk=bblk, cout=cout, wq=wq, m=m),
        grid=(npad // bblk,),
        in_specs=[
            pl.BlockSpec((bblk, 4, sq_pad), lambda i: (i, 0, 0)),
            pl.BlockSpec((cout, 9), lambda i: (0, 0)),
            pl.BlockSpec((cout, 1), lambda i: (0, 0)),
        ],
        out_specs=pl.BlockSpec((bblk, cout, m), lambda i: (i, 0, 0)),
        out_shape=jax.ShapeDtypeStruct((npad, cout, m), jnp.bfloat16),
        compiler_params=pltpu.CompilerParams(dimension_semantics=("parallel",)),
    )(planes, w, b)


def _conv2_call(planes, w, b, bblk, hp, wq):
    npad, _, cin, sq_pad = planes.shape
    cout = w.shape[0]
    m = hp * wq
    return pl.pallas_call(
        partial(conv2_relu_pool_kernel, bblk=bblk, cin=cin, cout=cout, wq=wq, m=m),
        grid=(npad // bblk,),
        in_specs=[
            pl.BlockSpec((bblk, 4, cin, sq_pad), lambda i: (i, 0, 0, 0)),
            pl.BlockSpec((cout, 9 * cin), lambda i: (0, 0)),
            pl.BlockSpec((cout, 1), lambda i: (0, 0)),
        ],
        out_specs=pl.BlockSpec((bblk, cout, m), lambda i: (i, 0, 0)),
        out_shape=jax.ShapeDtypeStruct((npad, cout, m), jnp.bfloat16),
        scratch_shapes=[pltpu.VMEM((9 * cin, m), jnp.bfloat16)],
        compiler_params=pltpu.CompilerParams(dimension_semantics=("parallel",)),
    )(planes, w, b)


def fc_out_softmax(flat, w_fc, b_fc, w_out, b_out):
    """(N, 1792) bf16 -> (N, 10) softmax probabilities, one fused head kernel."""
    n, k = flat.shape
    bm = min(512, max(8, _round_up(n, 8)))
    npad = _round_up(n, bm)
    x = jnp.pad(flat, ((0, npad - n), (0, 0)))
    nout = w_out.shape[-1]

    out = pl.pallas_call(
        head_kernel,
        grid=(npad // bm,),
        in_specs=[
            pl.BlockSpec((bm, k), lambda i: (i, 0)),
            pl.BlockSpec(w_fc.shape, lambda i: (0, 0)),
            pl.BlockSpec(b_fc.shape, lambda i: (0, 0)),
            pl.BlockSpec(w_out.shape, lambda i: (0, 0)),
            pl.BlockSpec(b_out.shape, lambda i: (0, 0)),
        ],
        out_specs=pl.BlockSpec((bm, nout), lambda i: (i, 0)),
        out_shape=jax.ShapeDtypeStruct((npad, nout), jnp.float32),
        compiler_params=pltpu.CompilerParams(dimension_semantics=("parallel",)),
    )(x, w_fc, b_fc, w_out, b_out)
    return out[:n]


# --------------------------------- forward ----------------------------------

def net_forward(x_nchw, p, *, bblk=8):
    """Forward pass: conv1+pool -> conv2+pool -> fc+ReLU -> out -> softmax."""
    n, cin, h, w = x_nchw.shape
    assert cin == 1 and h % 4 == 0 and w % 4 == 0
    c1 = p["w1"].shape[0]
    c2 = p["w2"].shape[0]
    bblk = max(1, min(bblk, n))
    npad = _round_up(n, bblk)

    # conv1 glue: zero-pad and split into the 4 (row,col)-parity planes.
    hq1, wq1 = (h + 2) // 2, (w + 2) // 2                 # 15, 15
    hp1, wp1 = h // 2, w // 2                             # 14, 14
    m1, sq1 = hp1 * wq1, hq1 * wq1                        # 210, 225
    sq1_pad = _round_up(m1 + wq1 + 1, 128)                # max tap read end
    xp = jnp.pad(x_nchw[:, 0].astype(jnp.float32),
                 ((0, npad - n), (1, 1), (1, 1)))
    planes1 = jnp.stack([xp[:, pr::2, pc::2]
                         for pr in (0, 1) for pc in (0, 1)], axis=1)
    planes1 = jnp.pad(planes1.reshape(npad, 4, sq1),
                      ((0, 0), (0, 0), (0, sq1_pad - sq1)))
    out1 = _conv1_call(planes1, p["w1"], p["b1"], bblk, hp1, wq1)   # (npad,16,210)

    # conv2 glue: drop conv1's junk column, re-pad, parity-split (<=7 KB/image).
    hq2, wq2 = (hp1 + 2) // 2, (wp1 + 2) // 2             # 8, 8
    hp2, wp2 = hp1 // 2, wp1 // 2                         # 7, 7
    m2, sq2 = hp2 * wq2, hq2 * wq2                        # 56, 64
    sq2_pad = _round_up(m2 + wq2 + 1, 128)
    y = out1.reshape(npad, c1, hp1, wq1)[:, :, :, :wp1]
    yp = jnp.pad(y, ((0, 0), (0, 0), (1, 1), (1, 1)))
    planes2 = jnp.stack([yp[:, :, pr::2, pc::2]
                         for pr in (0, 1) for pc in (0, 1)], axis=1)
    planes2 = jnp.pad(planes2.reshape(npad, 4, c1, sq2),
                      ((0, 0), (0, 0), (0, 0), (0, sq2_pad - sq2)))
    planes2 = planes2.astype(jnp.bfloat16)
    out2 = _conv2_call(planes2, p["w2"], p["b2"], bblk, hp2, wq2)   # (npad,32,56)

    # Head: channel-major conv output == PyTorch NCHW flatten order, so this is
    # a pure reshape; conv2's junk columns hit zero rows of the padded fc weight.
    flat = out2.reshape(npad, c2 * m2)                              # (npad, 1792)
    probs = fc_out_softmax(flat, p["w_fc"], p["b_fc"], p["w_out"], p["b_out"])
    return probs[:n]


def prepare_params(params):
    """One-time weight layout / dtype preprocessing (hoisted out of forward)."""
    c1, _, kh, kw = params["w1"].shape                    # (16, 1, 3, 3)
    c2 = params["w2"].shape[0]                            # 32
    # Conv weights, channel-major: (Cout, 9*Cin), K index = (3*dh+dw)*Cin + ci.
    w1 = params["w1"].reshape(c1, kh * kw).astype(jnp.float32)
    w2 = jnp.transpose(params["w2"], (0, 2, 3, 1)).reshape(c2, -1).astype(jnp.bfloat16)
    # fc weight: conv2 emits (c2, 7, 8) per image (one junk column per pooled
    # row), so zero-pad the spatial width 7 -> 8; junk then contributes 0 and
    # the flatten is a pure reshape.
    wfc = params["w_fc"].reshape(-1, c2, 7, 7)
    wfc = jnp.pad(wfc, ((0, 0), (0, 0), (0, 0), (0, 1)))
    wfc = wfc.reshape(wfc.shape[0], -1).T.astype(jnp.bfloat16)        # (1792, 24)
    return {
        "w1": w1,
        "b1": params["b1"].reshape(-1, 1).astype(jnp.float32),
        "w2": w2,
        "b2": params["b2"].reshape(-1, 1).astype(jnp.float32),
        "w_fc": wfc,
        "b_fc": params["b_fc"].reshape(1, -1).astype(jnp.float32),
        "w_out": params["w_out"].T.astype(jnp.bfloat16),              # (24, 10)
        "b_out": params["b_out"].reshape(1, -1).astype(jnp.float32),
    }


def init_params(key):
    ks = jax.random.split(key, 8)

    def u(k, shape, fan_in):
        bound = 1.0 / jnp.sqrt(fan_in)
        return jax.random.uniform(k, shape, jnp.float32, -bound, bound)

    return {
        "w1": u(ks[0], (16, 1, 3, 3), 1 * 9),
        "b1": u(ks[1], (16,), 1 * 9),
        "w2": u(ks[2], (32, 16, 3, 3), 16 * 9),
        "b2": u(ks[3], (32,), 16 * 9),
        "w_fc": u(ks[4], (24, 32 * 7 * 7), 32 * 7 * 7),
        "b_fc": u(ks[5], (24,), 32 * 7 * 7),
        "w_out": u(ks[6], (10, 24), 24),
        "b_out": u(ks[7], (10,), 24),
    }


def reference_forward(x_nchw, params):
    """Pure-XLA f32 reference for a loose sanity check (bf16 kernel tolerance)."""
    x = jnp.transpose(x_nchw, (0, 2, 3, 1))

    def conv(x, w, b):
        y = jax.lax.conv_general_dilated(
            x, jnp.transpose(w, (2, 3, 1, 0)), (1, 1), ((1, 1), (1, 1)),
            dimension_numbers=("NHWC", "HWIO", "NHWC"))
        return jax.nn.relu(y + b)

    def pool(x):
        return jax.lax.reduce_window(x, -jnp.inf, jax.lax.max,
                                     (1, 2, 2, 1), (1, 2, 2, 1), "VALID")

    x = pool(conv(x, params["w1"], params["b1"]))
    x = pool(conv(x, params["w2"], params["b2"]))
    flat = jnp.transpose(x, (0, 3, 1, 2)).reshape(x.shape[0], -1)
    h = jax.nn.relu(flat @ params["w_fc"].T + params["b_fc"])
    return jax.nn.softmax(h @ params["w_out"].T + params["b_out"], axis=-1)


if __name__ == "__main__":
    key = jax.random.PRNGKey(0)
    k_x, k_p = jax.random.split(key)

    # Input consistent with fc = Linear(32*7*7, 24): (N, 1, 28, 28), NCHW.
    x = jax.random.normal(k_x, (2, 1, 28, 28), dtype=jnp.float32)
    params = init_params(k_p)
    prepped = prepare_params(params)          # hoisted: done once, not per call

    fwd = jax.jit(net_forward)
    probs = jax.block_until_ready(fwd(x, prepped))

    assert probs.shape == (2, 10)
    assert bool(jnp.all(jnp.isfinite(probs)))
    # approx reciprocal in the softmax -> rows sum to 1 within EUP accuracy.
    assert bool(jnp.allclose(jnp.sum(probs, axis=1), 1.0, atol=3e-3))

    # Loose check vs the pure-XLA f32 reference (bf16 matmuls in the kernels).
    ref = reference_forward(x, params)
    assert bool(jnp.max(jnp.abs(probs - ref)) < 3e-2)

    print("KERNEL_OK")
</pallas_src>

<mosaic_0001>
module attributes {stable_mosaic.version = 11 : i64} {
  func.func @conv1_relu_pool_kernel(%arg0: i32, %arg1: memref<2x4x256xf32, #tpu.memory_space<vmem>>, %arg2: memref<16x9xf32, #tpu.memory_space<vmem>>, %arg3: memref<16x1xf32, #tpu.memory_space<vmem>>, %arg4: memref<2x16x210xbf16, #tpu.memory_space<vmem>>) attributes {dimension_semantics = [#tpu.dimension_semantics<parallel>], iteration_bounds = array<i64: 1>, scalar_prefetch = 0 : i64, scratch_operands = 0 : i64, tpu.core_type = #tpu.core_type<tc>, window_params = [{transform_indices = @transform_0, window_bounds = array<i64: 2, 4, 256>}, {pipeline_mode = #tpu.pipeline_mode<synchronous>, transform_indices = @transform_1, window_bounds = array<i64: 16, 9>}, {pipeline_mode = #tpu.pipeline_mode<synchronous>, transform_indices = @transform_2, window_bounds = array<i64: 16, 1>}, {transform_indices = @transform_3, window_bounds = array<i64: 2, 16, 210>}]} {
    %c0 = arith.constant 0 : index
    %c0_0 = arith.constant 0 : index
    %0 = vector.load %arg3[%c0, %c0_0] : memref<16x1xf32, #tpu.memory_space<vmem>>, vector<16x1xf32>
    %c0_1 = arith.constant 0 : index
    %c0_2 = arith.constant 0 : index
    %1 = vector.load %arg2[%c0_1, %c0_2] : memref<16x9xf32, #tpu.memory_space<vmem>>, vector<16x1xf32>
    %c0_3 = arith.constant 0 : index
    %c1 = arith.constant 1 : index
    %2 = vector.load %arg2[%c0_3, %c1] : memref<16x9xf32, #tpu.memory_space<vmem>>, vector<16x1xf32>
    %c0_4 = arith.constant 0 : index
    %c2 = arith.constant 2 : index
    %3 = vector.load %arg2[%c0_4, %c2] : memref<16x9xf32, #tpu.memory_space<vmem>>, vector<16x1xf32>
    %c0_5 = arith.constant 0 : index
    %c3 = arith.constant 3 : index
    %4 = vector.load %arg2[%c0_5, %c3] : memref<16x9xf32, #tpu.memory_space<vmem>>, vector<16x1xf32>
    %c0_6 = arith.constant 0 : index
    %c4 = arith.constant 4 : index
    %5 = vector.load %arg2[%c0_6, %c4] : memref<16x9xf32, #tpu.memory_space<vmem>>, vector<16x1xf32>
    %c0_7 = arith.constant 0 : index
    %c5 = arith.constant 5 : index
    %6 = vector.load %arg2[%c0_7, %c5] : memref<16x9xf32, #tpu.memory_space<vmem>>, vector<16x1xf32>
    %c0_8 = arith.constant 0 : index
    %c6 = arith.constant 6 : index
    %7 = vector.load %arg2[%c0_8, %c6] : memref<16x9xf32, #tpu.memory_space<vmem>>, vector<16x1xf32>
    %c0_9 = arith.constant 0 : index
    %c7 = arith.constant 7 : index
    %8 = vector.load %arg2[%c0_9, %c7] : memref<16x9xf32, #tpu.memory_space<vmem>>, vector<16x1xf32>
    %c0_10 = arith.constant 0 : index
    %c8 = arith.constant 8 : index
    %9 = vector.load %arg2[%c0_10, %c8] : memref<16x9xf32, #tpu.memory_space<vmem>>, vector<16x1xf32>
    %cst = arith.constant 0.000000e+00 : f32
    %10 = vector.broadcast %cst : f32 to vector<16x210xf32>
    %c0_11 = arith.constant 0 : index
    %c0_12 = arith.constant 0 : index
    %c0_13 = arith.constant 0 : index
    %11 = vector.load %arg1[%c0_11, %c0_12, %c0_13] : memref<2x4x256xf32, #tpu.memory_space<vmem>>, vector<1x1x210xf32>
    %12 = vector.shape_cast %11 : vector<1x1x210xf32> to vector<1x210xf32>
    %13 = vector.broadcast %1 : vector<16x1xf32> to vector<16x210xf32>
    %14 = vector.broadcast %12 : vector<1x210xf32> to vector<16x210xf32>
    %15 = arith.mulf %13, %14 : vector<16x210xf32>
    %16 = arith.addf %10, %15 : vector<16x210xf32>
    %c0_14 = arith.constant 0 : index
    %c1_15 = arith.constant 1 : index
    %c0_16 = arith.constant 0 : index
    %17 = vector.load %arg1[%c0_14, %c1_15, %c0_16] : memref<2x4x256xf32, #tpu.memory_space<vmem>>, vector<1x1x210xf32>
    %18 = vector.shape_cast %17 : vector<1x1x210xf32> to vector<1x210xf32>
    %19 = vector.broadcast %2 : vector<16x1xf32> to vector<16x210xf32>
    %20 = vector.broadcast %18 : vector<1x210xf32> to vector<16x210xf32>
    %21 = arith.mulf %19, %20 : vector<16x210xf32>
    %22 = arith.addf %16, %21 : vector<16x210xf32>
    %c0_17 = arith.constant 0 : index
    %c0_18 = arith.constant 0 : index
    %c1_19 = arith.constant 1 : index
    %23 = vector.load %arg1[%c0_17, %c0_18, %c1_19] : memref<2x4x256xf32, #tpu.memory_space<vmem>>, vector<1x1x210xf32>
    %24 = vector.shape_cast %23 : vector<1x1x210xf32> to vector<1x210xf32>
    %25 = vector.broadcast %3 : vector<16x1xf32> to vector<16x210xf32>
    %26 = vector.broadcast %24 : vector<1x210xf32> to vector<16x210xf32>
    %27 = arith.mulf %25, %26 : vector<16x210xf32>
    %28 = arith.addf %22, %27 : vector<16x210xf32>
    %c0_20 = arith.constant 0 : index
    %c2_21 = arith.constant 2 : index
    %c0_22 = arith.constant 0 : index
    %29 = vector.load %arg1[%c0_20, %c2_21, %c0_22] : memref<2x4x256xf32, #tpu.memory_space<vmem>>, vector<1x1x210xf32>
    %30 = vector.shape_cast %29 : vector<1x1x210xf32> to vector<1x210xf32>
    %31 = vector.broadcast %4 : vector<16x1xf32> to vector<16x210xf32>
    %32 = vector.broadcast %30 : vector<1x210xf32> to vector<16x210xf32>
    %33 = arith.mulf %31, %32 : vector<16x210xf32>
    %34 = arith.addf %28, %33 : vector<16x210xf32>
    %c0_23 = arith.constant 0 : index
    %c3_24 = arith.constant 3 : index
    %c0_25 = arith.constant 0 : index
    %35 = vector.load %arg1[%c0_23, %c3_24, %c0_25] : memref<2x4x256xf32, #tpu.memory_space<vmem>>, vector<1x1x210xf32>
    %36 = vector.shape_cast %35 : vector<1x1x210xf32> to vector<1x210xf32>
    %37 = vector.broadcast %5 : vector<16x1xf32> to vector<16x210xf32>
    %38 = vector.broadcast %36 : vector<1x210xf32> to vector<16x210xf32>
    %39 = arith.mulf %37, %38 : vector<16x210xf32>
    %40 = arith.addf %34, %39 : vector<16x210xf32>
    %c0_26 = arith.constant 0 : index
    %c2_27 = arith.constant 2 : index
    %c1_28 = arith.constant 1 : index
    %41 = vector.load %arg1[%c0_26, %c2_27, %c1_28] : memref<2x4x256xf32, #tpu.memory_space<vmem>>, vector<1x1x210xf32>
    %42 = vector.shape_cast %41 : vector<1x1x210xf32> to vector<1x210xf32>
    %43 = vector.broadcast %6 : vector<16x1xf32> to vector<16x210xf32>
    %44 = vector.broadcast %42 : vector<1x210xf32> to vector<16x210xf32>
    %45 = arith.mulf %43, %44 : vector<16x210xf32>
    %46 = arith.addf %40, %45 : vector<16x210xf32>
    %c0_29 = arith.constant 0 : index
    %c0_30 = arith.constant 0 : index
    %c15 = arith.constant 15 : index
    %47 = vector.load %arg1[%c0_29, %c0_30, %c15] : memref<2x4x256xf32, #tpu.memory_space<vmem>>, vector<1x1x210xf32>
    %48 = vector.shape_cast %47 : vector<1x1x210xf32> to vector<1x210xf32>
    %49 = vector.broadcast %7 : vector<16x1xf32> to vector<16x210xf32>
    %50 = vector.broadcast %48 : vector<1x210xf32> to vector<16x210xf32>
    %51 = arith.mulf %49, %50 : vector<16x210xf32>
    %52 = arith.addf %46, %51 : vector<16x210xf32>
    %c0_31 = arith.constant 0 : index
    %c1_32 = arith.constant 1 : index
    %c15_33 = arith.constant 15 : index
    %53 = vector.load %arg1[%c0_31, %c1_32, %c15_33] : memref<2x4x256xf32, #tpu.memory_space<vmem>>, vector<1x1x210xf32>
    %54 = vector.shape_cast %53 : vector<1x1x210xf32> to vector<1x210xf32>
    %55 = vector.broadcast %8 : vector<16x1xf32> to vector<16x210xf32>
    %56 = vector.broadcast %54 : vector<1x210xf32> to vector<16x210xf32>
    %57 = arith.mulf %55, %56 : vector<16x210xf32>
    %58 = arith.addf %52, %57 : vector<16x210xf32>
    %c0_34 = arith.constant 0 : index
    %c0_35 = arith.constant 0 : index
    %c16 = arith.constant 16 : index
    %59 = vector.load %arg1[%c0_34, %c0_35, %c16] : memref<2x4x256xf32, #tpu.memory_space<vmem>>, vector<1x1x210xf32>
    %60 = vector.shape_cast %59 : vector<1x1x210xf32> to vector<1x210xf32>
    %61 = vector.broadcast %9 : vector<16x1xf32> to vector<16x210xf32>
    %62 = vector.broadcast %60 : vector<1x210xf32> to vector<16x210xf32>
    %63 = arith.mulf %61, %62 : vector<16x210xf32>
    %64 = arith.addf %58, %63 : vector<16x210xf32>
    %cst_36 = arith.constant 0.000000e+00 : f32
    %65 = vector.broadcast %cst_36 : f32 to vector<16x210xf32>
    %c0_37 = arith.constant 0 : index
    %c1_38 = arith.constant 1 : index
    %c0_39 = arith.constant 0 : index
    %66 = vector.load %arg1[%c0_37, %c1_38, %c0_39] : memref<2x4x256xf32, #tpu.memory_space<vmem>>, vector<1x1x210xf32>
    %67 = vector.shape_cast %66 : vector<1x1x210xf32> to vector<1x210xf32>
    %68 = vector.broadcast %1 : vector<16x1xf32> to vector<16x210xf32>
    %69 = vector.broadcast %67 : vector<1x210xf32> to vector<16x210xf32>
    %70 = arith.mulf %68, %69 : vector<16x210xf32>
    %71 = arith.addf %65, %70 : vector<16x210xf32>
    %c0_40 = arith.constant 0 : index
    %c0_41 = arith.constant 0 : index
    %c1_42 = arith.constant 1 : index
    %72 = vector.load %arg1[%c0_40, %c0_41, %c1_42] : memref<2x4x256xf32, #tpu.memory_space<vmem>>, vector<1x1x210xf32>
    %73 = vector.shape_cast %72 : vector<1x1x210xf32> to vector<1x210xf32>
    %74 = vector.broadcast %2 : vector<16x1xf32> to vector<16x210xf32>
    %75 = vector.broadcast %73 : vector<1x210xf32> to vector<16x210xf32>
    %76 = arith.mulf %74, %75 : vector<16x210xf32>
    %77 = arith.addf %71, %76 : vector<16x210xf32>
    %c0_43 = arith.constant 0 : index
    %c1_44 = arith.constant 1 : index
    %c1_45 = arith.constant 1 : index
    %78 = vector.load %arg1[%c0_43, %c1_44, %c1_45] : memref<2x4x256xf32, #tpu.memory_space<vmem>>, vector<1x1x210xf32>
    %79 = vector.shape_cast %78 : vector<1x1x210xf32> to vector<1x210xf32>
    %80 = vector.broadcast %3 : vector<16x1xf32> to vector<16x210xf32>
    %81 = vector.broadcast %79 : vector<1x210xf32> to vector<16x210xf32>
    %82 = arith.mulf %80, %81 : vector<16x210xf32>
    %83 = arith.addf %77, %82 : vector<16x210xf32>
    %c0_46 = arith.constant 0 : index
    %c3_47 = arith.constant 3 : index
    %c0_48 = arith.constant 0 : index
    %84 = vector.load %arg1[%c0_46, %c3_47, %c0_48] : memref<2x4x256xf32, #tpu.memory_space<vmem>>, vector<1x1x210xf32>
    %85 = vector.shape_cast %84 : vector<1x1x210xf32> to vector<1x210xf32>
    %86 = vector.broadcast %4 : vector<16x1xf32> to vector<16x210xf32>
    %87 = vector.broadcast %85 : vector<1x210xf32> to vector<16x210xf32>
    %88 = arith.mulf %86, %87 : vector<16x210xf32>
    %89 = arith.addf %83, %88 : vector<16x210xf32>
    %c0_49 = arith.constant 0 : index
    %c2_50 = arith.constant 2 : index
    %c1_51 = arith.constant 1 : index
    %90 = vector.load %arg1[%c0_49, %c2_50, %c1_51] : memref<2x4x256xf32, #tpu.memory_space<vmem>>, vector<1x1x210xf32>
    %91 = vector.shape_cast %90 : vector<1x1x210xf32> to vector<1x210xf32>
    %92 = vector.broadcast %5 : vector<16x1xf32> to vector<16x210xf32>
    %93 = vector.broadcast %91 : vector<1x210xf32> to vector<16x210xf32>
    %94 = arith.mulf %92, %93 : vector<16x210xf32>
    %95 = arith.addf %89, %94 : vector<16x210xf32>
    %c0_52 = arith.constant 0 : index
    %c3_53 = arith.constant 3 : index
    %c1_54 = arith.constant 1 : index
    %96 = vector.load %arg1[%c0_52, %c3_53, %c1_54] : memref<2x4x256xf32, #tpu.memory_space<vmem>>, vector<1x1x210xf32>
    %97 = vector.shape_cast %96 : vector<1x1x210xf32> to vector<1x210xf32>
    %98 = vector.broadcast %6 : vector<16x1xf32> to vector<16x210xf32>
    %99 = vector.broadcast %97 : vector<1x210xf32> to vector<16x210xf32>
    %100 = arith.mulf %98, %99 : vector<16x210xf32>
    %101 = arith.addf %95, %100 : vector<16x210xf32>
    %c0_55 = arith.constant 0 : index
    %c1_56 = arith.constant 1 : index
    %c15_57 = arith.constant 15 : index
    %102 = vector.load %arg1[%c0_55, %c1_56, %c15_57] : memref<2x4x256xf32, #tpu.memory_space<vmem>>, vector<1x1x210xf32>
    %103 = vector.shape_cast %102 : vector<1x1x210xf32> to vector<1x210xf32>
    %104 = vector.broadcast %7 : vector<16x1xf32> to vector<16x210xf32>
    %105 = vector.broadcast %103 : vector<1x210xf32> to vector<16x210xf32>
    %106 = arith.mulf %104, %105 : vector<16x210xf32>
    %107 = arith.addf %101, %106 : vector<16x210xf32>
    %c0_58 = arith.constant 0 : index
    %c0_59 = arith.constant 0 : index
    %c16_60 = arith.constant 16 : index
    %108 = vector.load %arg1[%c0_58, %c0_59, %c16_60] : memref<2x4x256xf32, #tpu.memory_space<vmem>>, vector<1x1x210xf32>
    %109 = vector.shape_cast %108 : vector<1x1x210xf32> to vector<1x210xf32>
    %110 = vector.broadcast %8 : vector<16x1xf32> to vector<16x210xf32>
    %111 = vector.broadcast %109 : vector<1x210xf32> to vector<16x210xf32>
    %112 = arith.mulf %110, %111 : vector<16x210xf32>
    %113 = arith.addf %107, %112 : vector<16x210xf32>
    %c0_61 = arith.constant 0 : index
    %c1_62 = arith.constant 1 : index
    %c16_63 = arith.constant 16 : index
    %114 = vector.load %arg1[%c0_61, %c1_62, %c16_63] : memref<2x4x256xf32, #tpu.memory_space<vmem>>, vector<1x1x210xf32>
    %115 = vector.shape_cast %114 : vector<1x1x210xf32> to vector<1x210xf32>
    %116 = vector.broadcast %9 : vector<16x1xf32> to vector<16x210xf32>
    %117 = vector.broadcast %115 : vector<1x210xf32> to vector<16x210xf32>
    %118 = arith.mulf %116, %117 : vector<16x210xf32>
    %119 = arith.addf %113, %118 : vector<16x210xf32>
    %120 = arith.maximumf %64, %119 : vector<16x210xf32>
    %cst_64 = arith.constant 0.000000e+00 : f32
    %121 = vector.broadcast %cst_64 : f32 to vector<16x210xf32>
    %c0_65 = arith.constant 0 : index
    %c2_66 = arith.constant 2 : index
    %c0_67 = arith.constant 0 : index
    %122 = vector.load %arg1[%c0_65, %c2_66, %c0_67] : memref<2x4x256xf32, #tpu.memory_space<vmem>>, vector<1x1x210xf32>
    %123 = vector.shape_cast %122 : vector<1x1x210xf32> to vector<1x210xf32>
    %124 = vector.broadcast %1 : vector<16x1xf32> to vector<16x210xf32>
    %125 = vector.broadcast %123 : vector<1x210xf32> to vector<16x210xf32>
    %126 = arith.mulf %124, %125 : vector<16x210xf32>
    %127 = arith.addf %121, %126 : vector<16x210xf32>
    %c0_68 = arith.constant 0 : index
    %c3_69 = arith.constant 3 : index
    %c0_70 = arith.constant 0 : index
    %128 = vector.load %arg1[%c0_68, %c3_69, %c0_70] : memref<2x4x256xf32, #tpu.memory_space<vmem>>, vector<1x1x210xf32>
    %129 = vector.shape_cast %128 : vector<1x1x210xf32> to vector<1x210xf32>
    %130 = vector.broadcast %2 : vector<16x1xf32> to vector<16x210xf32>
    %131 = vector.broadcast %129 : vector<1x210xf32> to vector<16x210xf32>
    %132 = arith.mulf %130, %131 : vector<16x210xf32>
    %133 = arith.addf %127, %132 : vector<16x210xf32>
    %c0_71 = arith.constant 0 : index
    %c2_72 = arith.constant 2 : index
    %c1_73 = arith.constant 1 : index
    %134 = vector.load %arg1[%c0_71, %c2_72, %c1_73] : memref<2x4x256xf32, #tpu.memory_space<vmem>>, vector<1x1x210xf32>
    %135 = vector.shape_cast %134 : vector<1x1x210xf32> to vector<1x210xf32>
    %136 = vector.broadcast %3 : vector<16x1xf32> to vector<16x210xf32>
    %137 = vector.broadcast %135 : vector<1x210xf32> to vector<16x210xf32>
    %138 = arith.mulf %136, %137 : vector<16x210xf32>
    %139 = arith.addf %133, %138 : vector<16x210xf32>
    %c0_74 = arith.constant 0 : index
    %c0_75 = arith.constant 0 : index
    %c15_76 = arith.constant 15 : index
    %140 = vector.load %arg1[%c0_74, %c0_75, %c15_76] : memref<2x4x256xf32, #tpu.memory_space<vmem>>, vector<1x1x210xf32>
    %141 = vector.shape_cast %140 : vector<1x1x210xf32> to vector<1x210xf32>
    %142 = vector.broadcast %4 : vector<16x1xf32> to vector<16x210xf32>
    %143 = vector.broadcast %141 : vector<1x210xf32> to vector<16x210xf32>
    %144 = arith.mulf %142, %143 : vector<16x210xf32>
    %145 = arith.addf %139, %144 : vector<16x210xf32>
    %c0_77 = arith.constant 0 : index
    %c1_78 = arith.constant 1 : index
    %c15_79 = arith.constant 15 : index
    %146 = vector.load %arg1[%c0_77, %c1_78, %c15_79] : memref<2x4x256xf32, #tpu.memory_space<vmem>>, vector<1x1x210xf32>
    %147 = vector.shape_cast %146 : vector<1x1x210xf32> to vector<1x210xf32>
    %148 = vector.broadcast %5 : vector<16x1xf32> to vector<16x210xf32>
    %149 = vector.broadcast %147 : vector<1x210xf32> to vector<16x210xf32>
    %150 = arith.mulf %148, %149 : vector<16x210xf32>
    %151 = arith.addf %145, %150 : vector<16x210xf32>
    %c0_80 = arith.constant 0 : index
    %c0_81 = arith.constant 0 : index
    %c16_82 = arith.constant 16 : index
    %152 = vector.load %arg1[%c0_80, %c0_81, %c16_82] : memref<2x4x256xf32, #tpu.memory_space<vmem>>, vector<1x1x210xf32>
    %153 = vector.shape_cast %152 : vector<1x1x210xf32> to vector<1x210xf32>
    %154 = vector.broadcast %6 : vector<16x1xf32> to vector<16x210xf32>
    %155 = vector.broadcast %153 : vector<1x210xf32> to vector<16x210xf32>
    %156 = arith.mulf %154, %155 : vector<16x210xf32>
    %157 = arith.addf %151, %156 : vector<16x210xf32>
    %c0_83 = arith.constant 0 : index
    %c2_84 = arith.constant 2 : index
    %c15_85 = arith.constant 15 : index
    %158 = vector.load %arg1[%c0_83, %c2_84, %c15_85] : memref<2x4x256xf32, #tpu.memory_space<vmem>>, vector<1x1x210xf32>
    %159 = vector.shape_cast %158 : vector<1x1x210xf32> to vector<1x210xf32>
    %160 = vector.broadcast %7 : vector<16x1xf32> to vector<16x210xf32>
    %161 = vector.broadcast %159 : vector<1x210xf32> to vector<16x210xf32>
    %162 = arith.mulf %160, %161 : vector<16x210xf32>
    %163 = arith.addf %157, %162 : vector<16x210xf32>
    %c0_86 = arith.constant 0 : index
    %c3_87 = arith.constant 3 : index
    %c15_88 = arith.constant 15 : index
    %164 = vector.load %arg1[%c0_86, %c3_87, %c15_88] : memref<2x4x256xf32, #tpu.memory_space<vmem>>, vector<1x1x210xf32>
    %165 = vector.shape_cast %164 : vector<1x1x210xf32> to vector<1x210xf32>
    %166 = vector.broadcast %8 : vector<16x1xf32> to vector<16x210xf32>
    %167 = vector.broadcast %165 : vector<1x210xf32> to vector<16x210xf32>
    %168 = arith.mulf %166, %167 : vector<16x210xf32>
    %169 = arith.addf %163, %168 : vector<16x210xf32>
    %c0_89 = arith.constant 0 : index
    %c2_90 = arith.constant 2 : index
    %c16_91 = arith.constant 16 : index
    %170 = vector.load %arg1[%c0_89, %c2_90, %c16_91] : memref<2x4x256xf32, #tpu.memory_space<vmem>>, vector<1x1x210xf32>
    %171 = vector.shape_cast %170 : vector<1x1x210xf32> to vector<1x210xf32>
    %172 = vector.broadcast %9 : vector<16x1xf32> to vector<16x210xf32>
    %173 = vector.broadcast %171 : vector<1x210xf32> to vector<16x210xf32>
    %174 = arith.mulf %172, %173 : vector<16x210xf32>
    %175 = arith.addf %169, %174 : vector<16x210xf32>
    %176 = arith.maximumf %120, %175 : vector<16x210xf32>
    %cst_92 = arith.constant 0.000000e+00 : f32
    %177 = vector.broadcast %cst_92 : f32 to vector<16x210xf32>
    %c0_93 = arith.constant 0 : index
    %c3_94 = arith.constant 3 : index
    %c0_95 = arith.constant 0 : index
    %178 = vector.load %arg1[%c0_93, %c3_94, %c0_95] : memref<2x4x256xf32, #tpu.memory_space<vmem>>, vector<1x1x210xf32>
    %179 = vector.shape_cast %178 : vector<1x1x210xf32> to vector<1x210xf32>
    %180 = vector.broadcast %1 : vector<16x1xf32> to vector<16x210xf32>
    %181 = vector.broadcast %179 : vector<1x210xf32> to vector<16x210xf32>
    %182 = arith.mulf %180, %181 : vector<16x210xf32>
    %183 = arith.addf %177, %182 : vector<16x210xf32>
    %c0_96 = arith.constant 0 : index
    %c2_97 = arith.constant 2 : index
    %c1_98 = arith.constant 1 : index
    %184 = vector.load %arg1[%c0_96, %c2_97, %c1_98] : memref<2x4x256xf32, #tpu.memory_space<vmem>>, vector<1x1x210xf32>
    %185 = vector.shape_cast %184 : vector<1x1x210xf32> to vector<1x210xf32>
    %186 = vector.broadcast %2 : vector<16x1xf32> to vector<16x210xf32>
    %187 = vector.broadcast %185 : vector<1x210xf32> to vector<16x210xf32>
    %188 = arith.mulf %186, %187 : vector<16x210xf32>
    %189 = arith.addf %183, %188 : vector<16x210xf32>
    %c0_99 = arith.constant 0 : index
    %c3_100 = arith.constant 3 : index
    %c1_101 = arith.constant 1 : index
    %190 = vector.load %arg1[%c0_99, %c3_100, %c1_101] : memref<2x4x256xf32, #tpu.memory_space<vmem>>, vector<1x1x210xf32>
    %191 = vector.shape_cast %190 : vector<1x1x210xf32> to vector<1x210xf32>
    %192 = vector.broadcast %3 : vector<16x1xf32> to vector<16x210xf32>
    %193 = vector.broadcast %191 : vector<1x210xf32> to vector<16x210xf32>
    %194 = arith.mulf %192, %193 : vector<16x210xf32>
    %195 = arith.addf %189, %194 : vector<16x210xf32>
    %c0_102 = arith.constant 0 : index
    %c1_103 = arith.constant 1 : index
    %c15_104 = arith.constant 15 : index
    %196 = vector.load %arg1[%c0_102, %c1_103, %c15_104] : memref<2x4x256xf32, #tpu.memory_space<vmem>>, vector<1x1x210xf32>
    %197 = vector.shape_cast %196 : vector<1x1x210xf32> to vector<1x210xf32>
    %198 = vector.broadcast %4 : vector<16x1xf32> to vector<16x210xf32>
    %199 = vector.broadcast %197 : vector<1x210xf32> to vector<16x210xf32>
    %200 = arith.mulf %198, %199 : vector<16x210xf32>
    %201 = arith.addf %195, %200 : vector<16x210xf32>
    %c0_105 = arith.constant 0 : index
    %c0_106 = arith.constant 0 : index
    %c16_107 = arith.constant 16 : index
    %202 = vector.load %arg1[%c0_105, %c0_106, %c16_107] : memref<2x4x256xf32, #tpu.memory_space<vmem>>, vector<1x1x210xf32>
    %203 = vector.shape_cast %202 : vector<1x1x210xf32> to vector<1x210xf32>
    %204 = vector.broadcast %5 : vector<16x1xf32> to vector<16x210xf32>
    %205 = vector.broadcast %203 : vector<1x210xf32> to vector<16x210xf32>
    %206 = arith.mulf %204, %205 : vector<16x210xf32>
    %207 = arith.addf %201, %206 : vector<16x210xf32>
    %c0_108 = arith.constant 0 : index
    %c1_109 = arith.constant 1 : index
    %c16_110 = arith.constant 16 : index
    %208 = vector.load %arg1[%c0_108, %c1_109, %c16_110] : memref<2x4x256xf32, #tpu.memory_space<vmem>>, vector<1x1x210xf32>
    %209 = vector.shape_cast %208 : vector<1x1x210xf32> to vector<1x210xf32>
    %210 = vector.broadcast %6 : vector<16x1xf32> to vector<16x210xf32>
    %211 = vector.broadcast %209 : vector<1x210xf32> to vector<16x210xf32>
    %212 = arith.mulf %210, %211 : vector<16x210xf32>
    %213 = arith.addf %207, %212 : vector<16x210xf32>
    %c0_111 = arith.constant 0 : index
    %c3_112 = arith.constant 3 : index
    %c15_113 = arith.constant 15 : index
    %214 = vector.load %arg1[%c0_111, %c3_112, %c15_113] : memref<2x4x256xf32, #tpu.memory_space<vmem>>, vector<1x1x210xf32>
    %215 = vector.shape_cast %214 : vector<1x1x210xf32> to vector<1x210xf32>
    %216 = vector.broadcast %7 : vector<16x1xf32> to vector<16x210xf32>
    %217 = vector.broadcast %215 : vector<1x210xf32> to vector<16x210xf32>
    %218 = arith.mulf %216, %217 : vector<16x210xf32>
    %219 = arith.addf %213, %218 : vector<16x210xf32>
    %c0_114 = arith.constant 0 : index
    %c2_115 = arith.constant 2 : index
    %c16_116 = arith.constant 16 : index
    %220 = vector.load %arg1[%c0_114, %c2_115, %c16_116] : memref<2x4x256xf32, #tpu.memory_space<vmem>>, vector<1x1x210xf32>
    %221 = vector.shape_cast %220 : vector<1x1x210xf32> to vector<1x210xf32>
    %222 = vector.broadcast %8 : vector<16x1xf32> to vector<16x210xf32>
    %223 = vector.broadcast %221 : vector<1x210xf32> to vector<16x210xf32>
    %224 = arith.mulf %222, %223 : vector<16x210xf32>
    %225 = arith.addf %219, %224 : vector<16x210xf32>
    %c0_117 = arith.constant 0 : index
    %c3_118 = arith.constant 3 : index
    %c16_119 = arith.constant 16 : index
    %226 = vector.load %arg1[%c0_117, %c3_118, %c16_119] : memref<2x4x256xf32, #tpu.memory_space<vmem>>, vector<1x1x210xf32>
    %227 = vector.shape_cast %226 : vector<1x1x210xf32> to vector<1x210xf32>
    %228 = vector.broadcast %9 : vector<16x1xf32> to vector<16x210xf32>
    %229 = vector.broadcast %227 : vector<1x210xf32> to vector<16x210xf32>
    %230 = arith.mulf %228, %229 : vector<16x210xf32>
    %231 = arith.addf %225, %230 : vector<16x210xf32>
    %232 = arith.maximumf %176, %231 : vector<16x210xf32>
    %233 = vector.broadcast %0 : vector<16x1xf32> to vector<16x210xf32>
    %234 = arith.addf %232, %233 : vector<16x210xf32>
    %cst_120 = arith.constant 0.000000e+00 : f32
    %235 = vector.broadcast %cst_120 : f32 to vector<16x210xf32>
    %236 = arith.maximumf %234, %235 : vector<16x210xf32>
    %237 = arith.truncf %236 : vector<16x210xf32> to vector<16x210xbf16>
    %c0_121 = arith.constant 0 : index
    %c0_122 = arith.constant 0 : index
    %c0_123 = arith.constant 0 : index
    %238 = vector.load %arg4[%c0_121, %c0_122, %c0_123] : memref<2x16x210xbf16, #tpu.memory_space<vmem>>, vector<1x16x210xbf16>
    %239 = vector.shape_cast %238 : vector<1x16x210xbf16> to vector<16x210xbf16>
    %240 = vector.shape_cast %237 : vector<16x210xbf16> to vector<1x16x210xbf16>
    tpu.vector_store %arg4[%c0_121, %c0_122, %c0_123], %240 {strides = array<i32>} : memref<2x16x210xbf16, #tpu.memory_space<vmem>>, vector<1x16x210xbf16>,
    %cst_124 = arith.constant 0.000000e+00 : f32
    %241 = vector.broadcast %cst_124 : f32 to vector<16x210xf32>
    %c1_125 = arith.constant 1 : index
    %c0_126 = arith.constant 0 : index
    %c0_127 = arith.constant 0 : index
    %242 = vector.load %arg1[%c1_125, %c0_126, %c0_127] : memref<2x4x256xf32, #tpu.memory_space<vmem>>, vector<1x1x210xf32>
    %243 = vector.shape_cast %242 : vector<1x1x210xf32> to vector<1x210xf32>
    %244 = vector.broadcast %1 : vector<16x1xf32> to vector<16x210xf32>
    %245 = vector.broadcast %243 : vector<1x210xf32> to vector<16x210xf32>
    %246 = arith.mulf %244, %245 : vector<16x210xf32>
    %247 = arith.addf %241, %246 : vector<16x210xf32>
    %c1_128 = arith.constant 1 : index
    %c1_129 = arith.constant 1 : index
    %c0_130 = arith.constant 0 : index
    %248 = vector.load %arg1[%c1_128, %c1_129, %c0_130] : memref<2x4x256xf32, #tpu.memory_space<vmem>>, vector<1x1x210xf32>
    %249 = vector.shape_cast %248 : vector<1x1x210xf32> to vector<1x210xf32>
    %250 = vector.broadcast %2 : vector<16x1xf32> to vector<16x210xf32>
    %251 = vector.broadcast %249 : vector<1x210xf32> to vector<16x210xf32>
    %252 = arith.mulf %250, %251 : vector<16x210xf32>
    %253 = arith.addf %247, %252 : vector<16x210xf32>
    %c1_131 = arith.constant 1 : index
    %c0_132 = arith.constant 0 : index
    %c1_133 = arith.constant 1 : index
    %254 = vector.load %arg1[%c1_131, %c0_132, %c1_133] : memref<2x4x256xf32, #tpu.memory_space<vmem>>, vector<1x1x210xf32>
    %255 = vector.shape_cast %254 : vector<1x1x210xf32> to vector<1x210xf32>
    %256 = vector.broadcast %3 : vector<16x1xf32> to vector<16x210xf32>
    %257 = vector.broadcast %255 : vector<1x210xf32> to vector<16x210xf32>
    %258 = arith.mulf %256, %257 : vector<16x210xf32>
    %259 = arith.addf %253, %258 : vector<16x210xf32>
    %c1_134 = arith.constant 1 : index
    %c2_135 = arith.constant 2 : index
    %c0_136 = arith.constant 0 : index
    %260 = vector.load %arg1[%c1_134, %c2_135, %c0_136] : memref<2x4x256xf32, #tpu.memory_space<vmem>>, vector<1x1x210xf32>
    %261 = vector.shape_cast %260 : vector<1x1x210xf32> to vector<1x210xf32>
    %262 = vector.broadcast %4 : vector<16x1xf32> to vector<16x210xf32>
    %263 = vector.broadcast %261 : vector<1x210xf32> to vector<16x210xf32>
    %264 = arith.mulf %262, %263 : vector<16x210xf32>
    %265 = arith.addf %259, %264 : vector<16x210xf32>
    %c1_137 = arith.constant 1 : index
    %c3_138 = arith.constant 3 : index
    %c0_139 = arith.constant 0 : index
    %266 = vector.load %arg1[%c1_137, %c3_138, %c0_139] : memref<2x4x256xf32, #tpu.memory_space<vmem>>, vector<1x1x210xf32>
    %267 = vector.shape_cast %266 : vector<1x1x210xf32> to vector<1x210xf32>
    %268 = vector.broadcast %5 : vector<16x1xf32> to vector<16x210xf32>
    %269 = vector.broadcast %267 : vector<1x210xf32> to vector<16x210xf32>
    %270 = arith.mulf %268, %269 : vector<16x210xf32>
    %271 = arith.addf %265, %270 : vector<16x210xf32>
    %c1_140 = arith.constant 1 : index
    %c2_141 = arith.constant 2 : index
    %c1_142 = arith.constant 1 : index
    %272 = vector.load %arg1[%c1_140, %c2_141, %c1_142] : memref<2x4x256xf32, #tpu.memory_space<vmem>>, vector<1x1x210xf32>
    %273 = vector.shape_cast %272 : vector<1x1x210xf32> to vector<1x210xf32>
    %274 = vector.broadcast %6 : vector<16x1xf32> to vector<16x210xf32>
    %275 = vector.broadcast %273 : vector<1x210xf32> to vector<16x210xf32>
    %276 = arith.mulf %274, %275 : vector<16x210xf32>
    %277 = arith.addf %271, %276 : vector<16x210xf32>
    %c1_143 = arith.constant 1 : index
    %c0_144 = arith.constant 0 : index
    %c15_145 = arith.constant 15 : index
    %278 = vector.load %arg1[%c1_143, %c0_144, %c15_145] : memref<2x4x256xf32, #tpu.memory_space<vmem>>, vector<1x1x210xf32>
    %279 = vector.shape_cast %278 : vector<1x1x210xf32> to vector<1x210xf32>
    %280 = vector.broadcast %7 : vector<16x1xf32> to vector<16x210xf32>
    %281 = vector.broadcast %279 : vector<1x210xf32> to vector<16x210xf32>
    %282 = arith.mulf %280, %281 : vector<16x210xf32>
    %283 = arith.addf %277, %282 : vector<16x210xf32>
    %c1_146 = arith.constant 1 : index
    %c1_147 = arith.constant 1 : index
    %c15_148 = arith.constant 15 : index
    %284 = vector.load %arg1[%c1_146, %c1_147, %c15_148] : memref<2x4x256xf32, #tpu.memory_space<vmem>>, vector<1x1x210xf32>
    %285 = vector.shape_cast %284 : vector<1x1x210xf32> to vector<1x210xf32>
    %286 = vector.broadcast %8 : vector<16x1xf32> to vector<16x210xf32>
    %287 = vector.broadcast %285 : vector<1x210xf32> to vector<16x210xf32>
    %288 = arith.mulf %286, %287 : vector<16x210xf32>
    %289 = arith.addf %283, %288 : vector<16x210xf32>
    %c1_149 = arith.constant 1 : index
    %c0_150 = arith.constant 0 : index
    %c16_151 = arith.constant 16 : index
    %290 = vector.load %arg1[%c1_149, %c0_150, %c16_151] : memref<2x4x256xf32, #tpu.memory_space<vmem>>, vector<1x1x210xf32>
    %291 = vector.shape_cast %290 : vector<1x1x210xf32> to vector<1x210xf32>
    %292 = vector.broadcast %9 : vector<16x1xf32> to vector<16x210xf32>
    %293 = vector.broadcast %291 : vector<1x210xf32> to vector<16x210xf32>
    %294 = arith.mulf %292, %293 : vector<16x210xf32>
    %295 = arith.addf %289, %294 : vector<16x210xf32>
    %cst_152 = arith.constant 0.000000e+00 : f32
    %296 = vector.broadcast %cst_152 : f32 to vector<16x210xf32>
    %c1_153 = arith.constant 1 : index
    %c1_154 = arith.constant 1 : index
    %c0_155 = arith.constant 0 : index
    %297 = vector.load %arg1[%c1_153, %c1_154, %c0_155] : memref<2x4x256xf32, #tpu.memory_space<vmem>>, vector<1x1x210xf32>
    %298 = vector.shape_cast %297 : vector<1x1x210xf32> to vector<1x210xf32>
    %299 = vector.broadcast %1 : vector<16x1xf32> to vector<16x210xf32>
    %300 = vector.broadcast %298 : vector<1x210xf32> to vector<16x210xf32>
    %301 = arith.mulf %299, %300 : vector<16x210xf32>
    %302 = arith.addf %296, %301 : vector<16x210xf32>
    %c1_156 = arith.constant 1 : index
    %c0_157 = arith.constant 0 : index
    %c1_158 = arith.constant 1 : index
    %303 = vector.load %arg1[%c1_156, %c0_157, %c1_158] : memref<2x4x256xf32, #tpu.memory_space<vmem>>, vector<1x1x210xf32>
    %304 = vector.shape_cast %303 : vector<1x1x210xf32> to vector<1x210xf32>
    %305 = vector.broadcast %2 : vector<16x1xf32> to vector<16x210xf32>
    %306 = vector.broadcast %304 : vector<1x210xf32> to vector<16x210xf32>
    %307 = arith.mulf %305, %306 : vector<16x210xf32>
    %308 = arith.addf %302, %307 : vector<16x210xf32>
    %c1_159 = arith.constant 1 : index
    %c1_160 = arith.constant 1 : index
    %c1_161 = arith.constant 1 : index
    %309 = vector.load %arg1[%c1_159, %c1_160, %c1_161] : memref<2x4x256xf32, #tpu.memory_space<vmem>>, vector<1x1x210xf32>
    %310 = vector.shape_cast %309 : vector<1x1x210xf32> to vector<1x210xf32>
    %311 = vector.broadcast %3 : vector<16x1xf32> to vector<16x210xf32>
    %312 = vector.broadcast %310 : vector<1x210xf32> to vector<16x210xf32>
    %313 = arith.mulf %311, %312 : vector<16x210xf32>
    %314 = arith.addf %308, %313 : vector<16x210xf32>
    %c1_162 = arith.constant 1 : index
    %c3_163 = arith.constant 3 : index
    %c0_164 = arith.constant 0 : index
    %315 = vector.load %arg1[%c1_162, %c3_163, %c0_164] : memref<2x4x256xf32, #tpu.memory_space<vmem>>, vector<1x1x210xf32>
    %316 = vector.shape_cast %315 : vector<1x1x210xf32> to vector<1x210xf32>
    %317 = vector.broadcast %4 : vector<16x1xf32> to vector<16x210xf32>
    %318 = vector.broadcast %316 : vector<1x210xf32> to vector<16x210xf32>
    %319 = arith.mulf %317, %318 : vector<16x210xf32>
    %320 = arith.addf %314, %319 : vector<16x210xf32>
    %c1_165 = arith.constant 1 : index
    %c2_166 = arith.constant 2 : index
    %c1_167 = arith.constant 1 : index
    %321 = vector.load %arg1[%c1_165, %c2_166, %c1_167] : memref<2x4x256xf32, #tpu.memory_space<vmem>>, vector<1x1x210xf32>
    %322 = vector.shape_cast %321 : vector<1x1x210xf32> to vector<1x210xf32>
    %323 = vector.broadcast %5 : vector<16x1xf32> to vector<16x210xf32>
    %324 = vector.broadcast %322 : vector<1x210xf32> to vector<16x210xf32>
    %325 = arith.mulf %323, %324 : vector<16x210xf32>
    %326 = arith.addf %320, %325 : vector<16x210xf32>
    %c1_168 = arith.constant 1 : index
    %c3_169 = arith.constant 3 : index
    %c1_170 = arith.constant 1 : index
    %327 = vector.load %arg1[%c1_168, %c3_169, %c1_170] : memref<2x4x256xf32, #tpu.memory_space<vmem>>, vector<1x1x210xf32>
    %328 = vector.shape_cast %327 : vector<1x1x210xf32> to vector<1x210xf32>
    %329 = vector.broadcast %6 : vector<16x1xf32> to vector<16x210xf32>
    %330 = vector.broadcast %328 : vector<1x210xf32> to vector<16x210xf32>
    %331 = arith.mulf %329, %330 : vector<16x210xf32>
    %332 = arith.addf %326, %331 : vector<16x210xf32>
    %c1_171 = arith.constant 1 : index
    %c1_172 = arith.constant 1 : index
    %c15_173 = arith.constant 15 : index
    %333 = vector.load %arg1[%c1_171, %c1_172, %c15_173] : memref<2x4x256xf32, #tpu.memory_space<vmem>>, vector<1x1x210xf32>
    %334 = vector.shape_cast %333 : vector<1x1x210xf32> to vector<1x210xf32>
    %335 = vector.broadcast %7 : vector<16x1xf32> to vector<16x210xf32>
    %336 = vector.broadcast %334 : vector<1x210xf32> to vector<16x210xf32>
    %337 = arith.mulf %335, %336 : vector<16x210xf32>
    %338 = arith.addf %332, %337 : vector<16x210xf32>
    %c1_174 = arith.constant 1 : index
    %c0_175 = arith.constant 0 : index
    %c16_176 = arith.constant 16 : index
    %339 = vector.load %arg1[%c1_174, %c0_175, %c16_176] : memref<2x4x256xf32, #tpu.memory_space<vmem>>, vector<1x1x210xf32>
    %340 = vector.shape_cast %339 : vector<1x1x210xf32> to vector<1x210xf32>
    %341 = vector.broadcast %8 : vector<16x1xf32> to vector<16x210xf32>
    %342 = vector.broadcast %340 : vector<1x210xf32> to vector<16x210xf32>
    %343 = arith.mulf %341, %342 : vector<16x210xf32>
    %344 = arith.addf %338, %343 : vector<16x210xf32>
    %c1_177 = arith.constant 1 : index
    %c1_178 = arith.constant 1 : index
    %c16_179 = arith.constant 16 : index
    %345 = vector.load %arg1[%c1_177, %c1_178, %c16_179] : memref<2x4x256xf32, #tpu.memory_space<vmem>>, vector<1x1x210xf32>
    %346 = vector.shape_cast %345 : vector<1x1x210xf32> to vector<1x210xf32>
    %347 = vector.broadcast %9 : vector<16x1xf32> to vector<16x210xf32>
    %348 = vector.broadcast %346 : vector<1x210xf32> to vector<16x210xf32>
    %349 = arith.mulf %347, %348 : vector<16x210xf32>
    %350 = arith.addf %344, %349 : vector<16x210xf32>
    %351 = arith.maximumf %295, %350 : vector<16x210xf32>
    %cst_180 = arith.constant 0.000000e+00 : f32
    %352 = vector.broadcast %cst_180 : f32 to vector<16x210xf32>
    %c1_181 = arith.constant 1 : index
    %c2_182 = arith.constant 2 : index
    %c0_183 = arith.constant 0 : index
    %353 = vector.load %arg1[%c1_181, %c2_182, %c0_183] : memref<2x4x256xf32, #tpu.memory_space<vmem>>, vector<1x1x210xf32>
    %354 = vector.shape_cast %353 : vector<1x1x210xf32> to vector<1x210xf32>
    %355 = vector.broadcast %1 : vector<16x1xf32> to vector<16x210xf32>
    %356 = vector.broadcast %354 : vector<1x210xf32> to vector<16x210xf32>
    %357 = arith.mulf %355, %356 : vector<16x210xf32>
    %358 = arith.addf %352, %357 : vector<16x210xf32>
    %c1_184 = arith.constant 1 : index
    %c3_185 = arith.constant 3 : index
    %c0_186 = arith.constant 0 : index
    %359 = vector.load %arg1[%c1_184, %c3_185, %c0_186] : memref<2x4x256xf32, #tpu.memory_space<vmem>>, vector<1x1x210xf32>
    %360 = vector.shape_cast %359 : vector<1x1x210xf32> to vector<1x210xf32>
    %361 = vector.broadcast %2 : vector<16x1xf32> to vector<16x210xf32>
    %362 = vector.broadcast %360 : vector<1x210xf32> to vector<16x210xf32>
    %363 = arith.mulf %361, %362 : vector<16x210xf32>
    %364 = arith.addf %358, %363 : vector<16x210xf32>
    %c1_187 = arith.constant 1 : index
    %c2_188 = arith.constant 2 : index
    %c1_189 = arith.constant 1 : index
    %365 = vector.load %arg1[%c1_187, %c2_188, %c1_189] : memref<2x4x256xf32, #tpu.memory_space<vmem>>, vector<1x1x210xf32>
    %366 = vector.shape_cast %365 : vector<1x1x210xf32> to vector<1x210xf32>
    %367 = vector.broadcast %3 : vector<16x1xf32> to vector<16x210xf32>
    %368 = vector.broadcast %366 : vector<1x210xf32> to vector<16x210xf32>
    %369 = arith.mulf %367, %368 : vector<16x210xf32>
    %370 = arith.addf %364, %369 : vector<16x210xf32>
    %c1_190 = arith.constant 1 : index
    %c0_191 = arith.constant 0 : index
    %c15_192 = arith.constant 15 : index
    %371 = vector.load %arg1[%c1_190, %c0_191, %c15_192] : memref<2x4x256xf32, #tpu.memory_space<vmem>>, vector<1x1x210xf32>
    %372 = vector.shape_cast %371 : vector<1x1x210xf32> to vector<1x210xf32>
    %373 = vector.broadcast %4 : vector<16x1xf32> to vector<16x210xf32>
    %374 = vector.broadcast %372 : vector<1x210xf32> to vector<16x210xf32>
    %375 = arith.mulf %373, %374 : vector<16x210xf32>
    %376 = arith.addf %370, %375 : vector<16x210xf32>
    %c1_193 = arith.constant 1 : index
    %c1_194 = arith.constant 1 : index
    %c15_195 = arith.constant 15 : index
    %377 = vector.load %arg1[%c1_193, %c1_194, %c15_195] : memref<2x4x256xf32, #tpu.memory_space<vmem>>, vector<1x1x210xf32>
    %378 = vector.shape_cast %377 : vector<1x1x210xf32> to vector<1x210xf32>
    %379 = vector.broadcast %5 : vector<16x1xf32> to vector<16x210xf32>
    %380 = vector.broadcast %378 : vector<1x210xf32> to vector<16x210xf32>
    %381 = arith.mulf %379, %380 : vector<16x210xf32>
    %382 = arith.addf %376, %381 : vector<16x210xf32>
    %c1_196 = arith.constant 1 : index
    %c0_197 = arith.constant 0 : index
    %c16_198 = arith.constant 16 : index
    %383 = vector.load %arg1[%c1_196, %c0_197, %c16_198] : memref<2x4x256xf32, #tpu.memory_space<vmem>>, vector<1x1x210xf32>
    %384 = vector.shape_cast %383 : vector<1x1x210xf32> to vector<1x210xf32>
    %385 = vector.broadcast %6 : vector<16x1xf32> to vector<16x210xf32>
    %386 = vector.broadcast %384 : vector<1x210xf32> to vector<16x210xf32>
    %387 = arith.mulf %385, %386 : vector<16x210xf32>
    %388 = arith.addf %382, %387 : vector<16x210xf32>
    %c1_199 = arith.constant 1 : index
    %c2_200 = arith.constant 2 : index
    %c15_201 = arith.constant 15 : index
    %389 = vector.load %arg1[%c1_199, %c2_200, %c15_201] : memref<2x4x256xf32, #tpu.memory_space<vmem>>, vector<1x1x210xf32>
    %390 = vector.shape_cast %389 : vector<1x1x210xf32> to vector<1x210xf32>
    %391 = vector.broadcast %7 : vector<16x1xf32> to vector<16x210xf32>
    %392 = vector.broadcast %390 : vector<1x210xf32> to vector<16x210xf32>
    %393 = arith.mulf %391, %392 : vector<16x210xf32>
    %394 = arith.addf %388, %393 : vector<16x210xf32>
    %c1_202 = arith.constant 1 : index
    %c3_203 = arith.constant 3 : index
    %c15_204 = arith.constant 15 : index
    %395 = vector.load %arg1[%c1_202, %c3_203, %c15_204] : memref<2x4x256xf32, #tpu.memory_space<vmem>>, vector<1x1x210xf32>
    %396 = vector.shape_cast %395 : vector<1x1x210xf32> to vector<1x210xf32>
    %397 = vector.broadcast %8 : vector<16x1xf32> to vector<16x210xf32>
    %398 = vector.broadcast %396 : vector<1x210xf32> to vector<16x210xf32>
    %399 = arith.mulf %397, %398 : vector<16x210xf32>
    %400 = arith.addf %394, %399 : vector<16x210xf32>
    %c1_205 = arith.constant 1 : index
    %c2_206 = arith.constant 2 : index
    %c16_207 = arith.constant 16 : index
    %401 = vector.load %arg1[%c1_205, %c2_206, %c16_207] : memref<2x4x256xf32, #tpu.memory_space<vmem>>, vector<1x1x210xf32>
    %402 = vector.shape_cast %401 : vector<1x1x210xf32> to vector<1x210xf32>
    %403 = vector.broadcast %9 : vector<16x1xf32> to vector<16x210xf32>
    %404 = vector.broadcast %402 : vector<1x210xf32> to vector<16x210xf32>
    %405 = arith.mulf %403, %404 : vector<16x210xf32>
    %406 = arith.addf %400, %405 : vector<16x210xf32>
    %407 = arith.maximumf %351, %406 : vector<16x210xf32>
    %cst_208 = arith.constant 0.000000e+00 : f32
    %408 = vector.broadcast %cst_208 : f32 to vector<16x210xf32>
    %c1_209 = arith.constant 1 : index
    %c3_210 = arith.constant 3 : index
    %c0_211 = arith.constant 0 : index
    %409 = vector.load %arg1[%c1_209, %c3_210, %c0_211] : memref<2x4x256xf32, #tpu.memory_space<vmem>>, vector<1x1x210xf32>
    %410 = vector.shape_cast %409 : vector<1x1x210xf32> to vector<1x210xf32>
    %411 = vector.broadcast %1 : vector<16x1xf32> to vector<16x210xf32>
    %412 = vector.broadcast %410 : vector<1x210xf32> to vector<16x210xf32>
    %413 = arith.mulf %411, %412 : vector<16x210xf32>
    %414 = arith.addf %408, %413 : vector<16x210xf32>
    %c1_212 = arith.constant 1 : index
    %c2_213 = arith.constant 2 : index
    %c1_214 = arith.constant 1 : index
    %415 = vector.load %arg1[%c1_212, %c2_213, %c1_214] : memref<2x4x256xf32, #tpu.memory_space<vmem>>, vector<1x1x210xf32>
    %416 = vector.shape_cast %415 : vector<1x1x210xf32> to vector<1x210xf32>
    %417 = vector.broadcast %2 : vector<16x1xf32> to vector<16x210xf32>
    %418 = vector.broadcast %416 : vector<1x210xf32> to vector<16x210xf32>
    %419 = arith.mulf %417, %418 : vector<16x210xf32>
    %420 = arith.addf %414, %419 : vector<16x210xf32>
    %c1_215 = arith.constant 1 : index
    %c3_216 = arith.constant 3 : index
    %c1_217 = arith.constant 1 : index
    %421 = vector.load %arg1[%c1_215, %c3_216, %c1_217] : memref<2x4x256xf32, #tpu.memory_space<vmem>>, vector<1x1x210xf32>
    %422 = vector.shape_cast %421 : vector<1x1x210xf32> to vector<1x210xf32>
    %423 = vector.broadcast %3 : vector<16x1xf32> to vector<16x210xf32>
    %424 = vector.broadcast %422 : vector<1x210xf32> to vector<16x210xf32>
    %425 = arith.mulf %423, %424 : vector<16x210xf32>
    %426 = arith.addf %420, %425 : vector<16x210xf32>
    %c1_218 = arith.constant 1 : index
    %c1_219 = arith.constant 1 : index
    %c15_220 = arith.constant 15 : index
    %427 = vector.load %arg1[%c1_218, %c1_219, %c15_220] : memref<2x4x256xf32, #tpu.memory_space<vmem>>, vector<1x1x210xf32>
    %428 = vector.shape_cast %427 : vector<1x1x210xf32> to vector<1x210xf32>
    %429 = vector.broadcast %4 : vector<16x1xf32> to vector<16x210xf32>
    %430 = vector.broadcast %428 : vector<1x210xf32> to vector<16x210xf32>
    %431 = arith.mulf %429, %430 : vector<16x210xf32>
    %432 = arith.addf %426, %431 : vector<16x210xf32>
    %c1_221 = arith.constant 1 : index
    %c0_222 = arith.constant 0 : index
    %c16_223 = arith.constant 16 : index
    %433 = vector.load %arg1[%c1_221, %c0_222, %c16_223] : memref<2x4x256xf32, #tpu.memory_space<vmem>>, vector<1x1x210xf32>
    %434 = vector.shape_cast %433 : vector<1x1x210xf32> to vector<1x210xf32>
    %435 = vector.broadcast %5 : vector<16x1xf32> to vector<16x210xf32>
    %436 = vector.broadcast %434 : vector<1x210xf32> to vector<16x210xf32>
    %437 = arith.mulf %435, %436 : vector<16x210xf32>
    %438 = arith.addf %432, %437 : vector<16x210xf32>
    %c1_224 = arith.constant 1 : index
    %c1_225 = arith.constant 1 : index
    %c16_226 = arith.constant 16 : index
    %439 = vector.load %arg1[%c1_224, %c1_225, %c16_226] : memref<2x4x256xf32, #tpu.memory_space<vmem>>, vector<1x1x210xf32>
    %440 = vector.shape_cast %439 : vector<1x1x210xf32> to vector<1x210xf32>
    %441 = vector.broadcast %6 : vector<16x1xf32> to vector<16x210xf32>
    %442 = vector.broadcast %440 : vector<1x210xf32> to vector<16x210xf32>
    %443 = arith.mulf %441, %442 : vector<16x210xf32>
    %444 = arith.addf %438, %443 : vector<16x210xf32>
    %c1_227 = arith.constant 1 : index
    %c3_228 = arith.constant 3 : index
    %c15_229 = arith.constant 15 : index
    %445 = vector.load %arg1[%c1_227, %c3_228, %c15_229] : memref<2x4x256xf32, #tpu.memory_space<vmem>>, vector<1x1x210xf32>
    %446 = vector.shape_cast %445 : vector<1x1x210xf32> to vector<1x210xf32>
    %447 = vector.broadcast %7 : vector<16x1xf32> to vector<16x210xf32>
    %448 = vector.broadcast %446 : vector<1x210xf32> to vector<16x210xf32>
    %449 = arith.mulf %447, %448 : vector<16x210xf32>
    %450 = arith.addf %444, %449 : vector<16x210xf32>
    %c1_230 = arith.constant 1 : index
    %c2_231 = arith.constant 2 : index
    %c16_232 = arith.constant 16 : index
    %451 = vector.load %arg1[%c1_230, %c2_231, %c16_232] : memref<2x4x256xf32, #tpu.memory_space<vmem>>, vector<1x1x210xf32>
    %452 = vector.shape_cast %451 : vector<1x1x210xf32> to vector<1x210xf32>
    %453 = vector.broadcast %8 : vector<16x1xf32> to vector<16x210xf32>
    %454 = vector.broadcast %452 : vector<1x210xf32> to vector<16x210xf32>
    %455 = arith.mulf %453, %454 : vector<16x210xf32>
    %456 = arith.addf %450, %455 : vector<16x210xf32>
    %c1_233 = arith.constant 1 : index
    %c3_234 = arith.constant 3 : index
    %c16_235 = arith.constant 16 : index
    %457 = vector.load %arg1[%c1_233, %c3_234, %c16_235] : memref<2x4x256xf32, #tpu.memory_space<vmem>>, vector<1x1x210xf32>
    %458 = vector.shape_cast %457 : vector<1x1x210xf32> to vector<1x210xf32>
    %459 = vector.broadcast %9 : vector<16x1xf32> to vector<16x210xf32>
    %460 = vector.broadcast %458 : vector<1x210xf32> to vector<16x210xf32>
    %461 = arith.mulf %459, %460 : vector<16x210xf32>
    %462 = arith.addf %456, %461 : vector<16x210xf32>
    %463 = arith.maximumf %407, %462 : vector<16x210xf32>
    %464 = vector.broadcast %0 : vector<16x1xf32> to vector<16x210xf32>
    %465 = arith.addf %463, %464 : vector<16x210xf32>
    %cst_236 = arith.constant 0.000000e+00 : f32
    %466 = vector.broadcast %cst_236 : f32 to vector<16x210xf32>
    %467 = arith.maximumf %465, %466 : vector<16x210xf32>
    %468 = arith.truncf %467 : vector<16x210xf32> to vector<16x210xbf16>
    %c1_237 = arith.constant 1 : index
    %c0_238 = arith.constant 0 : index
    %c0_239 = arith.constant 0 : index
    %469 = vector.load %arg4[%c1_237, %c0_238, %c0_239] : memref<2x16x210xbf16, #tpu.memory_space<vmem>>, vector<1x16x210xbf16>
    %470 = vector.shape_cast %469 : vector<1x16x210xbf16> to vector<16x210xbf16>
    %471 = vector.shape_cast %468 : vector<16x210xbf16> to vector<1x16x210xbf16>
    tpu.vector_store %arg4[%c1_237, %c0_238, %c0_239], %471 {strides = array<i32>} : memref<2x16x210xbf16, #tpu.memory_space<vmem>>, vector<1x16x210xbf16>,
    return
  }
  func.func @transform_0(%arg0: i32) -> (i32, i32, i32) {
    %c0_i32 = arith.constant 0 : i32
    %c0_i32_0 = arith.constant 0 : i32
    %c0_i32_1 = arith.constant 0 : i32
    return %arg0, %c0_i32, %c0_i32_0 : i32, i32, i32
  }
  func.func @transform_1(%arg0: i32) -> (i32, i32) {
    %c0_i32 = arith.constant 0 : i32
    %c0_i32_0 = arith.constant 0 : i32
    %c0_i32_1 = arith.constant 0 : i32
    return %c0_i32, %c0_i32_0 : i32, i32
  }
  func.func @transform_2(%arg0: i32) -> (i32, i32) {
    %c0_i32 = arith.constant 0 : i32
    %c0_i32_0 = arith.constant 0 : i32
    %c0_i32_1 = arith.constant 0 : i32
    return %c0_i32, %c0_i32_0 : i32, i32
  }
  func.func @transform_3(%arg0: i32) -> (i32, i32, i32) {
    %c0_i32 = arith.constant 0 : i32
    %c0_i32_0 = arith.constant 0 : i32
    %c0_i32_1 = arith.constant 0 : i32
    return %arg0, %c0_i32, %c0_i32_0 : i32, i32, i32
  }
}

module attributes {stable_mosaic.version = 11 : i64} {
  func.func @conv2_relu_pool_kernel(%arg0: i32, %arg1: memref<2x4x16x128xbf16, #tpu.memory_space<vmem>>, %arg2: memref<32x144xbf16, #tpu.memory_space<vmem>>, %arg3: memref<32x1xf32, #tpu.memory_space<vmem>>, %arg4: memref<2x32x56xbf16, #tpu.memory_space<vmem>>, %arg5: memref<144x56xbf16, #tpu.memory_space<vmem>>) attributes {dimension_semantics = [#tpu.dimension_semantics<parallel>], iteration_bounds = array<i64: 1>, scalar_prefetch = 0 : i64, scratch_operands = 1 : i64, tpu.core_type = #tpu.core_type<tc>, window_params = [{transform_indices = @transform_0, window_bounds = array<i64: 2, 4, 16, 128>}, {pipeline_mode = #tpu.pipeline_mode<synchronous>, transform_indices = @transform_1, window_bounds = array<i64: 32, 144>}, {pipeline_mode = #tpu.pipeline_mode<synchronous>, transform_indices = @transform_2, window_bounds = array<i64: 32, 1>}, {transform_indices = @transform_3, window_bounds = array<i64: 2, 32, 56>}]} {
    %c0 = arith.constant 0 : index
    %c0_0 = arith.constant 0 : index
    %0 = vector.load %arg3[%c0, %c0_0] : memref<32x1xf32, #tpu.memory_space<vmem>>, vector<32x1xf32>
    %c0_1 = arith.constant 0 : index
    %c0_2 = arith.constant 0 : index
    %1 = vector.load %arg2[%c0_1, %c0_2] : memref<32x144xbf16, #tpu.memory_space<vmem>>, vector<32x144xbf16>
    %c0_3 = arith.constant 0 : index
    %c0_4 = arith.constant 0 : index
    %c0_5 = arith.constant 0 : index
    %c0_6 = arith.constant 0 : index
    %2 = vector.load %arg1[%c0_3, %c0_4, %c0_5, %c0_6] : memref<2x4x16x128xbf16, #tpu.memory_space<vmem>>, vector<1x1x16x56xbf16>
    %3 = vector.shape_cast %2 : vector<1x1x16x56xbf16> to vector<16x56xbf16>
    %c0_7 = arith.constant 0 : index
    %c0_8 = arith.constant 0 : index
    %4 = vector.load %arg5[%c0_7, %c0_8] : memref<144x56xbf16, #tpu.memory_space<vmem>>, vector<16x56xbf16>
    tpu.vector_store %arg5[%c0_7, %c0_8], %3 {strides = array<i32>} : memref<144x56xbf16, #tpu.memory_space<vmem>>, vector<16x56xbf16>,
    %c0_9 = arith.constant 0 : index
    %c1 = arith.constant 1 : index
    %c0_10 = arith.constant 0 : index
    %c0_11 = arith.constant 0 : index
    %5 = vector.load %arg1[%c0_9, %c1, %c0_10, %c0_11] : memref<2x4x16x128xbf16, #tpu.memory_space<vmem>>, vector<1x1x16x56xbf16>
    %6 = vector.shape_cast %5 : vector<1x1x16x56xbf16> to vector<16x56xbf16>
    %c16 = arith.constant 16 : index
    %c0_12 = arith.constant 0 : index
    %7 = vector.load %arg5[%c16, %c0_12] : memref<144x56xbf16, #tpu.memory_space<vmem>>, vector<16x56xbf16>
    tpu.vector_store %arg5[%c16, %c0_12], %6 {strides = array<i32>} : memref<144x56xbf16, #tpu.memory_space<vmem>>, vector<16x56xbf16>,
    %c0_13 = arith.constant 0 : index
    %c0_14 = arith.constant 0 : index
    %c0_15 = arith.constant 0 : index
    %c1_16 = arith.constant 1 : index
    %8 = vector.load %arg1[%c0_13, %c0_14, %c0_15, %c1_16] : memref<2x4x16x128xbf16, #tpu.memory_space<vmem>>, vector<1x1x16x56xbf16>
    %9 = vector.shape_cast %8 : vector<1x1x16x56xbf16> to vector<16x56xbf16>
    %c32 = arith.constant 32 : index
    %c0_17 = arith.constant 0 : index
    %10 = vector.load %arg5[%c32, %c0_17] : memref<144x56xbf16, #tpu.memory_space<vmem>>, vector<16x56xbf16>
    tpu.vector_store %arg5[%c32, %c0_17], %9 {strides = array<i32>} : memref<144x56xbf16, #tpu.memory_space<vmem>>, vector<16x56xbf16>,
    %c0_18 = arith.constant 0 : index
    %c2 = arith.constant 2 : index
    %c0_19 = arith.constant 0 : index
    %c0_20 = arith.constant 0 : index
    %11 = vector.load %arg1[%c0_18, %c2, %c0_19, %c0_20] : memref<2x4x16x128xbf16, #tpu.memory_space<vmem>>, vector<1x1x16x56xbf16>
    %12 = vector.shape_cast %11 : vector<1x1x16x56xbf16> to vector<16x56xbf16>
    %c48 = arith.constant 48 : index
    %c0_21 = arith.constant 0 : index
    %13 = vector.load %arg5[%c48, %c0_21] : memref<144x56xbf16, #tpu.memory_space<vmem>>, vector<16x56xbf16>
    tpu.vector_store %arg5[%c48, %c0_21], %12 {strides = array<i32>} : memref<144x56xbf16, #tpu.memory_space<vmem>>, vector<16x56xbf16>,
    %c0_22 = arith.constant 0 : index
    %c3 = arith.constant 3 : index
    %c0_23 = arith.constant 0 : index
    %c0_24 = arith.constant 0 : index
    %14 = vector.load %arg1[%c0_22, %c3, %c0_23, %c0_24] : memref<2x4x16x128xbf16, #tpu.memory_space<vmem>>, vector<1x1x16x56xbf16>
    %15 = vector.shape_cast %14 : vector<1x1x16x56xbf16> to vector<16x56xbf16>
    %c64 = arith.constant 64 : index
    %c0_25 = arith.constant 0 : index
    %16 = vector.load %arg5[%c64, %c0_25] : memref<144x56xbf16, #tpu.memory_space<vmem>>, vector<16x56xbf16>
    tpu.vector_store %arg5[%c64, %c0_25], %15 {strides = array<i32>} : memref<144x56xbf16, #tpu.memory_space<vmem>>, vector<16x56xbf16>,
    %c0_26 = arith.constant 0 : index
    %c2_27 = arith.constant 2 : index
    %c0_28 = arith.constant 0 : index
    %c1_29 = arith.constant 1 : index
    %17 = vector.load %arg1[%c0_26, %c2_27, %c0_28, %c1_29] : memref<2x4x16x128xbf16, #tpu.memory_space<vmem>>, vector<1x1x16x56xbf16>
    %18 = vector.shape_cast %17 : vector<1x1x16x56xbf16> to vector<16x56xbf16>
    %c80 = arith.constant 80 : index
    %c0_30 = arith.constant 0 : index
    %19 = vector.load %arg5[%c80, %c0_30] : memref<144x56xbf16, #tpu.memory_space<vmem>>, vector<16x56xbf16>
    tpu.vector_store %arg5[%c80, %c0_30], %18 {strides = array<i32>} : memref<144x56xbf16, #tpu.memory_space<vmem>>, vector<16x56xbf16>,
    %c0_31 = arith.constant 0 : index
    %c0_32 = arith.constant 0 : index
    %c0_33 = arith.constant 0 : index
    %c8 = arith.constant 8 : index
    %20 = vector.load %arg1[%c0_31, %c0_32, %c0_33, %c8] : memref<2x4x16x128xbf16, #tpu.memory_space<vmem>>, vector<1x1x16x56xbf16>
    %21 = vector.shape_cast %20 : vector<1x1x16x56xbf16> to vector<16x56xbf16>
    %c96 = arith.constant 96 : index
    %c0_34 = arith.constant 0 : index
    %22 = vector.load %arg5[%c96, %c0_34] : memref<144x56xbf16, #tpu.memory_space<vmem>>, vector<16x56xbf16>
    tpu.vector_store %arg5[%c96, %c0_34], %21 {strides = array<i32>} : memref<144x56xbf16, #tpu.memory_space<vmem>>, vector<16x56xbf16>,
    %c0_35 = arith.constant 0 : index
    %c1_36 = arith.constant 1 : index
    %c0_37 = arith.constant 0 : index
    %c8_38 = arith.constant 8 : index
    %23 = vector.load %arg1[%c0_35, %c1_36, %c0_37, %c8_38] : memref<2x4x16x128xbf16, #tpu.memory_space<vmem>>, vector<1x1x16x56xbf16>
    %24 = vector.shape_cast %23 : vector<1x1x16x56xbf16> to vector<16x56xbf16>
    %c112 = arith.constant 112 : index
    %c0_39 = arith.constant 0 : index
    %25 = vector.load %arg5[%c112, %c0_39] : memref<144x56xbf16, #tpu.memory_space<vmem>>, vector<16x56xbf16>
    tpu.vector_store %arg5[%c112, %c0_39], %24 {strides = array<i32>} : memref<144x56xbf16, #tpu.memory_space<vmem>>, vector<16x56xbf16>,
    %c0_40 = arith.constant 0 : index
    %c0_41 = arith.constant 0 : index
    %c0_42 = arith.constant 0 : index
    %c9 = arith.constant 9 : index
    %26 = vector.load %arg1[%c0_40, %c0_41, %c0_42, %c9] : memref<2x4x16x128xbf16, #tpu.memory_space<vmem>>, vector<1x1x16x56xbf16>
    %27 = vector.shape_cast %26 : vector<1x1x16x56xbf16> to vector<16x56xbf16>
    %c128 = arith.constant 128 : index
    %c0_43 = arith.constant 0 : index
    %28 = vector.load %arg5[%c128, %c0_43] : memref<144x56xbf16, #tpu.memory_space<vmem>>, vector<16x56xbf16>
    tpu.vector_store %arg5[%c128, %c0_43], %27 {strides = array<i32>} : memref<144x56xbf16, #tpu.memory_space<vmem>>, vector<16x56xbf16>,
    %c0_44 = arith.constant 0 : index
    %c0_45 = arith.constant 0 : index
    %29 = vector.load %arg5[%c0_44, %c0_45] : memref<144x56xbf16, #tpu.memory_space<vmem>>, vector<144x56xbf16>
    %cst = arith.constant dense<0.000000e+00> : vector<32x56xf32>
    %30 = tpu.matmul %1, %29, %cst {dimension_numbers = #tpu.dot_dimension_numbers<[1], [0], [0], [1], [0, 0, 1, 1], [], []>} : vector<32x144xbf16>, vector<144x56xbf16>, vector<32x56xf32> -> vector<32x56xf32>
    %c0_46 = arith.constant 0 : index
    %c1_47 = arith.constant 1 : index
    %c0_48 = arith.constant 0 : index
    %c0_49 = arith.constant 0 : index
    %31 = vector.load %arg1[%c0_46, %c1_47, %c0_48, %c0_49] : memref<2x4x16x128xbf16, #tpu.memory_space<vmem>>, vector<1x1x16x56xbf16>
    %32 = vector.shape_cast %31 : vector<1x1x16x56xbf16> to vector<16x56xbf16>
    %c0_50 = arith.constant 0 : index
    %c0_51 = arith.constant 0 : index
    %33 = vector.load %arg5[%c0_50, %c0_51] : memref<144x56xbf16, #tpu.memory_space<vmem>>, vector<16x56xbf16>
    tpu.vector_store %arg5[%c0_50, %c0_51], %32 {strides = array<i32>} : memref<144x56xbf16, #tpu.memory_space<vmem>>, vector<16x56xbf16>,
    %c0_52 = arith.constant 0 : index
    %c0_53 = arith.constant 0 : index
    %c0_54 = arith.constant 0 : index
    %c1_55 = arith.constant 1 : index
    %34 = vector.load %arg1[%c0_52, %c0_53, %c0_54, %c1_55] : memref<2x4x16x128xbf16, #tpu.memory_space<vmem>>, vector<1x1x16x56xbf16>
    %35 = vector.shape_cast %34 : vector<1x1x16x56xbf16> to vector<16x56xbf16>
    %c16_56 = arith.constant 16 : index
    %c0_57 = arith.constant 0 : index
    %36 = vector.load %arg5[%c16_56, %c0_57] : memref<144x56xbf16, #tpu.memory_space<vmem>>, vector<16x56xbf16>
    tpu.vector_store %arg5[%c16_56, %c0_57], %35 {strides = array<i32>} : memref<144x56xbf16, #tpu.memory_space<vmem>>, vector<16x56xbf16>,
    %c0_58 = arith.constant 0 : index
    %c1_59 = arith.constant 1 : index
    %c0_60 = arith.constant 0 : index
    %c1_61 = arith.constant 1 : index
    %37 = vector.load %arg1[%c0_58, %c1_59, %c0_60, %c1_61] : memref<2x4x16x128xbf16, #tpu.memory_space<vmem>>, vector<1x1x16x56xbf16>
    %38 = vector.shape_cast %37 : vector<1x1x16x56xbf16> to vector<16x56xbf16>
    %c32_62 = arith.constant 32 : index
    %c0_63 = arith.constant 0 : index
    %39 = vector.load %arg5[%c32_62, %c0_63] : memref<144x56xbf16, #tpu.memory_space<vmem>>, vector<16x56xbf16>
    tpu.vector_store %arg5[%c32_62, %c0_63], %38 {strides = array<i32>} : memref<144x56xbf16, #tpu.memory_space<vmem>>, vector<16x56xbf16>,
    %c0_64 = arith.constant 0 : index
    %c3_65 = arith.constant 3 : index
    %c0_66 = arith.constant 0 : index
    %c0_67 = arith.constant 0 : index
    %40 = vector.load %arg1[%c0_64, %c3_65, %c0_66, %c0_67] : memref<2x4x16x128xbf16, #tpu.memory_space<vmem>>, vector<1x1x16x56xbf16>
    %41 = vector.shape_cast %40 : vector<1x1x16x56xbf16> to vector<16x56xbf16>
    %c48_68 = arith.constant 48 : index
    %c0_69 = arith.constant 0 : index
    %42 = vector.load %arg5[%c48_68, %c0_69] : memref<144x56xbf16, #tpu.memory_space<vmem>>, vector<16x56xbf16>
    tpu.vector_store %arg5[%c48_68, %c0_69], %41 {strides = array<i32>} : memref<144x56xbf16, #tpu.memory_space<vmem>>, vector<16x56xbf16>,
    %c0_70 = arith.constant 0 : index
    %c2_71 = arith.constant 2 : index
    %c0_72 = arith.constant 0 : index
    %c1_73 = arith.constant 1 : index
    %43 = vector.load %arg1[%c0_70, %c2_71, %c0_72, %c1_73] : memref<2x4x16x128xbf16, #tpu.memory_space<vmem>>, vector<1x1x16x56xbf16>
    %44 = vector.shape_cast %43 : vector<1x1x16x56xbf16> to vector<16x56xbf16>
    %c64_74 = arith.constant 64 : index
    %c0_75 = arith.constant 0 : index
    %45 = vector.load %arg5[%c64_74, %c0_75] : memref<144x56xbf16, #tpu.memory_space<vmem>>, vector<16x56xbf16>
    tpu.vector_store %arg5[%c64_74, %c0_75], %44 {strides = array<i32>} : memref<144x56xbf16, #tpu.memory_space<vmem>>, vector<16x56xbf16>,
    %c0_76 = arith.constant 0 : index
    %c3_77 = arith.constant 3 : index
    %c0_78 = arith.constant 0 : index
    %c1_79 = arith.constant 1 : index
    %46 = vector.load %arg1[%c0_76, %c3_77, %c0_78, %c1_79] : memref<2x4x16x128xbf16, #tpu.memory_space<vmem>>, vector<1x1x16x56xbf16>
    %47 = vector.shape_cast %46 : vector<1x1x16x56xbf16> to vector<16x56xbf16>
    %c80_80 = arith.constant 80 : index
    %c0_81 = arith.constant 0 : index
    %48 = vector.load %arg5[%c80_80, %c0_81] : memref<144x56xbf16, #tpu.memory_space<vmem>>, vector<16x56xbf16>
    tpu.vector_store %arg5[%c80_80, %c0_81], %47 {strides = array<i32>} : memref<144x56xbf16, #tpu.memory_space<vmem>>, vector<16x56xbf16>,
    %c0_82 = arith.constant 0 : index
    %c1_83 = arith.constant 1 : index
    %c0_84 = arith.constant 0 : index
    %c8_85 = arith.constant 8 : index
    %49 = vector.load %arg1[%c0_82, %c1_83, %c0_84, %c8_85] : memref<2x4x16x128xbf16, #tpu.memory_space<vmem>>, vector<1x1x16x56xbf16>
    %50 = vector.shape_cast %49 : vector<1x1x16x56xbf16> to vector<16x56xbf16>
    %c96_86 = arith.constant 96 : index
    %c0_87 = arith.constant 0 : index
    %51 = vector.load %arg5[%c96_86, %c0_87] : memref<144x56xbf16, #tpu.memory_space<vmem>>, vector<16x56xbf16>
    tpu.vector_store %arg5[%c96_86, %c0_87], %50 {strides = array<i32>} : memref<144x56xbf16, #tpu.memory_space<vmem>>, vector<16x56xbf16>,
    %c0_88 = arith.constant 0 : index
    %c0_89 = arith.constant 0 : index
    %c0_90 = arith.constant 0 : index
    %c9_91 = arith.constant 9 : index
    %52 = vector.load %arg1[%c0_88, %c0_89, %c0_90, %c9_91] : memref<2x4x16x128xbf16, #tpu.memory_space<vmem>>, vector<1x1x16x56xbf16>
    %53 = vector.shape_cast %52 : vector<1x1x16x56xbf16> to vector<16x56xbf16>
    %c112_92 = arith.constant 112 : index
    %c0_93 = arith.constant 0 : index
    %54 = vector.load %arg5[%c112_92, %c0_93] : memref<144x56xbf16, #tpu.memory_space<vmem>>, vector<16x56xbf16>
    tpu.vector_store %arg5[%c112_92, %c0_93], %53 {strides = array<i32>} : memref<144x56xbf16, #tpu.memory_space<vmem>>, vector<16x56xbf16>,
    %c0_94 = arith.constant 0 : index
    %c1_95 = arith.constant 1 : index
    %c0_96 = arith.constant 0 : index
    %c9_97 = arith.constant 9 : index
    %55 = vector.load %arg1[%c0_94, %c1_95, %c0_96, %c9_97] : memref<2x4x16x128xbf16, #tpu.memory_space<vmem>>, vector<1x1x16x56xbf16>
    %56 = vector.shape_cast %55 : vector<1x1x16x56xbf16> to vector<16x56xbf16>
    %c128_98 = arith.constant 128 : index
    %c0_99 = arith.constant 0 : index
    %57 = vector.load %arg5[%c128_98, %c0_99] : memref<144x56xbf16, #tpu.memory_space<vmem>>, vector<16x56xbf16>
    tpu.vector_store %arg5[%c128_98, %c0_99], %56 {strides = array<i32>} : memref<144x56xbf16, #tpu.memory_space<vmem>>, vector<16x56xbf16>,
    %c0_100 = arith.constant 0 : index
    %c0_101 = arith.constant 0 : index
    %58 = vector.load %arg5[%c0_100, %c0_101] : memref<144x56xbf16, #tpu.memory_space<vmem>>, vector<144x56xbf16>
    %cst_102 = arith.constant dense<0.000000e+00> : vector<32x56xf32>
    %59 = tpu.matmul %1, %58, %cst_102 {dimension_numbers = #tpu.dot_dimension_numbers<[1], [0], [0], [1], [0, 0, 1, 1], [], []>} : vector<32x144xbf16>, vector<144x56xbf16>, vector<32x56xf32> -> vector<32x56xf32>
    %60 = arith.maximumf %30, %59 : vector<32x56xf32>
    %c0_103 = arith.constant 0 : index
    %c2_104 = arith.constant 2 : index
    %c0_105 = arith.constant 0 : index
    %c0_106 = arith.constant 0 : index
    %61 = vector.load %arg1[%c0_103, %c2_104, %c0_105, %c0_106] : memref<2x4x16x128xbf16, #tpu.memory_space<vmem>>, vector<1x1x16x56xbf16>
    %62 = vector.shape_cast %61 : vector<1x1x16x56xbf16> to vector<16x56xbf16>
    %c0_107 = arith.constant 0 : index
    %c0_108 = arith.constant 0 : index
    %63 = vector.load %arg5[%c0_107, %c0_108] : memref<144x56xbf16, #tpu.memory_space<vmem>>, vector<16x56xbf16>
    tpu.vector_store %arg5[%c0_107, %c0_108], %62 {strides = array<i32>} : memref<144x56xbf16, #tpu.memory_space<vmem>>, vector<16x56xbf16>,
    %c0_109 = arith.constant 0 : index
    %c3_110 = arith.constant 3 : index
    %c0_111 = arith.constant 0 : index
    %c0_112 = arith.constant 0 : index
    %64 = vector.load %arg1[%c0_109, %c3_110, %c0_111, %c0_112] : memref<2x4x16x128xbf16, #tpu.memory_space<vmem>>, vector<1x1x16x56xbf16>
    %65 = vector.shape_cast %64 : vector<1x1x16x56xbf16> to vector<16x56xbf16>
    %c16_113 = arith.constant 16 : index
    %c0_114 = arith.constant 0 : index
    %66 = vector.load %arg5[%c16_113, %c0_114] : memref<144x56xbf16, #tpu.memory_space<vmem>>, vector<16x56xbf16>
    tpu.vector_store %arg5[%c16_113, %c0_114], %65 {strides = array<i32>} : memref<144x56xbf16, #tpu.memory_space<vmem>>, vector<16x56xbf16>,
    %c0_115 = arith.constant 0 : index
    %c2_116 = arith.constant 2 : index
    %c0_117 = arith.constant 0 : index
    %c1_118 = arith.constant 1 : index
    %67 = vector.load %arg1[%c0_115, %c2_116, %c0_117, %c1_118] : memref<2x4x16x128xbf16, #tpu.memory_space<vmem>>, vector<1x1x16x56xbf16>
    %68 = vector.shape_cast %67 : vector<1x1x16x56xbf16> to vector<16x56xbf16>
    %c32_119 = arith.constant 32 : index
    %c0_120 = arith.constant 0 : index
    %69 = vector.load %arg5[%c32_119, %c0_120] : memref<144x56xbf16, #tpu.memory_space<vmem>>, vector<16x56xbf16>
    tpu.vector_store %arg5[%c32_119, %c0_120], %68 {strides = array<i32>} : memref<144x56xbf16, #tpu.memory_space<vmem>>, vector<16x56xbf16>,
    %c0_121 = arith.constant 0 : index
    %c0_122 = arith.constant 0 : index
    %c0_123 = arith.constant 0 : index
    %c8_124 = arith.constant 8 : index
    %70 = vector.load %arg1[%c0_121, %c0_122, %c0_123, %c8_124] : memref<2x4x16x128xbf16, #tpu.memory_space<vmem>>, vector<1x1x16x56xbf16>
    %71 = vector.shape_cast %70 : vector<1x1x16x56xbf16> to vector<16x56xbf16>
    %c48_125 = arith.constant 48 : index
    %c0_126 = arith.constant 0 : index
    %72 = vector.load %arg5[%c48_125, %c0_126] : memref<144x56xbf16, #tpu.memory_space<vmem>>, vector<16x56xbf16>
    tpu.vector_store %arg5[%c48_125, %c0_126], %71 {strides = array<i32>} : memref<144x56xbf16, #tpu.memory_space<vmem>>, vector<16x56xbf16>,
    %c0_127 = arith.constant 0 : index
    %c1_128 = arith.constant 1 : index
    %c0_129 = arith.constant 0 : index
    %c8_130 = arith.constant 8 : index
    %73 = vector.load %arg1[%c0_127, %c1_128, %c0_129, %c8_130] : memref<2x4x16x128xbf16, #tpu.memory_space<vmem>>, vector<1x1x16x56xbf16>
    %74 = vector.shape_cast %73 : vector<1x1x16x56xbf16> to vector<16x56xbf16>
    %c64_131 = arith.constant 64 : index
    %c0_132 = arith.constant 0 : index
    %75 = vector.load %arg5[%c64_131, %c0_132] : memref<144x56xbf16, #tpu.memory_space<vmem>>, vector<16x56xbf16>
    tpu.vector_store %arg5[%c64_131, %c0_132], %74 {strides = array<i32>} : memref<144x56xbf16, #tpu.memory_space<vmem>>, vector<16x56xbf16>,
    %c0_133 = arith.constant 0 : index
    %c0_134 = arith.constant 0 : index
    %c0_135 = arith.constant 0 : index
    %c9_136 = arith.constant 9 : index
    %76 = vector.load %arg1[%c0_133, %c0_134, %c0_135, %c9_136] : memref<2x4x16x128xbf16, #tpu.memory_space<vmem>>, vector<1x1x16x56xbf16>
    %77 = vector.shape_cast %76 : vector<1x1x16x56xbf16> to vector<16x56xbf16>
    %c80_137 = arith.constant 80 : index
    %c0_138 = arith.constant 0 : index
    %78 = vector.load %arg5[%c80_137, %c0_138] : memref<144x56xbf16, #tpu.memory_space<vmem>>, vector<16x56xbf16>
    tpu.vector_store %arg5[%c80_137, %c0_138], %77 {strides = array<i32>} : memref<144x56xbf16, #tpu.memory_space<vmem>>, vector<16x56xbf16>,
    %c0_139 = arith.constant 0 : index
    %c2_140 = arith.constant 2 : index
    %c0_141 = arith.constant 0 : index
    %c8_142 = arith.constant 8 : index
    %79 = vector.load %arg1[%c0_139, %c2_140, %c0_141, %c8_142] : memref<2x4x16x128xbf16, #tpu.memory_space<vmem>>, vector<1x1x16x56xbf16>
    %80 = vector.shape_cast %79 : vector<1x1x16x56xbf16> to vector<16x56xbf16>
    %c96_143 = arith.constant 96 : index
    %c0_144 = arith.constant 0 : index
    %81 = vector.load %arg5[%c96_143, %c0_144] : memref<144x56xbf16, #tpu.memory_space<vmem>>, vector<16x56xbf16>
    tpu.vector_store %arg5[%c96_143, %c0_144], %80 {strides = array<i32>} : memref<144x56xbf16, #tpu.memory_space<vmem>>, vector<16x56xbf16>,
    %c0_145 = arith.constant 0 : index
    %c3_146 = arith.constant 3 : index
    %c0_147 = arith.constant 0 : index
    %c8_148 = arith.constant 8 : index
    %82 = vector.load %arg1[%c0_145, %c3_146, %c0_147, %c8_148] : memref<2x4x16x128xbf16, #tpu.memory_space<vmem>>, vector<1x1x16x56xbf16>
    %83 = vector.shape_cast %82 : vector<1x1x16x56xbf16> to vector<16x56xbf16>
    %c112_149 = arith.constant 112 : index
    %c0_150 = arith.constant 0 : index
    %84 = vector.load %arg5[%c112_149, %c0_150] : memref<144x56xbf16, #tpu.memory_space<vmem>>, vector<16x56xbf16>
    tpu.vector_store %arg5[%c112_149, %c0_150], %83 {strides = array<i32>} : memref<144x56xbf16, #tpu.memory_space<vmem>>, vector<16x56xbf16>,
    %c0_151 = arith.constant 0 : index
    %c2_152 = arith.constant 2 : index
    %c0_153 = arith.constant 0 : index
    %c9_154 = arith.constant 9 : index
    %85 = vector.load %arg1[%c0_151, %c2_152, %c0_153, %c9_154] : memref<2x4x16x128xbf16, #tpu.memory_space<vmem>>, vector<1x1x16x56xbf16>
    %86 = vector.shape_cast %85 : vector<1x1x16x56xbf16> to vector<16x56xbf16>
    %c128_155 = arith.constant 128 : index
    %c0_156 = arith.constant 0 : index
    %87 = vector.load %arg5[%c128_155, %c0_156] : memref<144x56xbf16, #tpu.memory_space<vmem>>, vector<16x56xbf16>
    tpu.vector_store %arg5[%c128_155, %c0_156], %86 {strides = array<i32>} : memref<144x56xbf16, #tpu.memory_space<vmem>>, vector<16x56xbf16>,
    %c0_157 = arith.constant 0 : index
    %c0_158 = arith.constant 0 : index
    %88 = vector.load %arg5[%c0_157, %c0_158] : memref<144x56xbf16, #tpu.memory_space<vmem>>, vector<144x56xbf16>
    %cst_159 = arith.constant dense<0.000000e+00> : vector<32x56xf32>
    %89 = tpu.matmul %1, %88, %cst_159 {dimension_numbers = #tpu.dot_dimension_numbers<[1], [0], [0], [1], [0, 0, 1, 1], [], []>} : vector<32x144xbf16>, vector<144x56xbf16>, vector<32x56xf32> -> vector<32x56xf32>
    %90 = arith.maximumf %60, %89 : vector<32x56xf32>
    %c0_160 = arith.constant 0 : index
    %c3_161 = arith.constant 3 : index
    %c0_162 = arith.constant 0 : index
    %c0_163 = arith.constant 0 : index
    %91 = vector.load %arg1[%c0_160, %c3_161, %c0_162, %c0_163] : memref<2x4x16x128xbf16, #tpu.memory_space<vmem>>, vector<1x1x16x56xbf16>
    %92 = vector.shape_cast %91 : vector<1x1x16x56xbf16> to vector<16x56xbf16>
    %c0_164 = arith.constant 0 : index
    %c0_165 = arith.constant 0 : index
    %93 = vector.load %arg5[%c0_164, %c0_165] : memref<144x56xbf16, #tpu.memory_space<vmem>>, vector<16x56xbf16>
    tpu.vector_store %arg5[%c0_164, %c0_165], %92 {strides = array<i32>} : memref<144x56xbf16, #tpu.memory_space<vmem>>, vector<16x56xbf16>,
    %c0_166 = arith.constant 0 : index
    %c2_167 = arith.constant 2 : index
    %c0_168 = arith.constant 0 : index
    %c1_169 = arith.constant 1 : index
    %94 = vector.load %arg1[%c0_166, %c2_167, %c0_168, %c1_169] : memref<2x4x16x128xbf16, #tpu.memory_space<vmem>>, vector<1x1x16x56xbf16>
    %95 = vector.shape_cast %94 : vector<1x1x16x56xbf16> to vector<16x56xbf16>
    %c16_170 = arith.constant 16 : index
    %c0_171 = arith.constant 0 : index
    %96 = vector.load %arg5[%c16_170, %c0_171] : memref<144x56xbf16, #tpu.memory_space<vmem>>, vector<16x56xbf16>
    tpu.vector_store %arg5[%c16_170, %c0_171], %95 {strides = array<i32>} : memref<144x56xbf16, #tpu.memory_space<vmem>>, vector<16x56xbf16>,
    %c0_172 = arith.constant 0 : index
    %c3_173 = arith.constant 3 : index
    %c0_174 = arith.constant 0 : index
    %c1_175 = arith.constant 1 : index
    %97 = vector.load %arg1[%c0_172, %c3_173, %c0_174, %c1_175] : memref<2x4x16x128xbf16, #tpu.memory_space<vmem>>, vector<1x1x16x56xbf16>
    %98 = vector.shape_cast %97 : vector<1x1x16x56xbf16> to vector<16x56xbf16>
    %c32_176 = arith.constant 32 : index
    %c0_177 = arith.constant 0 : index
    %99 = vector.load %arg5[%c32_176, %c0_177] : memref<144x56xbf16, #tpu.memory_space<vmem>>, vector<16x56xbf16>
    tpu.vector_store %arg5[%c32_176, %c0_177], %98 {strides = array<i32>} : memref<144x56xbf16, #tpu.memory_space<vmem>>, vector<16x56xbf16>,
    %c0_178 = arith.constant 0 : index
    %c1_179 = arith.constant 1 : index
    %c0_180 = arith.constant 0 : index
    %c8_181 = arith.constant 8 : index
    %100 = vector.load %arg1[%c0_178, %c1_179, %c0_180, %c8_181] : memref<2x4x16x128xbf16, #tpu.memory_space<vmem>>, vector<1x1x16x56xbf16>
    %101 = vector.shape_cast %100 : vector<1x1x16x56xbf16> to vector<16x56xbf16>
    %c48_182 = arith.constant 48 : index
    %c0_183 = arith.constant 0 : index
    %102 = vector.load %arg5[%c48_182, %c0_183] : memref<144x56xbf16, #tpu.memory_space<vmem>>, vector<16x56xbf16>
    tpu.vector_store %arg5[%c48_182, %c0_183], %101 {strides = array<i32>} : memref<144x56xbf16, #tpu.memory_space<vmem>>, vector<16x56xbf16>,
    %c0_184 = arith.constant 0 : index
    %c0_185 = arith.constant 0 : index
    %c0_186 = arith.constant 0 : index
    %c9_187 = arith.constant 9 : index
    %103 = vector.load %arg1[%c0_184, %c0_185, %c0_186, %c9_187] : memref<2x4x16x128xbf16, #tpu.memory_space<vmem>>, vector<1x1x16x56xbf16>
    %104 = vector.shape_cast %103 : vector<1x1x16x56xbf16> to vector<16x56xbf16>
    %c64_188 = arith.constant 64 : index
    %c0_189 = arith.constant 0 : index
    %105 = vector.load %arg5[%c64_188, %c0_189] : memref<144x56xbf16, #tpu.memory_space<vmem>>, vector<16x56xbf16>
    tpu.vector_store %arg5[%c64_188, %c0_189], %104 {strides = array<i32>} : memref<144x56xbf16, #tpu.memory_space<vmem>>, vector<16x56xbf16>,
    %c0_190 = arith.constant 0 : index
    %c1_191 = arith.constant 1 : index
    %c0_192 = arith.constant 0 : index
    %c9_193 = arith.constant 9 : index
    %106 = vector.load %arg1[%c0_190, %c1_191, %c0_192, %c9_193] : memref<2x4x16x128xbf16, #tpu.memory_space<vmem>>, vector<1x1x16x56xbf16>
    %107 = vector.shape_cast %106 : vector<1x1x16x56xbf16> to vector<16x56xbf16>
    %c80_194 = arith.constant 80 : index
    %c0_195 = arith.constant 0 : index
    %108 = vector.load %arg5[%c80_194, %c0_195] : memref<144x56xbf16, #tpu.memory_space<vmem>>, vector<16x56xbf16>
    tpu.vector_store %arg5[%c80_194, %c0_195], %107 {strides = array<i32>} : memref<144x56xbf16, #tpu.memory_space<vmem>>, vector<16x56xbf16>,
    %c0_196 = arith.constant 0 : index
    %c3_197 = arith.constant 3 : index
    %c0_198 = arith.constant 0 : index
    %c8_199 = arith.constant 8 : index
    %109 = vector.load %arg1[%c0_196, %c3_197, %c0_198, %c8_199] : memref<2x4x16x128xbf16, #tpu.memory_space<vmem>>, vector<1x1x16x56xbf16>
    %110 = vector.shape_cast %109 : vector<1x1x16x56xbf16> to vector<16x56xbf16>
    %c96_200 = arith.constant 96 : index
    %c0_201 = arith.constant 0 : index
    %111 = vector.load %arg5[%c96_200, %c0_201] : memref<144x56xbf16, #tpu.memory_space<vmem>>, vector<16x56xbf16>
    tpu.vector_store %arg5[%c96_200, %c0_201], %110 {strides = array<i32>} : memref<144x56xbf16, #tpu.memory_space<vmem>>, vector<16x56xbf16>,
    %c0_202 = arith.constant 0 : index
    %c2_203 = arith.constant 2 : index
    %c0_204 = arith.constant 0 : index
    %c9_205 = arith.constant 9 : index
    %112 = vector.load %arg1[%c0_202, %c2_203, %c0_204, %c9_205] : memref<2x4x16x128xbf16, #tpu.memory_space<vmem>>, vector<1x1x16x56xbf16>
    %113 = vector.shape_cast %112 : vector<1x1x16x56xbf16> to vector<16x56xbf16>
    %c112_206 = arith.constant 112 : index
    %c0_207 = arith.constant 0 : index
    %114 = vector.load %arg5[%c112_206, %c0_207] : memref<144x56xbf16, #tpu.memory_space<vmem>>, vector<16x56xbf16>
    tpu.vector_store %arg5[%c112_206, %c0_207], %113 {strides = array<i32>} : memref<144x56xbf16, #tpu.memory_space<vmem>>, vector<16x56xbf16>,
    %c0_208 = arith.constant 0 : index
    %c3_209 = arith.constant 3 : index
    %c0_210 = arith.constant 0 : index
    %c9_211 = arith.constant 9 : index
    %115 = vector.load %arg1[%c0_208, %c3_209, %c0_210, %c9_211] : memref<2x4x16x128xbf16, #tpu.memory_space<vmem>>, vector<1x1x16x56xbf16>
    %116 = vector.shape_cast %115 : vector<1x1x16x56xbf16> to vector<16x56xbf16>
    %c128_212 = arith.constant 128 : index
    %c0_213 = arith.constant 0 : index
    %117 = vector.load %arg5[%c128_212, %c0_213] : memref<144x56xbf16, #tpu.memory_space<vmem>>, vector<16x56xbf16>
    tpu.vector_store %arg5[%c128_212, %c0_213], %116 {strides = array<i32>} : memref<144x56xbf16, #tpu.memory_space<vmem>>, vector<16x56xbf16>,
    %c0_214 = arith.constant 0 : index
    %c0_215 = arith.constant 0 : index
    %118 = vector.load %arg5[%c0_214, %c0_215] : memref<144x56xbf16, #tpu.memory_space<vmem>>, vector<144x56xbf16>
    %cst_216 = arith.constant dense<0.000000e+00> : vector<32x56xf32>
    %119 = tpu.matmul %1, %118, %cst_216 {dimension_numbers = #tpu.dot_dimension_numbers<[1], [0], [0], [1], [0, 0, 1, 1], [], []>} : vector<32x144xbf16>, vector<144x56xbf16>, vector<32x56xf32> -> vector<32x56xf32>
    %120 = arith.maximumf %90, %119 : vector<32x56xf32>
    %121 = vector.broadcast %0 : vector<32x1xf32> to vector<32x56xf32>
    %122 = arith.addf %120, %121 : vector<32x56xf32>
    %cst_217 = arith.constant 0.000000e+00 : f32
    %123 = vector.broadcast %cst_217 : f32 to vector<32x56xf32>
    %124 = arith.maximumf %122, %123 : vector<32x56xf32>
    %125 = arith.truncf %124 : vector<32x56xf32> to vector<32x56xbf16>
    %c0_218 = arith.constant 0 : index
    %c0_219 = arith.constant 0 : index
    %c0_220 = arith.constant 0 : index
    %126 = vector.load %arg4[%c0_218, %c0_219, %c0_220] : memref<2x32x56xbf16, #tpu.memory_space<vmem>>, vector<1x32x56xbf16>
    %127 = vector.shape_cast %126 : vector<1x32x56xbf16> to vector<32x56xbf16>
    %128 = vector.shape_cast %125 : vector<32x56xbf16> to vector<1x32x56xbf16>
    tpu.vector_store %arg4[%c0_218, %c0_219, %c0_220], %128 {strides = array<i32>} : memref<2x32x56xbf16, #tpu.memory_space<vmem>>, vector<1x32x56xbf16>,
    %c1_221 = arith.constant 1 : index
    %c0_222 = arith.constant 0 : index
    %c0_223 = arith.constant 0 : index
    %c0_224 = arith.constant 0 : index
    %129 = vector.load %arg1[%c1_221, %c0_222, %c0_223, %c0_224] : memref<2x4x16x128xbf16, #tpu.memory_space<vmem>>, vector<1x1x16x56xbf16>
    %130 = vector.shape_cast %129 : vector<1x1x16x56xbf16> to vector<16x56xbf16>
    %c0_225 = arith.constant 0 : index
    %c0_226 = arith.constant 0 : index
    %131 = vector.load %arg5[%c0_225, %c0_226] : memref<144x56xbf16, #tpu.memory_space<vmem>>, vector<16x56xbf16>
    tpu.vector_store %arg5[%c0_225, %c0_226], %130 {strides = array<i32>} : memref<144x56xbf16, #tpu.memory_space<vmem>>, vector<16x56xbf16>,
    %c1_227 = arith.constant 1 : index
    %c1_228 = arith.constant 1 : index
    %c0_229 = arith.constant 0 : index
    %c0_230 = arith.constant 0 : index
    %132 = vector.load %arg1[%c1_227, %c1_228, %c0_229, %c0_230] : memref<2x4x16x128xbf16, #tpu.memory_space<vmem>>, vector<1x1x16x56xbf16>
    %133 = vector.shape_cast %132 : vector<1x1x16x56xbf16> to vector<16x56xbf16>
    %c16_231 = arith.constant 16 : index
    %c0_232 = arith.constant 0 : index
    %134 = vector.load %arg5[%c16_231, %c0_232] : memref<144x56xbf16, #tpu.memory_space<vmem>>, vector<16x56xbf16>
    tpu.vector_store %arg5[%c16_231, %c0_232], %133 {strides = array<i32>} : memref<144x56xbf16, #tpu.memory_space<vmem>>, vector<16x56xbf16>,
    %c1_233 = arith.constant 1 : index
    %c0_234 = arith.constant 0 : index
    %c0_235 = arith.constant 0 : index
    %c1_236 = arith.constant 1 : index
    %135 = vector.load %arg1[%c1_233, %c0_234, %c0_235, %c1_236] : memref<2x4x16x128xbf16, #tpu.memory_space<vmem>>, vector<1x1x16x56xbf16>
    %136 = vector.shape_cast %135 : vector<1x1x16x56xbf16> to vector<16x56xbf16>
    %c32_237 = arith.constant 32 : index
    %c0_238 = arith.constant 0 : index
    %137 = vector.load %arg5[%c32_237, %c0_238] : memref<144x56xbf16, #tpu.memory_space<vmem>>, vector<16x56xbf16>
    tpu.vector_store %arg5[%c32_237, %c0_238], %136 {strides = array<i32>} : memref<144x56xbf16, #tpu.memory_space<vmem>>, vector<16x56xbf16>,
    %c1_239 = arith.constant 1 : index
    %c2_240 = arith.constant 2 : index
    %c0_241 = arith.constant 0 : index
    %c0_242 = arith.constant 0 : index
    %138 = vector.load %arg1[%c1_239, %c2_240, %c0_241, %c0_242] : memref<2x4x16x128xbf16, #tpu.memory_space<vmem>>, vector<1x1x16x56xbf16>
    %139 = vector.shape_cast %138 : vector<1x1x16x56xbf16> to vector<16x56xbf16>
    %c48_243 = arith.constant 48 : index
    %c0_244 = arith.constant 0 : index
    %140 = vector.load %arg5[%c48_243, %c0_244] : memref<144x56xbf16, #tpu.memory_space<vmem>>, vector<16x56xbf16>
    tpu.vector_store %arg5[%c48_243, %c0_244], %139 {strides = array<i32>} : memref<144x56xbf16, #tpu.memory_space<vmem>>, vector<16x56xbf16>,
    %c1_245 = arith.constant 1 : index
    %c3_246 = arith.constant 3 : index
    %c0_247 = arith.constant 0 : index
    %c0_248 = arith.constant 0 : index
    %141 = vector.load %arg1[%c1_245, %c3_246, %c0_247, %c0_248] : memref<2x4x16x128xbf16, #tpu.memory_space<vmem>>, vector<1x1x16x56xbf16>
    %142 = vector.shape_cast %141 : vector<1x1x16x56xbf16> to vector<16x56xbf16>
    %c64_249 = arith.constant 64 : index
    %c0_250 = arith.constant 0 : index
    %143 = vector.load %arg5[%c64_249, %c0_250] : memref<144x56xbf16, #tpu.memory_space<vmem>>, vector<16x56xbf16>
    tpu.vector_store %arg5[%c64_249, %c0_250], %142 {strides = array<i32>} : memref<144x56xbf16, #tpu.memory_space<vmem>>, vector<16x56xbf16>,
    %c1_251 = arith.constant 1 : index
    %c2_252 = arith.constant 2 : index
    %c0_253 = arith.constant 0 : index
    %c1_254 = arith.constant 1 : index
    %144 = vector.load %arg1[%c1_251, %c2_252, %c0_253, %c1_254] : memref<2x4x16x128xbf16, #tpu.memory_space<vmem>>, vector<1x1x16x56xbf16>
    %145 = vector.shape_cast %144 : vector<1x1x16x56xbf16> to vector<16x56xbf16>
    %c80_255 = arith.constant 80 : index
    %c0_256 = arith.constant 0 : index
    %146 = vector.load %arg5[%c80_255, %c0_256] : memref<144x56xbf16, #tpu.memory_space<vmem>>, vector<16x56xbf16>
    tpu.vector_store %arg5[%c80_255, %c0_256], %145 {strides = array<i32>} : memref<144x56xbf16, #tpu.memory_space<vmem>>, vector<16x56xbf16>,
    %c1_257 = arith.constant 1 : index
    %c0_258 = arith.constant 0 : index
    %c0_259 = arith.constant 0 : index
    %c8_260 = arith.constant 8 : index
    %147 = vector.load %arg1[%c1_257, %c0_258, %c0_259, %c8_260] : memref<2x4x16x128xbf16, #tpu.memory_space<vmem>>, vector<1x1x16x56xbf16>
    %148 = vector.shape_cast %147 : vector<1x1x16x56xbf16> to vector<16x56xbf16>
    %c96_261 = arith.constant 96 : index
    %c0_262 = arith.constant 0 : index
    %149 = vector.load %arg5[%c96_261, %c0_262] : memref<144x56xbf16, #tpu.memory_space<vmem>>, vector<16x56xbf16>
    tpu.vector_store %arg5[%c96_261, %c0_262], %148 {strides = array<i32>} : memref<144x56xbf16, #tpu.memory_space<vmem>>, vector<16x56xbf16>,
    %c1_263 = arith.constant 1 : index
    %c1_264 = arith.constant 1 : index
    %c0_265 = arith.constant 0 : index
    %c8_266 = arith.constant 8 : index
    %150 = vector.load %arg1[%c1_263, %c1_264, %c0_265, %c8_266] : memref<2x4x16x128xbf16, #tpu.memory_space<vmem>>, vector<1x1x16x56xbf16>
    %151 = vector.shape_cast %150 : vector<1x1x16x56xbf16> to vector<16x56xbf16>
    %c112_267 = arith.constant 112 : index
    %c0_268 = arith.constant 0 : index
    %152 = vector.load %arg5[%c112_267, %c0_268] : memref<144x56xbf16, #tpu.memory_space<vmem>>, vector<16x56xbf16>
    tpu.vector_store %arg5[%c112_267, %c0_268], %151 {strides = array<i32>} : memref<144x56xbf16, #tpu.memory_space<vmem>>, vector<16x56xbf16>,
    %c1_269 = arith.constant 1 : index
    %c0_270 = arith.constant 0 : index
    %c0_271 = arith.constant 0 : index
    %c9_272 = arith.constant 9 : index
    %153 = vector.load %arg1[%c1_269, %c0_270, %c0_271, %c9_272] : memref<2x4x16x128xbf16, #tpu.memory_space<vmem>>, vector<1x1x16x56xbf16>
    %154 = vector.shape_cast %153 : vector<1x1x16x56xbf16> to vector<16x56xbf16>
    %c128_273 = arith.constant 128 : index
    %c0_274 = arith.constant 0 : index
    %155 = vector.load %arg5[%c128_273, %c0_274] : memref<144x56xbf16, #tpu.memory_space<vmem>>, vector<16x56xbf16>
    tpu.vector_store %arg5[%c128_273, %c0_274], %154 {strides = array<i32>} : memref<144x56xbf16, #tpu.memory_space<vmem>>, vector<16x56xbf16>,
    %c0_275 = arith.constant 0 : index
    %c0_276 = arith.constant 0 : index
    %156 = vector.load %arg5[%c0_275, %c0_276] : memref<144x56xbf16, #tpu.memory_space<vmem>>, vector<144x56xbf16>
    %cst_277 = arith.constant dense<0.000000e+00> : vector<32x56xf32>
    %157 = tpu.matmul %1, %156, %cst_277 {dimension_numbers = #tpu.dot_dimension_numbers<[1], [0], [0], [1], [0, 0, 1, 1], [], []>} : vector<32x144xbf16>, vector<144x56xbf16>, vector<32x56xf32> -> vector<32x56xf32>
    %c1_278 = arith.constant 1 : index
    %c1_279 = arith.constant 1 : index
    %c0_280 = arith.constant 0 : index
    %c0_281 = arith.constant 0 : index
    %158 = vector.load %arg1[%c1_278, %c1_279, %c0_280, %c0_281] : memref<2x4x16x128xbf16, #tpu.memory_space<vmem>>, vector<1x1x16x56xbf16>
    %159 = vector.shape_cast %158 : vector<1x1x16x56xbf16> to vector<16x56xbf16>
    %c0_282 = arith.constant 0 : index
    %c0_283 = arith.constant 0 : index
    %160 = vector.load %arg5[%c0_282, %c0_283] : memref<144x56xbf16, #tpu.memory_space<vmem>>, vector<16x56xbf16>
    tpu.vector_store %arg5[%c0_282, %c0_283], %159 {strides = array<i32>} : memref<144x56xbf16, #tpu.memory_space<vmem>>, vector<16x56xbf16>,
    %c1_284 = arith.constant 1 : index
    %c0_285 = arith.constant 0 : index
    %c0_286 = arith.constant 0 : index
    %c1_287 = arith.constant 1 : index
    %161 = vector.load %arg1[%c1_284, %c0_285, %c0_286, %c1_287] : memref<2x4x16x128xbf16, #tpu.memory_space<vmem>>, vector<1x1x16x56xbf16>
    %162 = vector.shape_cast %161 : vector<1x1x16x56xbf16> to vector<16x56xbf16>
    %c16_288 = arith.constant 16 : index
    %c0_289 = arith.constant 0 : index
    %163 = vector.load %arg5[%c16_288, %c0_289] : memref<144x56xbf16, #tpu.memory_space<vmem>>, vector<16x56xbf16>
    tpu.vector_store %arg5[%c16_288, %c0_289], %162 {strides = array<i32>} : memref<144x56xbf16, #tpu.memory_space<vmem>>, vector<16x56xbf16>,
    %c1_290 = arith.constant 1 : index
    %c1_291 = arith.constant 1 : index
    %c0_292 = arith.constant 0 : index
    %c1_293 = arith.constant 1 : index
    %164 = vector.load %arg1[%c1_290, %c1_291, %c0_292, %c1_293] : memref<2x4x16x128xbf16, #tpu.memory_space<vmem>>, vector<1x1x16x56xbf16>
    %165 = vector.shape_cast %164 : vector<1x1x16x56xbf16> to vector<16x56xbf16>
    %c32_294 = arith.constant 32 : index
    %c0_295 = arith.constant 0 : index
    %166 = vector.load %arg5[%c32_294, %c0_295] : memref<144x56xbf16, #tpu.memory_space<vmem>>, vector<16x56xbf16>
    tpu.vector_store %arg5[%c32_294, %c0_295], %165 {strides = array<i32>} : memref<144x56xbf16, #tpu.memory_space<vmem>>, vector<16x56xbf16>,
    %c1_296 = arith.constant 1 : index
    %c3_297 = arith.constant 3 : index
    %c0_298 = arith.constant 0 : index
    %c0_299 = arith.constant 0 : index
    %167 = vector.load %arg1[%c1_296, %c3_297, %c0_298, %c0_299] : memref<2x4x16x128xbf16, #tpu.memory_space<vmem>>, vector<1x1x16x56xbf16>
    %168 = vector.shape_cast %167 : vector<1x1x16x56xbf16> to vector<16x56xbf16>
    %c48_300 = arith.constant 48 : index
    %c0_301 = arith.constant 0 : index
    %169 = vector.load %arg5[%c48_300, %c0_301] : memref<144x56xbf16, #tpu.memory_space<vmem>>, vector<16x56xbf16>
    tpu.vector_store %arg5[%c48_300, %c0_301], %168 {strides = array<i32>} : memref<144x56xbf16, #tpu.memory_space<vmem>>, vector<16x56xbf16>,
    %c1_302 = arith.constant 1 : index
    %c2_303 = arith.constant 2 : index
    %c0_304 = arith.constant 0 : index
    %c1_305 = arith.constant 1 : index
    %170 = vector.load %arg1[%c1_302, %c2_303, %c0_304, %c1_305] : memref<2x4x16x128xbf16, #tpu.memory_space<vmem>>, vector<1x1x16x56xbf16>
    %171 = vector.shape_cast %170 : vector<1x1x16x56xbf16> to vector<16x56xbf16>
    %c64_306 = arith.constant 64 : index
    %c0_307 = arith.constant 0 : index
    %172 = vector.load %arg5[%c64_306, %c0_307] : memref<144x56xbf16, #tpu.memory_space<vmem>>, vector<16x56xbf16>
    tpu.vector_store %arg5[%c64_306, %c0_307], %171 {strides = array<i32>} : memref<144x56xbf16, #tpu.memory_space<vmem>>, vector<16x56xbf16>,
    %c1_308 = arith.constant 1 : index
    %c3_309 = arith.constant 3 : index
    %c0_310 = arith.constant 0 : index
    %c1_311 = arith.constant 1 : index
    %173 = vector.load %arg1[%c1_308, %c3_309, %c0_310, %c1_311] : memref<2x4x16x128xbf16, #tpu.memory_space<vmem>>, vector<1x1x16x56xbf16>
    %174 = vector.shape_cast %173 : vector<1x1x16x56xbf16> to vector<16x56xbf16>
    %c80_312 = arith.constant 80 : index
    %c0_313 = arith.constant 0 : index
    %175 = vector.load %arg5[%c80_312, %c0_313] : memref<144x56xbf16, #tpu.memory_space<vmem>>, vector<16x56xbf16>
    tpu.vector_store %arg5[%c80_312, %c0_313], %174 {strides = array<i32>} : memref<144x56xbf16, #tpu.memory_space<vmem>>, vector<16x56xbf16>,
    %c1_314 = arith.constant 1 : index
    %c1_315 = arith.constant 1 : index
    %c0_316 = arith.constant 0 : index
    %c8_317 = arith.constant 8 : index
    %176 = vector.load %arg1[%c1_314, %c1_315, %c0_316, %c8_317] : memref<2x4x16x128xbf16, #tpu.memory_space<vmem>>, vector<1x1x16x56xbf16>
    %177 = vector.shape_cast %176 : vector<1x1x16x56xbf16> to vector<16x56xbf16>
    %c96_318 = arith.constant 96 : index
    %c0_319 = arith.constant 0 : index
    %178 = vector.load %arg5[%c96_318, %c0_319] : memref<144x56xbf16, #tpu.memory_space<vmem>>, vector<16x56xbf16>
    tpu.vector_store %arg5[%c96_318, %c0_319], %177 {strides = array<i32>} : memref<144x56xbf16, #tpu.memory_space<vmem>>, vector<16x56xbf16>,
    %c1_320 = arith.constant 1 : index
    %c0_321 = arith.constant 0 : index
    %c0_322 = arith.constant 0 : index
    %c9_323 = arith.constant 9 : index
    %179 = vector.load %arg1[%c1_320, %c0_321, %c0_322, %c9_323] : memref<2x4x16x128xbf16, #tpu.memory_space<vmem>>, vector<1x1x16x56xbf16>
    %180 = vector.shape_cast %179 : vector<1x1x16x56xbf16> to vector<16x56xbf16>
    %c112_324 = arith.constant 112 : index
    %c0_325 = arith.constant 0 : index
    %181 = vector.load %arg5[%c112_324, %c0_325] : memref<144x56xbf16, #tpu.memory_space<vmem>>, vector<16x56xbf16>
    tpu.vector_store %arg5[%c112_324, %c0_325], %180 {strides = array<i32>} : memref<144x56xbf16, #tpu.memory_space<vmem>>, vector<16x56xbf16>,
    %c1_326 = arith.constant 1 : index
    %c1_327 = arith.constant 1 : index
    %c0_328 = arith.constant 0 : index
    %c9_329 = arith.constant 9 : index
    %182 = vector.load %arg1[%c1_326, %c1_327, %c0_328, %c9_329] : memref<2x4x16x128xbf16, #tpu.memory_space<vmem>>, vector<1x1x16x56xbf16>
    %183 = vector.shape_cast %182 : vector<1x1x16x56xbf16> to vector<16x56xbf16>
    %c128_330 = arith.constant 128 : index
    %c0_331 = arith.constant 0 : index
    %184 = vector.load %arg5[%c128_330, %c0_331] : memref<144x56xbf16, #tpu.memory_space<vmem>>, vector<16x56xbf16>
    tpu.vector_store %arg5[%c128_330, %c0_331], %183 {strides = array<i32>} : memref<144x56xbf16, #tpu.memory_space<vmem>>, vector<16x56xbf16>,
    %c0_332 = arith.constant 0 : index
    %c0_333 = arith.constant 0 : index
    %185 = vector.load %arg5[%c0_332, %c0_333] : memref<144x56xbf16, #tpu.memory_space<vmem>>, vector<144x56xbf16>
    %cst_334 = arith.constant dense<0.000000e+00> : vector<32x56xf32>
    %186 = tpu.matmul %1, %185, %cst_334 {dimension_numbers = #tpu.dot_dimension_numbers<[1], [0], [0], [1], [0, 0, 1, 1], [], []>} : vector<32x144xbf16>, vector<144x56xbf16>, vector<32x56xf32> -> vector<32x56xf32>
    %187 = arith.maximumf %157, %186 : vector<32x56xf32>
    %c1_335 = arith.constant 1 : index
    %c2_336 = arith.constant 2 : index
    %c0_337 = arith.constant 0 : index
    %c0_338 = arith.constant 0 : index
    %188 = vector.load %arg1[%c1_335, %c2_336, %c0_337, %c0_338] : memref<2x4x16x128xbf16, #tpu.memory_space<vmem>>, vector<1x1x16x56xbf16>
    %189 = vector.shape_cast %188 : vector<1x1x16x56xbf16> to vector<16x56xbf16>
    %c0_339 = arith.constant 0 : index
    %c0_340 = arith.constant 0 : index
    %190 = vector.load %arg5[%c0_339, %c0_340] : memref<144x56xbf16, #tpu.memory_space<vmem>>, vector<16x56xbf16>
    tpu.vector_store %arg5[%c0_339, %c0_340], %189 {strides = array<i32>} : memref<144x56xbf16, #tpu.memory_space<vmem>>, vector<16x56xbf16>,
    %c1_341 = arith.constant 1 : index
    %c3_342 = arith.constant 3 : index
    %c0_343 = arith.constant 0 : index
    %c0_344 = arith.constant 0 : index
    %191 = vector.load %arg1[%c1_341, %c3_342, %c0_343, %c0_344] : memref<2x4x16x128xbf16, #tpu.memory_space<vmem>>, vector<1x1x16x56xbf16>
    %192 = vector.shape_cast %191 : vector<1x1x16x56xbf16> to vector<16x56xbf16>
    %c16_345 = arith.constant 16 : index
    %c0_346 = arith.constant 0 : index
    %193 = vector.load %arg5[%c16_345, %c0_346] : memref<144x56xbf16, #tpu.memory_space<vmem>>, vector<16x56xbf16>
    tpu.vector_store %arg5[%c16_345, %c0_346], %192 {strides = array<i32>} : memref<144x56xbf16, #tpu.memory_space<vmem>>, vector<16x56xbf16>,
    %c1_347 = arith.constant 1 : index
    %c2_348 = arith.constant 2 : index
    %c0_349 = arith.constant 0 : index
    %c1_350 = arith.constant 1 : index
    %194 = vector.load %arg1[%c1_347, %c2_348, %c0_349, %c1_350] : memref<2x4x16x128xbf16, #tpu.memory_space<vmem>>, vector<1x1x16x56xbf16>
    %195 = vector.shape_cast %194 : vector<1x1x16x56xbf16> to vector<16x56xbf16>
    %c32_351 = arith.constant 32 : index
    %c0_352 = arith.constant 0 : index
    %196 = vector.load %arg5[%c32_351, %c0_352] : memref<144x56xbf16, #tpu.memory_space<vmem>>, vector<16x56xbf16>
    tpu.vector_store %arg5[%c32_351, %c0_352], %195 {strides = array<i32>} : memref<144x56xbf16, #tpu.memory_space<vmem>>, vector<16x56xbf16>,
    %c1_353 = arith.constant 1 : index
    %c0_354 = arith.constant 0 : index
    %c0_355 = arith.constant 0 : index
    %c8_356 = arith.constant 8 : index
    %197 = vector.load %arg1[%c1_353, %c0_354, %c0_355, %c8_356] : memref<2x4x16x128xbf16, #tpu.memory_space<vmem>>, vector<1x1x16x56xbf16>
    %198 = vector.shape_cast %197 : vector<1x1x16x56xbf16> to vector<16x56xbf16>
    %c48_357 = arith.constant 48 : index
    %c0_358 = arith.constant 0 : index
    %199 = vector.load %arg5[%c48_357, %c0_358] : memref<144x56xbf16, #tpu.memory_space<vmem>>, vector<16x56xbf16>
    tpu.vector_store %arg5[%c48_357, %c0_358], %198 {strides = array<i32>} : memref<144x56xbf16, #tpu.memory_space<vmem>>, vector<16x56xbf16>,
    %c1_359 = arith.constant 1 : index
    %c1_360 = arith.constant 1 : index
    %c0_361 = arith.constant 0 : index
    %c8_362 = arith.constant 8 : index
    %200 = vector.load %arg1[%c1_359, %c1_360, %c0_361, %c8_362] : memref<2x4x16x128xbf16, #tpu.memory_space<vmem>>, vector<1x1x16x56xbf16>
    %201 = vector.shape_cast %200 : vector<1x1x16x56xbf16> to vector<16x56xbf16>
    %c64_363 = arith.constant 64 : index
    %c0_364 = arith.constant 0 : index
    %202 = vector.load %arg5[%c64_363, %c0_364] : memref<144x56xbf16, #tpu.memory_space<vmem>>, vector<16x56xbf16>
    tpu.vector_store %arg5[%c64_363, %c0_364], %201 {strides = array<i32>} : memref<144x56xbf16, #tpu.memory_space<vmem>>, vector<16x56xbf16>,
    %c1_365 = arith.constant 1 : index
    %c0_366 = arith.constant 0 : index
    %c0_367 = arith.constant 0 : index
    %c9_368 = arith.constant 9 : index
    %203 = vector.load %arg1[%c1_365, %c0_366, %c0_367, %c9_368] : memref<2x4x16x128xbf16, #tpu.memory_space<vmem>>, vector<1x1x16x56xbf16>
    %204 = vector.shape_cast %203 : vector<1x1x16x56xbf16> to vector<16x56xbf16>
    %c80_369 = arith.constant 80 : index
    %c0_370 = arith.constant 0 : index
    %205 = vector.load %arg5[%c80_369, %c0_370] : memref<144x56xbf16, #tpu.memory_space<vmem>>, vector<16x56xbf16>
    tpu.vector_store %arg5[%c80_369, %c0_370], %204 {strides = array<i32>} : memref<144x56xbf16, #tpu.memory_space<vmem>>, vector<16x56xbf16>,
    %c1_371 = arith.constant 1 : index
    %c2_372 = arith.constant 2 : index
    %c0_373 = arith.constant 0 : index
    %c8_374 = arith.constant 8 : index
    %206 = vector.load %arg1[%c1_371, %c2_372, %c0_373, %c8_374] : memref<2x4x16x128xbf16, #tpu.memory_space<vmem>>, vector<1x1x16x56xbf16>
    %207 = vector.shape_cast %206 : vector<1x1x16x56xbf16> to vector<16x56xbf16>
    %c96_375 = arith.constant 96 : index
    %c0_376 = arith.constant 0 : index
    %208 = vector.load %arg5[%c96_375, %c0_376] : memref<144x56xbf16, #tpu.memory_space<vmem>>, vector<16x56xbf16>
    tpu.vector_store %arg5[%c96_375, %c0_376], %207 {strides = array<i32>} : memref<144x56xbf16, #tpu.memory_space<vmem>>, vector<16x56xbf16>,
    %c1_377 = arith.constant 1 : index
    %c3_378 = arith.constant 3 : index
    %c0_379 = arith.constant 0 : index
    %c8_380 = arith.constant 8 : index
    %209 = vector.load %arg1[%c1_377, %c3_378, %c0_379, %c8_380] : memref<2x4x16x128xbf16, #tpu.memory_space<vmem>>, vector<1x1x16x56xbf16>
    %210 = vector.shape_cast %209 : vector<1x1x16x56xbf16> to vector<16x56xbf16>
    %c112_381 = arith.constant 112 : index
    %c0_382 = arith.constant 0 : index
    %211 = vector.load %arg5[%c112_381, %c0_382] : memref<144x56xbf16, #tpu.memory_space<vmem>>, vector<16x56xbf16>
    tpu.vector_store %arg5[%c112_381, %c0_382], %210 {strides = array<i32>} : memref<144x56xbf16, #tpu.memory_space<vmem>>, vector<16x56xbf16>,
    %c1_383 = arith.constant 1 : index
    %c2_384 = arith.constant 2 : index
    %c0_385 = arith.constant 0 : index
    %c9_386 = arith.constant 9 : index
    %212 = vector.load %arg1[%c1_383, %c2_384, %c0_385, %c9_386] : memref<2x4x16x128xbf16, #tpu.memory_space<vmem>>, vector<1x1x16x56xbf16>
    %213 = vector.shape_cast %212 : vector<1x1x16x56xbf16> to vector<16x56xbf16>
    %c128_387 = arith.constant 128 : index
    %c0_388 = arith.constant 0 : index
    %214 = vector.load %arg5[%c128_387, %c0_388] : memref<144x56xbf16, #tpu.memory_space<vmem>>, vector<16x56xbf16>
    tpu.vector_store %arg5[%c128_387, %c0_388], %213 {strides = array<i32>} : memref<144x56xbf16, #tpu.memory_space<vmem>>, vector<16x56xbf16>,
    %c0_389 = arith.constant 0 : index
    %c0_390 = arith.constant 0 : index
    %215 = vector.load %arg5[%c0_389, %c0_390] : memref<144x56xbf16, #tpu.memory_space<vmem>>, vector<144x56xbf16>
    %cst_391 = arith.constant dense<0.000000e+00> : vector<32x56xf32>
    %216 = tpu.matmul %1, %215, %cst_391 {dimension_numbers = #tpu.dot_dimension_numbers<[1], [0], [0], [1], [0, 0, 1, 1], [], []>} : vector<32x144xbf16>, vector<144x56xbf16>, vector<32x56xf32> -> vector<32x56xf32>
    %217 = arith.maximumf %187, %216 : vector<32x56xf32>
    %c1_392 = arith.constant 1 : index
    %c3_393 = arith.constant 3 : index
    %c0_394 = arith.constant 0 : index
    %c0_395 = arith.constant 0 : index
    %218 = vector.load %arg1[%c1_392, %c3_393, %c0_394, %c0_395] : memref<2x4x16x128xbf16, #tpu.memory_space<vmem>>, vector<1x1x16x56xbf16>
    %219 = vector.shape_cast %218 : vector<1x1x16x56xbf16> to vector<16x56xbf16>
    %c0_396 = arith.constant 0 : index
    %c0_397 = arith.constant 0 : index
    %220 = vector.load %arg5[%c0_396, %c0_397] : memref<144x56xbf16, #tpu.memory_space<vmem>>, vector<16x56xbf16>
    tpu.vector_store %arg5[%c0_396, %c0_397], %219 {strides = array<i32>} : memref<144x56xbf16, #tpu.memory_space<vmem>>, vector<16x56xbf16>,
    %c1_398 = arith.constant 1 : index
    %c2_399 = arith.constant 2 : index
    %c0_400 = arith.constant 0 : index
    %c1_401 = arith.constant 1 : index
    %221 = vector.load %arg1[%c1_398, %c2_399, %c0_400, %c1_401] : memref<2x4x16x128xbf16, #tpu.memory_space<vmem>>, vector<1x1x16x56xbf16>
    %222 = vector.shape_cast %221 : vector<1x1x16x56xbf16> to vector<16x56xbf16>
    %c16_402 = arith.constant 16 : index
    %c0_403 = arith.constant 0 : index
    %223 = vector.load %arg5[%c16_402, %c0_403] : memref<144x56xbf16, #tpu.memory_space<vmem>>, vector<16x56xbf16>
    tpu.vector_store %arg5[%c16_402, %c0_403], %222 {strides = array<i32>} : memref<144x56xbf16, #tpu.memory_space<vmem>>, vector<16x56xbf16>,
    %c1_404 = arith.constant 1 : index
    %c3_405 = arith.constant 3 : index
    %c0_406 = arith.constant 0 : index
    %c1_407 = arith.constant 1 : index
    %224 = vector.load %arg1[%c1_404, %c3_405, %c0_406, %c1_407] : memref<2x4x16x128xbf16, #tpu.memory_space<vmem>>, vector<1x1x16x56xbf16>
    %225 = vector.shape_cast %224 : vector<1x1x16x56xbf16> to vector<16x56xbf16>
    %c32_408 = arith.constant 32 : index
    %c0_409 = arith.constant 0 : index
    %226 = vector.load %arg5[%c32_408, %c0_409] : memref<144x56xbf16, #tpu.memory_space<vmem>>, vector<16x56xbf16>
    tpu.vector_store %arg5[%c32_408, %c0_409], %225 {strides = array<i32>} : memref<144x56xbf16, #tpu.memory_space<vmem>>, vector<16x56xbf16>,
    %c1_410 = arith.constant 1 : index
    %c1_411 = arith.constant 1 : index
    %c0_412 = arith.constant 0 : index
    %c8_413 = arith.constant 8 : index
    %227 = vector.load %arg1[%c1_410, %c1_411, %c0_412, %c8_413] : memref<2x4x16x128xbf16, #tpu.memory_space<vmem>>, vector<1x1x16x56xbf16>
    %228 = vector.shape_cast %227 : vector<1x1x16x56xbf16> to vector<16x56xbf16>
    %c48_414 = arith.constant 48 : index
    %c0_415 = arith.constant 0 : index
    %229 = vector.load %arg5[%c48_414, %c0_415] : memref<144x56xbf16, #tpu.memory_space<vmem>>, vector<16x56xbf16>
    tpu.vector_store %arg5[%c48_414, %c0_415], %228 {strides = array<i32>} : memref<144x56xbf16, #tpu.memory_space<vmem>>, vector<16x56xbf16>,
    %c1_416 = arith.constant 1 : index
    %c0_417 = arith.constant 0 : index
    %c0_418 = arith.constant 0 : index
    %c9_419 = arith.constant 9 : index
    %230 = vector.load %arg1[%c1_416, %c0_417, %c0_418, %c9_419] : memref<2x4x16x128xbf16, #tpu.memory_space<vmem>>, vector<1x1x16x56xbf16>
    %231 = vector.shape_cast %230 : vector<1x1x16x56xbf16> to vector<16x56xbf16>
    %c64_420 = arith.constant 64 : index
    %c0_421 = arith.constant 0 : index
    %232 = vector.load %arg5[%c64_420, %c0_421] : memref<144x56xbf16, #tpu.memory_space<vmem>>, vector<16x56xbf16>
    tpu.vector_store %arg5[%c64_420, %c0_421], %231 {strides = array<i32>} : memref<144x56xbf16, #tpu.memory_space<vmem>>, vector<16x56xbf16>,
    %c1_422 = arith.constant 1 : index
    %c1_423 = arith.constant 1 : index
    %c0_424 = arith.constant 0 : index
    %c9_425 = arith.constant 9 : index
    %233 = vector.load %arg1[%c1_422, %c1_423, %c0_424, %c9_425] : memref<2x4x16x128xbf16, #tpu.memory_space<vmem>>, vector<1x1x16x56xbf16>
    %234 = vector.shape_cast %233 : vector<1x1x16x56xbf16> to vector<16x56xbf16>
    %c80_426 = arith.constant 80 : index
    %c0_427 = arith.constant 0 : index
    %235 = vector.load %arg5[%c80_426, %c0_427] : memref<144x56xbf16, #tpu.memory_space<vmem>>, vector<16x56xbf16>
    tpu.vector_store %arg5[%c80_426, %c0_427], %234 {strides = array<i32>} : memref<144x56xbf16, #tpu.memory_space<vmem>>, vector<16x56xbf16>,
    %c1_428 = arith.constant 1 : index
    %c3_429 = arith.constant 3 : index
    %c0_430 = arith.constant 0 : index
    %c8_431 = arith.constant 8 : index
    %236 = vector.load %arg1[%c1_428, %c3_429, %c0_430, %c8_431] : memref<2x4x16x128xbf16, #tpu.memory_space<vmem>>, vector<1x1x16x56xbf16>
    %237 = vector.shape_cast %236 : vector<1x1x16x56xbf16> to vector<16x56xbf16>
    %c96_432 = arith.constant 96 : index
    %c0_433 = arith.constant 0 : index
    %238 = vector.load %arg5[%c96_432, %c0_433] : memref<144x56xbf16, #tpu.memory_space<vmem>>, vector<16x56xbf16>
    tpu.vector_store %arg5[%c96_432, %c0_433], %237 {strides = array<i32>} : memref<144x56xbf16, #tpu.memory_space<vmem>>, vector<16x56xbf16>,
    %c1_434 = arith.constant 1 : index
    %c2_435 = arith.constant 2 : index
    %c0_436 = arith.constant 0 : index
    %c9_437 = arith.constant 9 : index
    %239 = vector.load %arg1[%c1_434, %c2_435, %c0_436, %c9_437] : memref<2x4x16x128xbf16, #tpu.memory_space<vmem>>, vector<1x1x16x56xbf16>
    %240 = vector.shape_cast %239 : vector<1x1x16x56xbf16> to vector<16x56xbf16>
    %c112_438 = arith.constant 112 : index
    %c0_439 = arith.constant 0 : index
    %241 = vector.load %arg5[%c112_438, %c0_439] : memref<144x56xbf16, #tpu.memory_space<vmem>>, vector<16x56xbf16>
    tpu.vector_store %arg5[%c112_438, %c0_439], %240 {strides = array<i32>} : memref<144x56xbf16, #tpu.memory_space<vmem>>, vector<16x56xbf16>,
    %c1_440 = arith.constant 1 : index
    %c3_441 = arith.constant 3 : index
    %c0_442 = arith.constant 0 : index
    %c9_443 = arith.constant 9 : index
    %242 = vector.load %arg1[%c1_440, %c3_441, %c0_442, %c9_443] : memref<2x4x16x128xbf16, #tpu.memory_space<vmem>>, vector<1x1x16x56xbf16>
    %243 = vector.shape_cast %242 : vector<1x1x16x56xbf16> to vector<16x56xbf16>
    %c128_444 = arith.constant 128 : index
    %c0_445 = arith.constant 0 : index
    %244 = vector.load %arg5[%c128_444, %c0_445] : memref<144x56xbf16, #tpu.memory_space<vmem>>, vector<16x56xbf16>
    tpu.vector_store %arg5[%c128_444, %c0_445], %243 {strides = array<i32>} : memref<144x56xbf16, #tpu.memory_space<vmem>>, vector<16x56xbf16>,
    %c0_446 = arith.constant 0 : index
    %c0_447 = arith.constant 0 : index
    %245 = vector.load %arg5[%c0_446, %c0_447] : memref<144x56xbf16, #tpu.memory_space<vmem>>, vector<144x56xbf16>
    %cst_448 = arith.constant dense<0.000000e+00> : vector<32x56xf32>
    %246 = tpu.matmul %1, %245, %cst_448 {dimension_numbers = #tpu.dot_dimension_numbers<[1], [0], [0], [1], [0, 0, 1, 1], [], []>} : vector<32x144xbf16>, vector<144x56xbf16>, vector<32x56xf32> -> vector<32x56xf32>
    %247 = arith.maximumf %217, %246 : vector<32x56xf32>
    %248 = vector.broadcast %0 : vector<32x1xf32> to vector<32x56xf32>
    %249 = arith.addf %247, %248 : vector<32x56xf32>
    %cst_449 = arith.constant 0.000000e+00 : f32
    %250 = vector.broadcast %cst_449 : f32 to vector<32x56xf32>
    %251 = arith.maximumf %249, %250 : vector<32x56xf32>
    %252 = arith.truncf %251 : vector<32x56xf32> to vector<32x56xbf16>
    %c1_450 = arith.constant 1 : index
    %c0_451 = arith.constant 0 : index
    %c0_452 = arith.constant 0 : index
    %253 = vector.load %arg4[%c1_450, %c0_451, %c0_452] : memref<2x32x56xbf16, #tpu.memory_space<vmem>>, vector<1x32x56xbf16>
    %254 = vector.shape_cast %253 : vector<1x32x56xbf16> to vector<32x56xbf16>
    %255 = vector.shape_cast %252 : vector<32x56xbf16> to vector<1x32x56xbf16>
    tpu.vector_store %arg4[%c1_450, %c0_451, %c0_452], %255 {strides = array<i32>} : memref<2x32x56xbf16, #tpu.memory_space<vmem>>, vector<1x32x56xbf16>,
    return
  }
  func.func @transform_0(%arg0: i32) -> (i32, i32, i32, i32) {
    %c0_i32 = arith.constant 0 : i32
    %c0_i32_0 = arith.constant 0 : i32
    %c0_i32_1 = arith.constant 0 : i32
    %c0_i32_2 = arith.constant 0 : i32
    return %arg0, %c0_i32, %c0_i32_0, %c0_i32_1 : i32, i32, i32, i32
  }
  func.func @transform_1(%arg0: i32) -> (i32, i32) {
    %c0_i32 = arith.constant 0 : i32
    %c0_i32_0 = arith.constant 0 : i32
    %c0_i32_1 = arith.constant 0 : i32
    return %c0_i32, %c0_i32_0 : i32, i32
  }
  func.func @transform_2(%arg0: i32) -> (i32, i32) {
    %c0_i32 = arith.constant 0 : i32
    %c0_i32_0 = arith.constant 0 : i32
    %c0_i32_1 = arith.constant 0 : i32
    return %c0_i32, %c0_i32_0 : i32, i32
  }
  func.func @transform_3(%arg0: i32) -> (i32, i32, i32) {
    %c0_i32 = arith.constant 0 : i32
    %c0_i32_0 = arith.constant 0 : i32
    %c0_i32_1 = arith.constant 0 : i32
    return %arg0, %c0_i32, %c0_i32_0 : i32, i32, i32
  }
}

module attributes {stable_mosaic.version = 11 : i64} {
  func.func @head_kernel(%arg0: i32, %arg1: memref<8x1792xbf16, #tpu.memory_space<vmem>>, %arg2: memref<1792x24xbf16, #tpu.memory_space<vmem>>, %arg3: memref<1x24xf32, #tpu.memory_space<vmem>>, %arg4: memref<24x10xbf16, #tpu.memory_space<vmem>>, %arg5: memref<1x10xf32, #tpu.memory_space<vmem>>, %arg6: memref<8x10xf32, #tpu.memory_space<vmem>>) attributes {dimension_semantics = [#tpu.dimension_semantics<parallel>], iteration_bounds = array<i64: 1>, scalar_prefetch = 0 : i64, scratch_operands = 0 : i64, tpu.core_type = #tpu.core_type<tc>, window_params = [{transform_indices = @transform_0, window_bounds = array<i64: 8, 1792>}, {pipeline_mode = #tpu.pipeline_mode<synchronous>, transform_indices = @transform_1, window_bounds = array<i64: 1792, 24>}, {pipeline_mode = #tpu.pipeline_mode<synchronous>, transform_indices = @transform_2, window_bounds = array<i64: 1, 24>}, {pipeline_mode = #tpu.pipeline_mode<synchronous>, transform_indices = @transform_3, window_bounds = array<i64: 24, 10>}, {pipeline_mode = #tpu.pipeline_mode<synchronous>, transform_indices = @transform_4, window_bounds = array<i64: 1, 10>}, {transform_indices = @transform_5, window_bounds = array<i64: 8, 10>}]} {
    %c0 = arith.constant 0 : index
    %c0_0 = arith.constant 0 : index
    %0 = vector.load %arg1[%c0, %c0_0] : memref<8x1792xbf16, #tpu.memory_space<vmem>>, vector<8x1792xbf16>
    %c0_1 = arith.constant 0 : index
    %c0_2 = arith.constant 0 : index
    %1 = vector.load %arg2[%c0_1, %c0_2] : memref<1792x24xbf16, #tpu.memory_space<vmem>>, vector<1792x24xbf16>
    %cst = arith.constant dense<0.000000e+00> : vector<8x24xf32>
    %2 = tpu.matmul %0, %1, %cst {dimension_numbers = #tpu.dot_dimension_numbers<[1], [0], [0], [1], [0, 0, 1, 1], [], []>} : vector<8x1792xbf16>, vector<1792x24xbf16>, vector<8x24xf32> -> vector<8x24xf32>
    %c0_3 = arith.constant 0 : index
    %c0_4 = arith.constant 0 : index
    %3 = vector.load %arg3[%c0_3, %c0_4] : memref<1x24xf32, #tpu.memory_space<vmem>>, vector<1x24xf32>
    %4 = vector.broadcast %3 : vector<1x24xf32> to vector<8x24xf32>
    %5 = arith.addf %2, %4 : vector<8x24xf32>
    %cst_5 = arith.constant 0.000000e+00 : f32
    %6 = vector.broadcast %cst_5 : f32 to vector<8x24xf32>
    %7 = arith.maximumf %5, %6 : vector<8x24xf32>
    %8 = arith.truncf %7 : vector<8x24xf32> to vector<8x24xbf16>
    %c0_6 = arith.constant 0 : index
    %c0_7 = arith.constant 0 : index
    %9 = vector.load %arg4[%c0_6, %c0_7] : memref<24x10xbf16, #tpu.memory_space<vmem>>, vector<24x10xbf16>
    %cst_8 = arith.constant dense<0.000000e+00> : vector<8x10xf32>
    %10 = tpu.matmul %8, %9, %cst_8 {dimension_numbers = #tpu.dot_dimension_numbers<[1], [0], [0], [1], [0, 0, 1, 1], [], []>} : vector<8x24xbf16>, vector<24x10xbf16>, vector<8x10xf32> -> vector<8x10xf32>
    %c0_9 = arith.constant 0 : index
    %c0_10 = arith.constant 0 : index
    %11 = vector.load %arg5[%c0_9, %c0_10] : memref<1x10xf32, #tpu.memory_space<vmem>>, vector<1x10xf32>
    %12 = vector.broadcast %11 : vector<1x10xf32> to vector<8x10xf32>
    %13 = arith.addf %10, %12 : vector<8x10xf32>
    %cst_11 = arith.constant dense<0xFF800000> : vector<8xf32>
    %14 = vector.multi_reduction <maximumf>, %13, %cst_11 [1] : vector<8x10xf32> to vector<8xf32>
    %15 = vector.shape_cast %14 : vector<8xf32> to vector<8x1xf32>
    %16 = vector.broadcast %15 : vector<8x1xf32> to vector<8x10xf32>
    %17 = arith.subf %13, %16 : vector<8x10xf32>
    %18 = math.exp %17 : vector<8x10xf32>
    %cst_12 = arith.constant dense<0.000000e+00> : vector<8xf32>
    %19 = vector.multi_reduction <add>, %18, %cst_12 [1] : vector<8x10xf32> to vector<8xf32>
    %20 = vector.shape_cast %19 : vector<8xf32> to vector<8x1xf32>
    %21 = tpu.reciprocal %20 {approx = true} : vector<8x1xf32> -> vector<8x1xf32>
    %22 = vector.broadcast %21 : vector<8x1xf32> to vector<8x10xf32>
    %23 = arith.mulf %18, %22 : vector<8x10xf32>
    %c0_13 = arith.constant 0 : index
    %c0_14 = arith.constant 0 : index
    %24 = vector.load %arg6[%c0_13, %c0_14] : memref<8x10xf32, #tpu.memory_space<vmem>>, vector<8x10xf32>
    tpu.vector_store %arg6[%c0_13, %c0_14], %23 {strides = array<i32>} : memref<8x10xf32, #tpu.memory_space<vmem>>, vector<8x10xf32>,
    return
  }
  func.func @transform_0(%arg0: i32) -> (i32, i32) {
    %c0_i32 = arith.constant 0 : i32
    %c0_i32_0 = arith.constant 0 : i32
    return %arg0, %c0_i32 : i32, i32
  }
  func.func @transform_1(%arg0: i32) -> (i32, i32) {
    %c0_i32 = arith.constant 0 : i32
    %c0_i32_0 = arith.constant 0 : i32
    %c0_i32_1 = arith.constant 0 : i32
    return %c0_i32, %c0_i32_0 : i32, i32
  }
  func.func @transform_2(%arg0: i32) -> (i32, i32) {
    %c0_i32 = arith.constant 0 : i32
    %c0_i32_0 = arith.constant 0 : i32
    %c0_i32_1 = arith.constant 0 : i32
    return %c0_i32, %c0_i32_0 : i32, i32
  }
  func.func @transform_3(%arg0: i32) -> (i32, i32) {
    %c0_i32 = arith.constant 0 : i32
    %c0_i32_0 = arith.constant 0 : i32
    %c0_i32_1 = arith.constant 0 : i32
    return %c0_i32, %c0_i32_0 : i32, i32
  }
  func.func @transform_4(%arg0: i32) -> (i32, i32) {
    %c0_i32 = arith.constant 0 : i32
    %c0_i32_0 = arith.constant 0 : i32
    %c0_i32_1 = arith.constant 0 : i32
    return %c0_i32, %c0_i32_0 : i32, i32
  }
  func.func @transform_5(%arg0: i32) -> (i32, i32) {
    %c0_i32 = arith.constant 0 : i32
    %c0_i32_0 = arith.constant 0 : i32
    return %arg0, %c0_i32 : i32, i32
  }
}

</mosaic_0001>

<bundles_post_ra>
// kernel: net_forward.3
= control target key start
LH: loop header
LB: loop body
LE: loop exit
PB: predicated region body
PF: predicated region fallthrough
CT: control target
= control target key end

     0   :  { %v1880_v0 = vmov 2   ;;  %v1881_v1 = vmov 1   ;;  %v30_v3 = vlaneseq  ;;  %v1882_v7 = vmov 3   ;;  %s1889_s27 = smov 127   ;;  %s1891_s5 = smov 112   ;;  %s3471_s1 = inlined_call_operand.vmem [shape: f32[16,9], index: 1, kind: input, shape index: {}]   ;;  %s3472_s0 = inlined_call_operand.vmem [shape: f32[2,4,256], index: 0, kind: input, shape index: {}]   ;;  %s3473_s2 = inlined_call_operand.vmem [shape: f32[16,1], index: 2, kind: input, shape index: {}]   ;;  %s3474_s3 = inlined_call_operand.vmem [shape: bf16[2,16,210], index: 3, kind: output, shape index: {}]  }
   0x1   :  { %1865 = vset.pattern.permute.xlu0 %v1880_v0  ;;  %1864 = vset.pattern.permute.xlu1 %v1881_v1  ;;  %v16_v2 = vld [vmem:[%s3471_s1] sm:$0xff]  ;;  %v17_v4 = vld [vmem:[%s3471_s1 + $0x8] sm:$0xff]  ;;  %v1883_v19 = vmov 5   ;;  %v1884_v22 = vmov 6   ;;  %v1885_v23 = vmov 4   ;;  %v1886_v24 = vmov 7  }
   0x2   :  { %78 = vperm.xlu0 %1865, %v16_v2   ;;  %51 = vperm.xlu1 %1864, %v16_v2   ;;  %v31_v5 = vshrl.u32 %v30_v3, 7  ;;  %v1837_v6 = vld [vmem:[%s3472_s0 + $0x3] ss:$4 sm:$0x3]  ;;  %v1887_v25 = vmov 8   ;;  %v1888_v26 = vmov 0  }
   0x3   :  { %v1840_v10 = vld [vmem:[%s3472_s0 + $0x8] ss:$4 sm:$0x3]  ;;  %v1842_v11 = vld [vmem:[%s3472_s0 + $0xa] ss:$4 sm:$0x3] }
   0x4   :  { %v1921_v8 = vsub.s32 1, %v31_v5  ;;  %v1923_v9 = vsub.s32 0, %v31_v5  ;;  %v1841_v12 = vld [vmem:[%s3472_s0 + $0x9] ss:$4 sm:$0x3]  ;;  %vm101_vm0 = vcmask 1039360  }
   0x5   :  { %v1843_v27 = vld [vmem:[%s3472_s0 + $0xb] ss:$4 sm:$0x3]  ;;  %v18_v30 = vld [vmem:[%s3472_s0] ss:$4 sm:$0x3] }
   0x6   :  { %1868 = vset.pattern.permute.xlu0 %v1882_v7  ;;  %55 = vperm.xlu1 %1864, %v17_v4   ;;  %v1935_v13 = vrot.slane %v1837_v6, %v1923_v9  ;;  %v1938_v14 = vrot.slane %v1837_v6, %v1921_v8  ;;  %v1941_v15 = vrot.slane %v1840_v10, %v1921_v8  ;;  %v1836_v39 = vld [vmem:[%s3472_s0 + $0x2] ss:$4 sm:$0x3]  ;;  %v1835_v53 = vld [vmem:[%s3472_s0 + $0x1] ss:$4 sm:$0x3] }
   0x7   :  { %119 = vperm.xlu0 %1868, %v17_v4   ;;  %v1944_v16 = vrot.slane %v1842_v11, %v1921_v8  ;;  %v1947_v17 = vrot.slane %v1840_v10, %v1923_v9  ;;  %v1950_v18 = vrot.slane %v1841_v12, %v1921_v8  ;;  %v1953_v20 = vrot.slane %v1842_v11, %v1923_v9  ;;  %s1890_s0 = smov 113  }
   0x8   :  { %3533 = vst [vmem:[#allocation2_spill] sm:$0xff] %v1935_v13  ;;  %3534 = vst [vmem:[#allocation3_spill] sm:$0xff] %v1941_v15  ;;  %v1956_v21 = vrot.slane %v1841_v12, %v1923_v9  ;;  %v1962_v28 = vrot.slane %v1843_v27, %v1921_v8  ;;  %v1965_v29 = vrot.slane %v1843_v27, %v1923_v9  ;;  %vm228_vm1 = vcmask 924672  }
   0x9   :  { %3535 = vst [vmem:[#allocation4_spill] sm:$0xff] %v1944_v16  ;;  %3536 = vst [vmem:[#allocation5_spill] sm:$0xff] %v1947_v17  ;;  %v1971_v31 = vrot.slane %v18_v30, %v1921_v8  ;;  %v1974_v32 = vrot.slane %v18_v30, %v1923_v9  ;;  %v2002_v44 = vrot.slane %v1836_v39, %v1921_v8  ;;  %vm297_vm2 = vcmask 916480  }
   0xa   :  { %1866 = vset.pattern.permute.xlu1 %v1880_v0  ;;  %3537 = vst [vmem:[#allocation6_spill] sm:$0xff] %v1950_v18  ;;  %3538 = vst [vmem:[#allocation7_spill] sm:$0xff] %v1953_v20  ;;  %v2005_v45 = vrot.slane %v1836_v39, %v1923_v9  ;;  %v2031_v55 = vrot.slane %v1835_v53, %v1921_v8  ;;  %v2034_v56 = vrot.slane %v1835_v53, %v1923_v9  ;;  %vm962_vm3 = vcmask 1043456  }
   0xb   :  { %1870 = vset.pattern.permute.xlu0 %v1883_v19  ;;  %82 = vperm.xlu1 %1866, %v17_v4   ;;  %3539 = vst [vmem:[#allocation8_spill] sm:$0xff] %v1956_v21  ;;  %3540 = vst [vmem:[#allocation9_spill] sm:$0xff] %v1962_v28  ;;  %vm963_vm4 = vcmask 670724  }
   0xc   :  { %171 = vperm.xlu0 %1870, %v16_v2   ;;  %3541 = vst [vmem:[#allocation10_spill] sm:$0xff] %v1965_v29  ;;  %3548 = vst [vmem:[#allocation17_spill] sm:$0xff] %v2005_v45 }
   0xd   :  { %vm3076_vm5 = vmor %vm963_vm4, %vm962_vm3 }
   0xf   :  { %1867 = vset.pattern.permute.xlu1 %v1882_v7 }
  0x10   :  { %1873 = vset.pattern.permute.xlu0 %v1884_v22  ;;  %115 = vperm.xlu1 %1867, %v16_v2  }
  0x11   :  { %209 = vperm.xlu0 %1873, %v17_v4  }
  0x14   :  { %1869 = vset.pattern.permute.xlu1 %v1885_v23 }
  0x15   :  { %1874 = vset.pattern.permute.xlu0 %v1886_v24  ;;  %144 = vperm.xlu1 %1869, %v16_v2  }
  0x16   :  { %240 = vperm.xlu0 %1874, %v16_v2  }
  0x19   :  { %148 = vperm.xlu1 %1869, %v17_v4  }
  0x1a   :  { %1877 = vset.pattern.permute.xlu0 %v1887_v25 }
  0x1b   :  { %278 = vperm.xlu0 %1877, %v17_v4  }
  0x1d   :  { %1871 = vset.pattern.permute.xlu1 %v1883_v19 }
  0x1e   :  { %175 = vperm.xlu1 %1871, %v17_v4  }
  0x1f   :  { %1878 = vset.pattern.permute.xlu0 %v1888_v26 }
  0x20   :  { %21 = vperm.xlu0 %1878, %v16_v2  }
  0x22   :  { %1872 = vset.pattern.permute.xlu1 %v1884_v22 }
  0x23   :  { %205 = vperm.xlu1 %1872, %v16_v2  }
  0x24   :  { %26 = vperm.xlu0 %1878, %v17_v4  }
  0x27   :  { %1875 = vset.pattern.permute.xlu1 %v1886_v24 }
  0x28   :  { %244 = vperm.xlu1 %1875, %v17_v4  }
  0x2c   :  { %1876 = vset.pattern.permute.xlu1 %v1887_v25 }
  0x2d   :  { %274 = vperm.xlu1 %1876, %v16_v2  }
  0x31   :  { %1879 = vset.pattern.permute.xlu1 %v1888_v26 }
  0x81   :  { %v1976_v33 = vpop.permute.xlu0 %78  ;;  %v1978_v34 = vpop.permute.xlu1 %51 }
  0x82   :  { %3542 = vst [vmem:[#allocation11_spill] sm:$0xff] %v1976_v33  ;;  %3543 = vst [vmem:[#allocation12_spill] sm:$0xff] %v1978_v34  ;;  %v86_v35 = vmul.f32 %v1976_v33, %v1971_v31  ;;  %v85_v36 = vmul.f32 %v1976_v33, %v1974_v32  ;;  %v70_v61 = vmul.f32 %v2031_v55, %v1978_v34 }
  0x83   :  { %v69_v62 = vmul.f32 %v2034_v56, %v1978_v34 }
  0x84   :  { %95 = vrot.lane.b32.xlu0 %v86_v35, %s1889_s27  ;;  %93 = vrot.lane.b32.xlu1 %v85_v36, %s1889_s27  ;;  %v316_v35 = vmul.f32 %v1978_v34, %v1974_v32 }
  0x85   :  { %v1986_v37 = vpop.permute.xlu1 %55 }
  0x86   :  { %3544 = vst [vmem:[#allocation13_spill] sm:$0xff] %v1986_v37  ;;  %v1988_v38 = vpop.permute.xlu0 %119  ;;  %v72_v7 = vmul.f32 %v2031_v55, %v1986_v37  ;;  %v71_v10 = vmul.f32 %v2034_v56, %v1986_v37 }
  0x87   :  { %3545 = vst [vmem:[#allocation14_spill] sm:$0xff] %v1988_v38 }
  0x8a   :  { %v1993_v40 = vpop.permute.xlu1 %82 }
  0x8b   :  { %3546 = vst [vmem:[#allocation15_spill] sm:$0xff] %v1993_v40  ;;  %v88_v41 = vmul.f32 %v1993_v40, %v1971_v31  ;;  %v87_v42 = vmul.f32 %v1993_v40, %v1974_v32  ;;  %v1999_v43 = vpop.permute.xlu0 %171 }
  0x8c   :  { %3547 = vst [vmem:[#allocation16_spill] sm:$0xff] %v1999_v43  ;;  %v179_v46 = vmul.f32 %v1999_v43, %v2002_v44  ;;  %v178_v47 = vmul.f32 %v1999_v43, %v2005_v45 }
  0x8d   :  { %99 = vrot.lane.b32.xlu0 %v88_v41, %s1889_s27  ;;  %97 = vrot.lane.b32.xlu1 %v87_v42, %s1889_s27  ;;  %v318_v41 = vmul.f32 %v1986_v37, %v1974_v32 }
  0x8f   :  { %v2013_v48 = vpop.permute.xlu1 %115 }
  0x90   :  { %3549 = vst [vmem:[#allocation18_spill] sm:$0xff] %v2013_v48  ;;  %v2015_v49 = vpop.permute.xlu0 %209 }
  0x91   :  { %3550 = vst [vmem:[#allocation19_spill] sm:$0xff] %v2015_v49  ;;  %188 = vrot.lane.b32.xlu0 %v179_v46, %s1889_s27  ;;  %186 = vrot.lane.b32.xlu1 %v178_v47, %s1889_s27  ;;  %v214_v63 = vmul.f32 %v2015_v49, %v1974_v32  ;;  %v215_v25 = vmul.f32 %v2015_v49, %v1971_v31 }
  0x92   :  { %v1002_v46 = vmul.f32 %v1950_v18, %v1978_v34 }
  0x94   :  { %v2019_v50 = vpop.permute.xlu1 %144 }
  0x95   :  { %3551 = vst [vmem:[#allocation20_spill] sm:$0xff] %v2019_v50  ;;  %v2021_v51 = vpop.permute.xlu0 %240 }
  0x96   :  { %3552 = vst [vmem:[#allocation21_spill] sm:$0xff] %v2021_v51  ;;  %v248_v8 = vmul.f32 %v2021_v51, %v2031_v55  ;;  %v247_v27 = vmul.f32 %v2021_v51, %v2034_v56 }
  0x98   :  { %v2023_v52 = vpop.permute.xlu1 %148 }
  0x99   :  { %3553 = vst [vmem:[#allocation22_spill] sm:$0xff] %v2023_v52 }
  0x9a   :  { %v2028_v54 = vpop.permute.xlu0 %278 }
  0x9b   :  { %v283_v26 = vmul.f32 %v2028_v54, %v1974_v32 }
  0x9d   :  { %v2036_v57 = vpop.permute.xlu1 %175 }
  0x9e   :  { %3554 = vst [vmem:[#allocation23_spill] sm:$0xff] %v2036_v57  ;;  %v181_v58 = vmul.f32 %v2036_v57, %v2002_v44  ;;  %v180_v59 = vmul.f32 %v2036_v57, %v2005_v45 }
  0x9f   :  { %v2042_v60 = vpop.permute.xlu0 %21 }
  0xa0   :  { %3555 = vst [vmem:[#allocation24_spill] sm:$0xff] %v2042_v60  ;;  %192 = vrot.lane.b32.xlu0 %v181_v58, %s1889_s27  ;;  %190 = vrot.lane.b32.xlu1 %v180_v59, %s1889_s27  ;;  %v41_v0 = vmul.f32 %v1971_v31, %v2042_v60  ;;  %v40_v1 = vmul.f32 %v1974_v32, %v2042_v60 }
  0xa1   :  { %v981_v42 = vmul.f32 %v1941_v15, %v2042_v60  ;;  %v1004_v58 = vmul.f32 %v1950_v18, %v1986_v37  ;;  %v342_v59 = vmul.f32 %v1976_v33, %v2034_v56  ;;  %v775_v18 = vmul.f32 %v1988_v38, %v2031_v55 }
  0xa2   :  { %v2056_v2 = vpop.permute.xlu1 %205  ;;  %v2058_v3 = vadd.f32 %v70_v61, %v41_v0  ;;  %v2060_v4 = vadd.f32 %v69_v62, %v40_v1  ;;  %v1001_v0 = vmul.f32 %v1956_v21, %v1978_v34  ;;  %v284_v1 = vmul.f32 %v2028_v54, %v1971_v31 }
  0xa3   :  { %v2062_v5 = vpop.permute.xlu0 %26  ;;  %v212_v6 = vmul.f32 %v2056_v2, %v1974_v32  ;;  %v213_v23 = vmul.f32 %v2056_v2, %v1971_v31  ;;  %v2120_v53 = vadd.f32 %v1002_v46, %v981_v42  ;;  %v1383_v42 = vmul.f32 %v1953_v20, %v2042_v60 }
  0xa4   :  { %3556 = vst [vmem:[#allocation25_spill] sm:$0xff] %v2062_v5  ;;  %224 = vrot.lane.b32.xlu0 %v214_v63, %s1890_s0  ;;  %v43_v9 = vmul.f32 %v1971_v31, %v2062_v5  ;;  %v42_v11 = vmul.f32 %v1974_v32, %v2062_v5  ;;  %v983_v47 = vmul.f32 %v1941_v15, %v2062_v5 }
  0xa5   :  { %220 = vrot.lane.b32.xlu1 %v212_v6, %s1890_s0  ;;  %3559 = vst [vmem:[#allocation28_spill] sm:$0xff] %v2120_v53  ;;  %v980_v63 = vmul.f32 %v1947_v17, %v2042_v60  ;;  %v982_v6 = vmul.f32 %v1947_v17, %v2062_v5  ;;  %v1391_v46 = vmul.f32 %v1965_v29, %v1978_v34 }
  0xa6   :  { %v2078_v12 = vadd.f32 %v72_v7, %v43_v9  ;;  %v2080_v19 = vadd.f32 %v71_v10, %v42_v11  ;;  %v2128_v62 = vadd.f32 %v1004_v58, %v983_v47  ;;  %v1003_v7 = vmul.f32 %v1956_v21, %v1986_v37 }
  0xa7   :  { %v2082_v22 = vpop.permute.xlu1 %244  ;;  %v2144_v9 = vadd.f32 %v1001_v0, %v980_v63  ;;  %v376_v11 = vmul.f32 %v2019_v50, %v2005_v45  ;;  %v1385_v58 = vmul.f32 %v1953_v20, %v2062_v5  ;;  %v2188_v63 = vadd.f32 %v1391_v46, %v1383_v42 }
  0xa8   :  { %3557 = vst [vmem:[#allocation26_spill] sm:$0xff] %v2082_v22  ;;  %257 = vrot.lane.b32.xlu0 %v248_v8, %s1890_s0  ;;  %v250_v24 = vmul.f32 %v2082_v22, %v2031_v55  ;;  %v249_v30 = vmul.f32 %v2082_v22, %v2034_v56  ;;  %3560 = vst [vmem:[#allocation29_spill] sm:$0xff] %v2128_v62  ;;  %v344_v8 = vmul.f32 %v1993_v40, %v2034_v56 }
  0xa9   :  { %222 = vrot.lane.b32.xlu1 %v213_v23, %s1890_s0  ;;  %3561 = vst [vmem:[#allocation30_spill] sm:$0xff] %v2144_v9  ;;  %v2146_v10 = vadd.f32 %v1003_v7, %v982_v6  ;;  %v317_v23 = vmul.f32 %v1978_v34, %v1971_v31  ;;  %3565 = vst [vmem:[#allocation34_spill] sm:$0xff] %v2188_v63  ;;  %v404_v0 = vmul.f32 %v2036_v57, %v1935_v13 }
  0xaa   :  { %v345_v6 = vmul.f32 %v1993_v40, %v2031_v55  ;;  %v428_v7 = vmul.f32 %v2056_v2, %v2034_v56  ;;  %v526_v42 = vmul.f32 %v2005_v45, %v1976_v33  ;;  %v455_v46 = vmul.f32 %v2021_v51, %v1971_v31 }
  0xab   :  { %3562 = vst [vmem:[#allocation31_spill] sm:$0xff] %v2146_v10  ;;  %v721_v9 = vmul.f32 %v2002_v44, %v1978_v34  ;;  %v723_v53 = vmul.f32 %v2002_v44, %v1986_v37  ;;  %v773_v20 = vmul.f32 %v2013_v48, %v2031_v55 }
  0xac   :  { %261 = vrot.lane.b32.xlu0 %v250_v24, %s1890_s0  ;;  %v2104_v36 = vpop.permute.xlu1 %274  ;;  %v378_v24 = vmul.f32 %v2023_v52, %v2005_v45 }
  0xad   :  { %226 = vrot.lane.b32.xlu1 %v215_v25, %s1890_s0  ;;  %3558 = vst [vmem:[#allocation27_spill] sm:$0xff] %v2104_v36  ;;  %v281_v39 = vmul.f32 %v2104_v36, %v1974_v32  ;;  %v282_v61 = vmul.f32 %v2104_v36, %v1971_v31  ;;  %v319_v25 = vmul.f32 %v1986_v37, %v1971_v31 }
  0xae   :  { %v683_v63 = vmul.f32 %v2104_v36, %v2002_v44 }
  0xb0   :  { %293 = vrot.lane.b32.xlu0 %v283_v26, %s1891_s5  ;;  %v402_v26 = vmul.f32 %v1999_v43, %v1935_v13 }
  0xb1   :  { %255 = vrot.lane.b32.xlu1 %v247_v27, %s1890_s0  ;;  %v1384_v27 = vmul.f32 %v1944_v16, %v2042_v60 }
  0xb4   :  { %324 = vrot.lane.b32.xlu0 %v316_v35, %s1889_s27  ;;  %v1386_v35 = vmul.f32 %v1944_v16, %v2062_v5  ;;  %v799_v16 = vmul.f32 %v2019_v50, %v1971_v31 }
  0xb5   :  { %259 = vrot.lane.b32.xlu1 %v249_v30, %s1890_s0  ;;  %v1392_v30 = vmul.f32 %v1962_v28, %v1978_v34 }
  0xb7   :  { %v2179_v47 = vadd.f32 %v1392_v30, %v1384_v27  ;;  %v405_v27 = vmul.f32 %v2036_v57, %v1938_v14  ;;  %v480_v30 = vmul.f32 %v2104_v36, %v2034_v56 }
  0xb8   :  { %328 = vrot.lane.b32.xlu0 %v318_v41, %s1889_s27  ;;  %v1394_v41 = vmul.f32 %v1962_v28, %v1986_v37  ;;  %v747_v28 = vmul.f32 %v1938_v14, %v1976_v33 }
  0xb9   :  { %289 = vrot.lane.b32.xlu1 %v281_v39, %s1891_s5  ;;  %v343_v39 = vmul.f32 %v1976_v33, %v2031_v55  ;;  %3563 = vst [vmem:[#allocation32_spill] sm:$0xff] %v2179_v47  ;;  %v685_v47 = vmul.f32 %v2028_v54, %v2002_v44 }
  0xbc   :  { %350 = vrot.lane.b32.xlu0 %v342_v59, %s1889_s27  ;;  %v1393_v59 = vmul.f32 %v1965_v29, %v1986_v37 }
  0xbd   :  { %291 = vrot.lane.b32.xlu1 %v282_v61, %s1891_s5  ;;  %v2186_v61 = vadd.f32 %v1394_v41, %v1386_v35  ;;  %v429_v35 = vmul.f32 %v2056_v2, %v2031_v55  ;;  %v431_v41 = vmul.f32 %v2015_v49, %v2031_v55 }
  0xbf   :  { %3564 = vst [vmem:[#allocation33_spill] sm:$0xff] %v2186_v61 }
  0xc0   :  { %354 = vrot.lane.b32.xlu0 %v344_v8, %s1889_s27  ;;  %v377_v8 = vmul.f32 %v2019_v50, %v2002_v44 }
  0xc1   :  { %295 = vrot.lane.b32.xlu1 %v284_v1, %s1891_s5  ;;  %v2192_v1 = vadd.f32 %v1393_v59, %v1385_v58  ;;  %v528_v58 = vmul.f32 %v2005_v45, %v1993_v40  ;;  %v457_v59 = vmul.f32 %v2082_v22, %v1971_v31 }
  0xc3   :  { %3566 = vst [vmem:[#allocation35_spill] sm:$0xff] %v2192_v1 }
  0xc4   :  { %384 = vrot.lane.b32.xlu0 %v376_v11, %s1889_s27  ;;  %v430_v11 = vmul.f32 %v2015_v49, %v2034_v56 }
  0xc5   :  { %326 = vrot.lane.b32.xlu1 %v317_v23, %s1889_s27  ;;  %v379_v23 = vmul.f32 %v2023_v52, %v2002_v44 }
  0xc8   :  { %388 = vrot.lane.b32.xlu0 %v378_v24, %s1889_s27  ;;  %v454_v24 = vmul.f32 %v2021_v51, %v1974_v32 }
  0xc9   :  { %330 = vrot.lane.b32.xlu1 %v319_v25, %s1889_s27  ;;  %v403_v25 = vmul.f32 %v1999_v43, %v1938_v14 }
  0xcc   :  { %410 = vrot.lane.b32.xlu0 %v402_v26, %s1889_s27  ;;  %v456_v26 = vmul.f32 %v2082_v22, %v1974_v32 }
  0xcd   :  { %352 = vrot.lane.b32.xlu1 %v343_v39, %s1889_s27  ;;  %v482_v39 = vmul.f32 %v2028_v54, %v2034_v56 }
  0xd0   :  { %414 = vrot.lane.b32.xlu0 %v404_v0, %s1889_s27  ;;  %v552_v0 = vmul.f32 %v2013_v48, %v1974_v32 }
  0xd1   :  { %356 = vrot.lane.b32.xlu1 %v345_v6, %s1889_s27  ;;  %v481_v6 = vmul.f32 %v2104_v36, %v2031_v55 }
  0xd4   :  { %436 = vrot.lane.b32.xlu0 %v428_v7, %s1890_s0 }
  0xd5   :  { %386 = vrot.lane.b32.xlu1 %v377_v8, %s1889_s27 }
  0xd8   :  { %440 = vrot.lane.b32.xlu0 %v430_v11, %s1890_s0  ;;  %v554_v11 = vmul.f32 %v1988_v38, %v1974_v32 }
  0xd9   :  { %390 = vrot.lane.b32.xlu1 %v379_v23, %s1889_s27  ;;  %v134_v23 = vmul.f32 %v2002_v44, %v2013_v48 }
  0xdc   :  { %462 = vrot.lane.b32.xlu0 %v454_v24, %s1891_s5 }
  0xdd   :  { %412 = vrot.lane.b32.xlu1 %v403_v25, %s1889_s27 }
  0xe0   :  { %466 = vrot.lane.b32.xlu0 %v456_v26, %s1891_s5  ;;  %v483_v26 = vmul.f32 %v2028_v54, %v2031_v55 }
  0xe1   :  { %416 = vrot.lane.b32.xlu1 %v405_v27, %s1889_s27  ;;  %v133_v27 = vmul.f32 %v2005_v45, %v2013_v48 }
  0xe4   :  { %488 = vrot.lane.b32.xlu0 %v480_v30, %s1891_s5 }
  0xe5   :  { %438 = vrot.lane.b32.xlu1 %v429_v35, %s1890_s0 }
  0xe8   :  { %492 = vrot.lane.b32.xlu0 %v482_v39, %s1891_s5 }
  0xe9   :  { %442 = vrot.lane.b32.xlu1 %v431_v41, %s1890_s0  ;;  %v527_v41 = vmul.f32 %v2002_v44, %v1976_v33 }
  0xec   :  { %534 = vrot.lane.b32.xlu0 %v526_v42, %s1889_s27 }
  0xed   :  { %464 = vrot.lane.b32.xlu1 %v455_v46, %s1891_s5 }
  0xf0   :  { %538 = vrot.lane.b32.xlu0 %v528_v58, %s1889_s27  ;;  %v529_v58 = vmul.f32 %v2002_v44, %v1993_v40 }
  0xf1   :  { %468 = vrot.lane.b32.xlu1 %v457_v59, %s1891_s5  ;;  %v136_v59 = vmul.f32 %v2002_v44, %v1988_v38 }
  0xf4   :  { %560 = vrot.lane.b32.xlu0 %v552_v0, %s1890_s0 }
  0xf5   :  { %490 = vrot.lane.b32.xlu1 %v481_v6, %s1891_s5 }
  0xf6   :  { %v96_v7 = vpop.permute.xlu0 %95  ;;  %v94_v8 = vpop.permute.xlu1 %93 }
  0xf7   :  { %v109_v24 = vadd.f32 %v96_v7, %v2058_v3  ;;  %v102_v25 = vsel %vm101_vm0, %v94_v8, %v96_v7  ;;  %v578_v3 = vmul.f32 %v2019_v50, %v2034_v56  ;;  %v135_v7 = vmul.f32 %v2005_v45, %v1988_v38 }
  0xf8   :  { %v108_v30 = vadd.f32 %v102_v25, %v2060_v4  ;;  %564 = vrot.lane.b32.xlu0 %v554_v11, %s1890_s0  ;;  %v580_v4 = vmul.f32 %v2023_v52, %v2034_v56  ;;  %v606_v25 = vmul.f32 %v2036_v57, %v1974_v32 }
  0xf9   :  { %v2264_v35 = vadd.f32 %v134_v23, %v109_v24  ;;  %494 = vrot.lane.b32.xlu1 %v483_v26, %s1891_s5  ;;  %v604_v23 = vmul.f32 %v1999_v43, %v1974_v32  ;;  %v630_v26 = vmul.f32 %v2056_v2, %v2005_v45 }
  0xfa   :  { %v2267_v39 = vadd.f32 %v133_v27, %v108_v30  ;;  %v579_v27 = vmul.f32 %v2019_v50, %v2031_v55 }
  0xfc   :  { %586 = vrot.lane.b32.xlu0 %v578_v3, %s1890_s0 }
  0xfd   :  { %536 = vrot.lane.b32.xlu1 %v527_v41, %s1889_s27  ;;  %v632_v41 = vmul.f32 %v2015_v49, %v2005_v45 }
  0xff   :  { %v100_v42 = vpop.permute.xlu0 %99  ;;  %v98_v46 = vpop.permute.xlu1 %97 }
 0x100   :  { %v111_v0 = vadd.f32 %v100_v42, %v2078_v12  ;;  %v103_v6 = vsel %vm101_vm0, %v98_v46, %v100_v42  ;;  %590 = vrot.lane.b32.xlu0 %v580_v4, %s1890_s0  ;;  %v553_v12 = vmul.f32 %v2013_v48, %v1971_v31  ;;  %v581_v4 = vmul.f32 %v2023_v52, %v2031_v55 }
 0x101   :  { %v110_v8 = vadd.f32 %v103_v6, %v2080_v19  ;;  %540 = vrot.lane.b32.xlu1 %v529_v58, %s1889_s27  ;;  %v555_v19 = vmul.f32 %v1988_v38, %v1971_v31  ;;  %v656_v58 = vmul.f32 %v2021_v51, %v1935_v13  ;;  %v658_v6 = vmul.f32 %v2082_v22, %v1935_v13 }
 0x102   :  { %v2288_v11 = vadd.f32 %v136_v59, %v111_v0  ;;  %v605_v59 = vmul.f32 %v1999_v43, %v1971_v31 }
 0x103   :  { %v2292_v24 = vadd.f32 %v135_v7, %v110_v8  ;;  %v2310_v30 = vpop.permute.xlu0 %188  ;;  %v2312_v3 = vpop.permute.xlu1 %186  ;;  %v607_v8 = vmul.f32 %v2036_v57, %v1971_v31 }
 0x104   :  { %612 = vrot.lane.b32.xlu0 %v604_v23, %s1891_s5 }
 0x105   :  { %562 = vrot.lane.b32.xlu1 %v553_v12, %s1890_s0  ;;  %v682_v12 = vmul.f32 %v2104_v36, %v2005_v45 }
 0x108   :  { %616 = vrot.lane.b32.xlu0 %v606_v25, %s1891_s5 }
 0x109   :  { %566 = vrot.lane.b32.xlu1 %v555_v19, %s1890_s0  ;;  %v631_v19 = vmul.f32 %v2056_v2, %v2002_v44 }
 0x10c   :  { %638 = vrot.lane.b32.xlu0 %v630_v26, %s1890_s0 }
 0x10d   :  { %588 = vrot.lane.b32.xlu1 %v579_v27, %s1890_s0  ;;  %v684_v27 = vmul.f32 %v2028_v54, %v2005_v45 }
 0x110   :  { %642 = vrot.lane.b32.xlu0 %v632_v41, %s1890_s0 }
 0x111   :  { %592 = vrot.lane.b32.xlu1 %v581_v4, %s1890_s0  ;;  %v633_v4 = vmul.f32 %v2015_v49, %v2002_v44 }
 0x112   :  { %v2320_v42 = vpop.permute.xlu0 %192  ;;  %v2322_v46 = vpop.permute.xlu1 %190 }
 0x114   :  { %664 = vrot.lane.b32.xlu0 %v656_v58, %s1890_s0 }
 0x115   :  { %614 = vrot.lane.b32.xlu1 %v605_v59, %s1891_s5  ;;  %v720_v59 = vmul.f32 %v2005_v45, %v1978_v34 }
 0x116   :  { %v2330_v0 = vpop.permute.xlu0 %224 }
 0x117   :  { %v2334_v7 = vpop.permute.xlu1 %220 }
 0x118   :  { %668 = vrot.lane.b32.xlu0 %v658_v6, %s1890_s0 }
 0x119   :  { %618 = vrot.lane.b32.xlu1 %v607_v8, %s1891_s5  ;;  %v657_v8 = vmul.f32 %v2021_v51, %v1938_v14 }
 0x11a   :  { %v2340_v23 = vpop.permute.xlu0 %257 }
 0x11b   :  { %v2344_v25 = vpop.permute.xlu1 %222 }
 0x11c   :  { %690 = vrot.lane.b32.xlu0 %v682_v12, %s1891_s5 }
 0x11d   :  { %640 = vrot.lane.b32.xlu1 %v631_v19, %s1890_s0  ;;  %v722_v19 = vmul.f32 %v2005_v45, %v1986_v37  ;;  %v749_v37 = vmul.f32 %v1938_v14, %v1993_v40 }
 0x11e   :  { %v2350_v26 = vpop.permute.xlu0 %261 }
 0x11f   :  { %3567 = vst [vmem:[#allocation36_spill] sm:$0xff] %v2350_v26  ;;  %v2354_v41 = vpop.permute.xlu1 %226  ;;  %v825_v26 = vmul.f32 %v1999_v43, %v2031_v55 }
 0x120   :  { %694 = vrot.lane.b32.xlu0 %v684_v27, %s1891_s5 }
 0x121   :  { %644 = vrot.lane.b32.xlu1 %v633_v4, %s1890_s0  ;;  %v659_v4 = vmul.f32 %v2082_v22, %v1938_v14 }
 0x122   :  { %v2360_v58 = vpop.permute.xlu0 %293 }
 0x123   :  { %3568 = vst [vmem:[#allocation37_spill] sm:$0xff] %v2360_v58  ;;  %v2364_v6 = vpop.permute.xlu1 %255 }
 0x124   :  { %728 = vrot.lane.b32.xlu0 %v720_v59, %s1889_s27  ;;  %v746_v59 = vmul.f32 %v1935_v13, %v1976_v33 }
 0x125   :  { %666 = vrot.lane.b32.xlu1 %v657_v8, %s1890_s0 }
 0x126   :  { %v2370_v12 = vpop.permute.xlu0 %324 }
 0x127   :  { %v2374_v27 = vpop.permute.xlu1 %259 }
 0x128   :  { %3569 = vst [vmem:[#allocation38_spill] sm:$0xff] %v2374_v27  ;;  %732 = vrot.lane.b32.xlu0 %v722_v19, %s1889_s27  ;;  %v748_v19 = vmul.f32 %v1935_v13, %v1993_v40 }
 0x129   :  { %670 = vrot.lane.b32.xlu1 %v659_v4, %s1890_s0 }
 0x12a   :  { %v2380_v1 = vpop.permute.xlu0 %328 }
 0x12b   :  { %v2384_v8 = vpop.permute.xlu1 %289 }
 0x12c   :  { %3570 = vst [vmem:[#allocation39_spill] sm:$0xff] %v2384_v8  ;;  %754 = vrot.lane.b32.xlu0 %v746_v59, %s1889_s27  ;;  %v772_v59 = vmul.f32 %v2013_v48, %v2034_v56  ;;  %v2535_v8 = vmul.f32 %v2021_v51, %v2002_v44 }
 0x12d   :  { %692 = vrot.lane.b32.xlu1 %v683_v63, %s1891_s5 }
 0x12e   :  { %v2390_v61 = vpop.permute.xlu0 %350 }
 0x12f   :  { %v2394_v4 = vpop.permute.xlu1 %291 }
 0x130   :  { %758 = vrot.lane.b32.xlu0 %v748_v19, %s1889_s27  ;;  %v774_v19 = vmul.f32 %v1988_v38, %v2034_v56 }
 0x131   :  { %696 = vrot.lane.b32.xlu1 %v685_v47, %s1891_s5 }
 0x132   :  { %v2400_v10 = vpop.permute.xlu0 %354 }
 0x133   :  { %v2404_v63 = vpop.permute.xlu1 %295 }
 0x134   :  { %3571 = vst [vmem:[#allocation40_spill] sm:$0xff] %v2404_v63  ;;  %780 = vrot.lane.b32.xlu0 %v772_v59, %s1890_s0  ;;  %v798_v59 = vmul.f32 %v2019_v50, %v1974_v32  ;;  %v801_v63 = vmul.f32 %v2023_v52, %v1971_v31  ;;  %v2494_v31 = vmul.f32 %v1938_v14, %v1988_v38 }
 0x135   :  { %730 = vrot.lane.b32.xlu1 %v721_v9, %s1889_s27 }
 0x136   :  { %v2410_v62 = vpop.permute.xlu0 %384 }
 0x137   :  { %v2414_v47 = vpop.permute.xlu1 %326 }
 0x138   :  { %784 = vrot.lane.b32.xlu0 %v774_v19, %s1890_s0  ;;  %v800_v19 = vmul.f32 %v2023_v52, %v1974_v32 }
 0x139   :  { %734 = vrot.lane.b32.xlu1 %v723_v53, %s1889_s27 }
 0x13a   :  { %v2420_v29 = vpop.permute.xlu0 %388 }
 0x13b   :  { %v2424_v9 = vpop.permute.xlu1 %330 }
 0x13c   :  { %806 = vrot.lane.b32.xlu0 %v798_v59, %s1891_s5  ;;  %v824_v59 = vmul.f32 %v1999_v43, %v2034_v56  ;;  %v163_v43 = vmul.f32 %v1938_v14, %v2019_v50 }
 0x13d   :  { %756 = vrot.lane.b32.xlu1 %v747_v28, %s1889_s27 }
 0x13e   :  { %v2430_v21 = vpop.permute.xlu0 %410 }
 0x13f   :  { %v2434_v53 = vpop.permute.xlu1 %352 }
 0x140   :  { %810 = vrot.lane.b32.xlu0 %v800_v19, %s1891_s5  ;;  %v826_v19 = vmul.f32 %v2036_v57, %v2034_v56 }
 0x141   :  { %760 = vrot.lane.b32.xlu1 %v749_v37, %s1889_s27 }
 0x142   :  { %v2440_v34 = vpop.permute.xlu0 %414 }
 0x143   :  { %v2444_v28 = vpop.permute.xlu1 %356 }
 0x144   :  { %832 = vrot.lane.b32.xlu0 %v824_v59, %s1891_s5  ;;  %v850_v59 = vmul.f32 %v2056_v2, %v1935_v13 }
 0x145   :  { %782 = vrot.lane.b32.xlu1 %v773_v20, %s1890_s0 }
 0x146   :  { %v2450_v32 = vpop.permute.xlu0 %436 }
 0x147   :  { %v2454_v37 = vpop.permute.xlu1 %386 }
 0x148   :  { %836 = vrot.lane.b32.xlu0 %v826_v19, %s1891_s5  ;;  %v852_v19 = vmul.f32 %v2015_v49, %v1935_v13 }
 0x149   :  { %786 = vrot.lane.b32.xlu1 %v775_v18, %s1890_s0 }
 0x14a   :  { %v2460_v17 = vpop.permute.xlu0 %440 }
 0x14b   :  { %3572 = vst [vmem:[#allocation41_spill] sm:$0xff] %v2460_v17  ;;  %v2464_v20 = vpop.permute.xlu1 %390  ;;  %v2490_v17 = vmul.f32 %v1935_v13, %v1988_v38  ;;  %v369_v38 = vmul.f32 %v1938_v14, %v2013_v48 }
 0x14c   :  { %858 = vrot.lane.b32.xlu0 %v850_v59, %s1890_s0  ;;  %v876_v59 = vmul.f32 %v2021_v51, %v2005_v45  ;;  %v902_v51 = vmul.f32 %v2104_v36, %v1935_v13 }
 0x14d   :  { %808 = vrot.lane.b32.xlu1 %v799_v16, %s1891_s5 }
 0x14e   :  { %v2470_v58 = vpop.permute.xlu0 %462 }
 0x14f   :  { %v2474_v18 = vpop.permute.xlu1 %412 }
 0x150   :  { %862 = vrot.lane.b32.xlu0 %v852_v19, %s1890_s0  ;;  %v2503_v19 = vmul.f32 %v1941_v15, %v1993_v40  ;;  %v309_v40 = vmul.f32 %v2031_v55, %v2042_v60 }
 0x151   :  { %812 = vrot.lane.b32.xlu1 %v801_v63, %s1891_s5  ;;  %v2499_v63 = vmul.f32 %v1941_v15, %v1976_v33  ;;  %v162_v33 = vmul.f32 %v1935_v13, %v2019_v50  ;;  %v332_v15 = vsel %vm101_vm0, %v2370_v12, %v2414_v47  ;;  %v827_v50 = vmul.f32 %v2036_v57, %v2031_v55 }
 0x152   :  { %v2480_v27 = vpop.permute.xlu0 %466  ;;  %3575 = vst [vmem:[#allocation44_spill] sm:$0xff] %v2503_v19  ;;  %v164_v12 = vmul.f32 %v1935_v13, %v2023_v52  ;;  %v311_v57 = vmul.f32 %v2031_v55, %v2062_v5  ;;  %v310_v55 = vmul.f32 %v2034_v56, %v2062_v5 }
 0x153   :  { %3573 = vst [vmem:[#allocation42_spill] sm:$0xff] %v2480_v27  ;;  %v2484_v16 = vpop.permute.xlu1 %416  ;;  %3574 = vst [vmem:[#allocation43_spill] sm:$0xff] %v2499_v63  ;;  %v368_v27 = vmul.f32 %v1935_v13, %v2013_v48  ;;  %v878_v48 = vmul.f32 %v2082_v22, %v2005_v45  ;;  %v339_v45 = vadd.f32 %v2414_v47, %v309_v40 }
 0x154   :  { %884 = vrot.lane.b32.xlu0 %v876_v59, %s1891_s5  ;;  %v853_v59 = vmul.f32 %v2015_v49, %v1938_v14  ;;  %v308_v49 = vmul.f32 %v2034_v56, %v2042_v60  ;;  %v167_v40 = vadd.f32 %v163_v43, %v2264_v35  ;;  %v851_v43 = vmul.f32 %v2056_v2, %v1938_v14 }
 0x155   :  { %834 = vrot.lane.b32.xlu1 %v825_v26, %s1891_s5  ;;  %v165_v26 = vmul.f32 %v1938_v14, %v2023_v52  ;;  %v904_v52 = vmul.f32 %v2028_v54, %v1935_v13 }
 0x156   :  { %v2521_v19 = vpop.permute.xlu0 %488  ;;  %v338_v60 = vadd.f32 %v332_v15, %v308_v49  ;;  %v333_v15 = vsel %vm101_vm0, %v2380_v1, %v2424_v9  ;;  %v201_v35 = vadd.f32 %v2310_v30, %v167_v40  ;;  %v195_v1 = vsel %vm101_vm0, %v2322_v46, %v2320_v42 }
 0x157   :  { %3576 = vst [vmem:[#allocation45_spill] sm:$0xff] %v2521_v19  ;;  %v2529_v63 = vpop.permute.xlu1 %438  ;;  %v358_v19 = vsel %vm101_vm0, %v2390_v61, %v2434_v53  ;;  %v194_v61 = vsel %vm101_vm0, %v2312_v3, %v2310_v30  ;;  %v341_v3 = vadd.f32 %v2424_v9, %v311_v57  ;;  %v229_v57 = vsel %vm228_vm1, %v2334_v7, %v2344_v25 }
 0x158   :  { %888 = vrot.lane.b32.xlu0 %v878_v48, %s1891_s5  ;;  %v365_v48 = vadd.f32 %v2434_v53, %v339_v45  ;;  %v364_v47 = vadd.f32 %v358_v19, %v338_v60  ;;  %v359_v45 = vsel %vm101_vm0, %v2400_v10, %v2444_v28  ;;  %v169_v60 = vadd.f32 %v165_v26, %v2288_v11 }
 0x159   :  { %838 = vrot.lane.b32.xlu1 %v827_v50, %s1891_s5  ;;  %v166_v50 = vadd.f32 %v162_v33, %v2267_v39  ;;  %v2576_v33 = vmul.f32 %v2082_v22, %v2002_v44  ;;  %v340_v39 = vadd.f32 %v333_v15, %v310_v55  ;;  %v392_v30 = vsel %vm101_vm0, %v2410_v62, %v2454_v37 }
 0x15a   :  { %v2559_v49 = vpop.permute.xlu0 %492  ;;  %v373_v10 = vadd.f32 %v369_v38, %v365_v48  ;;  %v168_v11 = vadd.f32 %v164_v12, %v2292_v24  ;;  %v236_v46 = vadd.f32 %v2344_v25, %v201_v35  ;;  %v372_v19 = vadd.f32 %v368_v27, %v364_v47  ;;  %v3580_v35 = vld [vmem:[#allocation38_spill] sm:$0xff] }
 0x15b   :  { %v2564_v13 = vpop.permute.xlu1 %442  ;;  %v200_v56 = vadd.f32 %v194_v61, %v166_v50  ;;  %v366_v53 = vadd.f32 %v359_v45, %v340_v39  ;;  %v203_v40 = vadd.f32 %v2320_v42, %v169_v60  ;;  %v418_v38 = vsel %vm101_vm0, %v2430_v21, %v2474_v18  ;;  %v14_v42 = vld [vmem:[%s3473_s2] sm:$0xff] }
 0x15c   :  { %910 = vrot.lane.b32.xlu0 %v902_v51, %s1891_s5  ;;  %v367_v51 = vadd.f32 %v2444_v28, %v341_v3  ;;  %v399_v7 = vadd.f32 %v2454_v37, %v373_v10  ;;  %v202_v62 = vadd.f32 %v195_v1, %v168_v11  ;;  %v263_v24 = vsel %vm228_vm1, %v2364_v6, %v2340_v23 }
 0x15d   :  { %860 = vrot.lane.b32.xlu1 %v851_v43, %s1890_s0  ;;  %v235_v28 = vadd.f32 %v229_v57, %v200_v56  ;;  %v398_v25 = vadd.f32 %v392_v30, %v372_v19  ;;  %v393_v21 = vsel %vm101_vm0, %v2420_v29, %v2464_v20  ;;  %v444_v37 = vsel %vm228_vm1, %v2450_v32, %v2529_v63  ;;  %v3583_v30 = vld [vmem:[#allocation43_spill] sm:$0xff]  ;;  %v3584_v19 = vld [vmem:[#allocation40_spill] sm:$0xff] }
 0x15e   :  { %v2590_v9 = vpop.permute.xlu0 %534  ;;  %v375_v27 = vadd.f32 %v2494_v31, %v367_v51  ;;  %v270_v12 = vadd.f32 %v2340_v23, %v236_v46  ;;  %v374_v31 = vadd.f32 %v2490_v17, %v366_v53  ;;  %v3577_v17 = vld [vmem:[#allocation39_spill] sm:$0xff]  ;;  %v3582_v57 = vld [vmem:[#allocation45_spill] sm:$0xff] }
 0x15f   :  { %v465_v26 = vpop.permute.xlu1 %464  ;;  %v424_v61 = vadd.f32 %v418_v38, %v398_v25  ;;  %v269_v50 = vadd.f32 %v263_v24, %v235_v28  ;;  %v3603_v38 = vld [vmem:[#allocation13_spill] sm:$0xff] }
 0x160   :  { %914 = vrot.lane.b32.xlu0 %v904_v52, %s1891_s5  ;;  %v425_v52 = vadd.f32 %v2474_v18, %v399_v7  ;;  %v401_v29 = vadd.f32 %v2464_v20, %v375_v27  ;;  %v419_v18 = vsel %vm101_vm0, %v2440_v34, %v2484_v16  ;;  %v470_v48 = vsel %vm297_vm2, %v2470_v58, %v465_v26 }
 0x161   :  { %864 = vrot.lane.b32.xlu1 %v853_v59, %s1890_s0  ;;  %v230_v59 = vsel %vm228_vm1, %v2330_v0, %v2354_v41  ;;  %v238_v0 = vadd.f32 %v2354_v41, %v203_v40  ;;  %v400_v23 = vadd.f32 %v393_v21, %v374_v31  ;;  %v450_v55 = vadd.f32 %v444_v37, %v424_v61  ;;  %v3579_v41 = vld [vmem:[#allocation36_spill] sm:$0xff] }
 0x162   :  { %v2615_v6 = vpop.permute.xlu0 %538  ;;  %v451_v32 = vadd.f32 %v2529_v63, %v425_v52  ;;  %v298_v20 = vsel %vm297_vm2, %v3577_v17, %v2394_v4  ;;  %v427_v34 = vadd.f32 %v2484_v16, %v401_v29  ;;  %v3578_v63 = vld [vmem:[#allocation41_spill] sm:$0xff]  ;;  %v264_v3 = vsel %vm228_vm1, %v3580_v35, %v3579_v41  ;;  %v3581_v16 = vld [vmem:[#allocation42_spill] sm:$0xff]  ;;  %v3586_v37 = vld [vmem:[#allocation44_spill] sm:$0xff] }
 0x163   :  { %v469_v15 = vpop.permute.xlu1 %468  ;;  %v445_v47 = vsel %vm228_vm1, %v3578_v63, %v2564_v13  ;;  %v2645_v45 = vadd.f32 %v2394_v4, %v270_v12  ;;  %v476_v56 = vadd.f32 %v470_v48, %v450_v55  ;;  %v237_v11 = vadd.f32 %v230_v59, %v202_v62  ;;  %v3588_v29 = vld [vmem:[#allocation4_spill] sm:$0xff]  ;;  %v15_v55 = vld [vmem:[%s3473_s2 + $0x8] sm:$0xff] }
 0x164   :  { %934 = vperm.xlu0 %1878, %v14_v42   ;;  %v477_v58 = vadd.f32 %v465_v26, %v451_v32  ;;  %v453_v1 = vadd.f32 %v2564_v13, %v427_v34  ;;  %v471_v39 = vsel %vm297_vm2, %v3581_v16, %v469_v15  ;;  %v2656_v46 = vadd.f32 %v298_v20, %v269_v50  ;;  %v3585_v26 = vld [vmem:[#allocation37_spill] sm:$0xff]  ;;  %v3589_v50 = vld [vmem:[#allocation23_spill] sm:$0xff] }
 0x165   :  { %886 = vrot.lane.b32.xlu1 %v2535_v8, %s1891_s5  ;;  %v426_v8 = vadd.f32 %v419_v18, %v400_v23  ;;  %v272_v13 = vadd.f32 %v3579_v41, %v238_v0  ;;  %v299_v40 = vsel %vm297_vm2, %v3585_v26, %v3584_v19  ;;  %v271_v62 = vadd.f32 %v264_v3, %v237_v11  ;;  %v3590_v34 = vld [vmem:[#allocation3_spill] sm:$0xff]  ;;  %v3592_v41 = vld [vmem:[#allocation5_spill] sm:$0xff] }
 0x166   :  { %v2639_v43 = vpop.permute.xlu0 %560  ;;  %v479_v7 = vadd.f32 %v469_v15, %v453_v1  ;;  %v3587_v15 = vld [vmem:[#allocation16_spill] sm:$0xff]  ;;  %v905_v48 = vmul.f32 %v2028_v54, %v1938_v14  ;;  %v1080_v23 = vmul.f32 %v3588_v29, %v3589_v50  ;;  %v1104_v63 = vmul.f32 %v3590_v34, %v2056_v2  ;;  %v3594_v1 = vld [vmem:[#allocation15_spill] sm:$0xff] }
 0x167   :  { %v491_v60 = vpop.permute.xlu1 %490  ;;  %v452_v4 = vadd.f32 %v445_v47, %v426_v8  ;;  %v2675_v27 = vadd.f32 %v3584_v19, %v272_v13  ;;  %v2683_v59 = vadd.f32 %v299_v40, %v271_v62  ;;  %v1078_v18 = vmul.f32 %v3588_v29, %v3587_v15  ;;  %v3593_v8 = vld [vmem:[#allocation19_spill] sm:$0xff] }
 0x168   :  { %v496_v51 = vsel %vm297_vm2, %v3582_v57, %v491_v60  ;;  %v2652_v10 = vadd.f32 %v491_v60, %v477_v58  ;;  %1019 = vrot.lane.b32.xlu0 %v3583_v30, %s1889_s27  ;;  %v3591_v58 = vld [vmem:[#allocation11_spill] sm:$0xff]  ;;  %v1011_v16 = vmul.f32 %v3592_v41, %v3594_v1  ;;  %v3595_v57 = vld [vmem:[#allocation21_spill] sm:$0xff] }
 0x169   :  { %v2658_v53 = vadd.f32 %v496_v51, %v476_v56  ;;  %890 = vrot.lane.b32.xlu1 %v2576_v33, %s1891_s5  ;;  %v478_v24 = vadd.f32 %v471_v39, %v452_v4  ;;  %v903_v33 = vmul.f32 %v2104_v36, %v1938_v14  ;;  %v1009_v35 = vmul.f32 %v3592_v41, %v3591_v58  ;;  %v3596_v51 = vld [vmem:[#allocation6_spill] sm:$0xff]  ;;  %v3597_v4 = vld [vmem:[#allocation7_spill] sm:$0xff] }
 0x16a   :  { %v2668_v28 = vpop.permute.xlu0 %564  ;;  %v1106_v56 = vmul.f32 %v3590_v34, %v3593_v8  ;;  %v1130_v30 = vmul.f32 %v3596_v51, %v3595_v57  ;;  %v1077_v13 = vmul.f32 %v3597_v4, %v3587_v15  ;;  %v1132_v26 = vmul.f32 %v3596_v51, %v2082_v22 }
 0x16b   :  { %v495_v42 = vpop.permute.xlu1 %494 }
 0x16c   :  { %v497_v21 = vsel %vm297_vm2, %v2559_v49, %v495_v42  ;;  %v2679_v52 = vadd.f32 %v495_v42, %v479_v7  ;;  %1023 = vrot.lane.b32.xlu0 %v3586_v37, %s1889_s27  ;;  %v1079_v7 = vmul.f32 %v3597_v4, %v3589_v50  ;;  %v1158_v37 = vmul.f32 %v3590_v34, %v2028_v54 }
 0x16d   :  { %v2685_v12 = vadd.f32 %v497_v21, %v478_v24  ;;  %912 = vrot.lane.b32.xlu1 %v903_v33, %s1891_s5  ;;  %v1156_v24 = vmul.f32 %v3590_v34, %v2104_v36  ;;  %v1103_v33 = vmul.f32 %v3592_v41, %v2056_v2 }
 0x16e   :  { %v2690_v61 = vpop.permute.xlu0 %586 }
 0x16f   :  { %v2696_v32 = vpop.permute.xlu1 %536 }
 0x170   :  { %1087 = vrot.lane.b32.xlu0 %v1078_v18, %s1889_s27  ;;  %v542_v31 = vsel %vm101_vm0, %v2590_v9, %v2696_v32 }
 0x171   :  { %916 = vrot.lane.b32.xlu1 %v905_v48, %s1891_s5  ;;  %v1105_v48 = vmul.f32 %v3592_v41, %v3593_v8  ;;  %v521_v8 = vmul.f32 %v1938_v14, %v3603_v38 }
 0x172   :  { %v2702_v0 = vpop.permute.xlu0 %590 }
 0x173   :  { %v2709_v17 = vpop.permute.xlu1 %540 }
 0x174   :  { %1091 = vrot.lane.b32.xlu0 %v1080_v23, %s1889_s27  ;;  %v3598_v23 = vld [vmem:[#allocation24_spill] sm:$0xff] }
 0x175   :  { %939 = vperm.xlu1 %1879, %v15_v55   ;;  %v511_v55 = vmul.f32 %v2002_v44, %v3598_v23 }
 0x176   :  { %v2712_v20 = vpop.permute.xlu0 %612 }
 0x177   :  { %v2716_v47 = vpop.permute.xlu1 %562 }
 0x178   :  { %1113 = vrot.lane.b32.xlu0 %v1104_v63, %s1890_s0  ;;  %v568_v9 = vsel %vm228_vm1, %v2639_v43, %v2716_v47  ;;  %v1216_v43 = vmul.f32 %v3596_v51, %v3591_v58 }
 0x179   :  { %1017 = vrot.lane.b32.xlu1 %v1009_v35, %s1889_s27  ;;  %v3599_v35 = vld [vmem:[#allocation12_spill] sm:$0xff] }
 0x17a   :  { %v2722_v3 = vpop.permute.xlu0 %616 }
 0x17b   :  { %v2726_v60 = vpop.permute.xlu1 %566 }
 0x17c   :  { %1117 = vrot.lane.b32.xlu0 %v1106_v56, %s1890_s0  ;;  %v1190_v56 = vmul.f32 %v3590_v34, %v3599_v35 }
 0x17d   :  { %1021 = vrot.lane.b32.xlu1 %v1011_v16, %s1889_s27  ;;  %v3600_v16 = vld [vmem:[#allocation17_spill] sm:$0xff] }
 0x17e   :  { %v2732_v39 = vpop.permute.xlu0 %638 }
 0x17f   :  { %v589_v11 = vpop.permute.xlu1 %588 }
 0x180   :  { %1139 = vrot.lane.b32.xlu0 %v1130_v30, %s1890_s0  ;;  %v510_v30 = vmul.f32 %v3600_v16, %v3598_v23  ;;  %v1192_v23 = vmul.f32 %v3590_v34, %v3603_v38 }
 0x181   :  { %1085 = vrot.lane.b32.xlu1 %v1077_v13, %s1889_s27 }
 0x182   :  { %v2740_v19 = vpop.permute.xlu0 %642 }
 0x183   :  { %v2744_v40 = vpop.permute.xlu1 %592 }
 0x184   :  { %1143 = vrot.lane.b32.xlu0 %v1132_v26, %s1890_s0  ;;  %v3601_v26 = vld [vmem:[#allocation8_spill] sm:$0xff] }
 0x185   :  { %1089 = vrot.lane.b32.xlu1 %v1079_v7, %s1889_s27  ;;  %v1129_v7 = vmul.f32 %v3601_v26, %v3595_v57 }
 0x186   :  { %v2750_v62 = vpop.permute.xlu0 %664 }
 0x187   :  { %v615_v42 = vpop.permute.xlu1 %614 }
 0x188   :  { %1165 = vrot.lane.b32.xlu0 %v1156_v24, %s1891_s5  ;;  %v519_v24 = vmul.f32 %v1938_v14, %v3599_v35 }
 0x189   :  { %1111 = vrot.lane.b32.xlu1 %v1103_v33, %s1890_s0  ;;  %v3602_v33 = vld [vmem:[#allocation2_spill] sm:$0xff] }
 0x18a   :  { %v2758_v21 = vpop.permute.xlu0 %668  ;;  %v523_v49 = vadd.f32 %v519_v24, %v511_v55  ;;  %v1131_v55 = vmul.f32 %v3601_v26, %v2082_v22 }
 0x18b   :  { %v2762_v18 = vpop.permute.xlu1 %618 }
 0x18c   :  { %1169 = vrot.lane.b32.xlu0 %v1158_v37, %s1891_s5  ;;  %v518_v37 = vmul.f32 %v3602_v33, %v3599_v35 }
 0x18d   :  { %1115 = vrot.lane.b32.xlu1 %v1105_v48, %s1890_s0  ;;  %v513_v48 = vmul.f32 %v2002_v44, %v2062_v5 }
 0x18e   :  { %v2770_v63 = vpop.permute.xlu0 %690  ;;  %v522_v57 = vadd.f32 %v518_v37, %v510_v30  ;;  %v520_v30 = vmul.f32 %v3602_v33, %v3603_v38  ;;  %v543_v37 = vsel %vm101_vm0, %v2615_v6, %v2709_v17  ;;  %v569_v6 = vsel %vm228_vm1, %v2668_v28, %v2726_v60 }
 0x18f   :  { %v641_v13 = vpop.permute.xlu1 %640 }
 0x190   :  { %1199 = vrot.lane.b32.xlu0 %v1190_v56, %s1889_s27  ;;  %v512_v56 = vmul.f32 %v3600_v16, %v2062_v5  ;;  %v548_v24 = vadd.f32 %v542_v31, %v522_v57  ;;  %v525_v16 = vadd.f32 %v521_v8, %v513_v48  ;;  %v1155_v8 = vmul.f32 %v3592_v41, %v2104_v36 }
 0x191   :  { %1137 = vrot.lane.b32.xlu1 %v1129_v7, %s1890_s0  ;;  %v549_v7 = vadd.f32 %v2696_v32, %v523_v49  ;;  %v594_v49 = vsel %vm228_vm1, %v2690_v61, %v589_v11  ;;  %v620_v61 = vsel %vm297_vm2, %v2712_v20, %v615_v42 }
 0x192   :  { %v2789_v25 = vpop.permute.xlu0 %694  ;;  %v524_v31 = vadd.f32 %v520_v30, %v512_v56  ;;  %v574_v57 = vadd.f32 %v568_v9, %v548_v24  ;;  %v551_v48 = vadd.f32 %v2709_v17, %v525_v16  ;;  %v1218_v56 = vmul.f32 %v3596_v51, %v3594_v1 }
 0x193   :  { %v645_v44 = vpop.permute.xlu1 %644  ;;  %v575_v5 = vadd.f32 %v2716_v47, %v549_v7  ;;  %v595_v17 = vsel %vm228_vm1, %v2702_v0, %v2744_v40  ;;  %v1157_v16 = vmul.f32 %v3592_v41, %v2028_v54 }
 0x194   :  { %1203 = vrot.lane.b32.xlu0 %v1192_v23, %s1889_s27  ;;  %v600_v7 = vadd.f32 %v594_v49, %v574_v57  ;;  %v577_v9 = vadd.f32 %v2726_v60, %v551_v48  ;;  %v621_v60 = vsel %vm297_vm2, %v2722_v3, %v2762_v18 }
 0x195   :  { %1141 = vrot.lane.b32.xlu1 %v1131_v55, %s1890_s0  ;;  %v601_v47 = vadd.f32 %v589_v11, %v575_v5  ;;  %v550_v55 = vadd.f32 %v543_v37, %v524_v31  ;;  %v646_v5 = vsel %vm228_vm1, %v2732_v39, %v641_v13  ;;  %v647_v31 = vsel %vm228_vm1, %v2740_v19, %v645_v44 }
 0x196   :  { %v2813_v32 = vpop.permute.xlu0 %728  ;;  %v626_v24 = vadd.f32 %v620_v61, %v600_v7  ;;  %v603_v37 = vadd.f32 %v2744_v40, %v577_v9 }
 0x197   :  { %v667_v23 = vpop.permute.xlu1 %666  ;;  %v627_v28 = vadd.f32 %v615_v42, %v601_v47  ;;  %v576_v11 = vadd.f32 %v569_v6, %v550_v55  ;;  %v1189_v6 = vmul.f32 %v3592_v41, %v3599_v35 }
 0x198   :  { %1225 = vrot.lane.b32.xlu0 %v1216_v43, %s1889_s27  ;;  %v672_v0 = vsel %vm228_vm1, %v2750_v62, %v667_v23  ;;  %v652_v42 = vadd.f32 %v646_v5, %v626_v24  ;;  %v629_v43 = vadd.f32 %v2762_v18, %v603_v37  ;;  %v1191_v24 = vmul.f32 %v3592_v41, %v3603_v38 }
 0x199   :  { %1163 = vrot.lane.b32.xlu1 %v1155_v8, %s1891_s5  ;;  %v653_v49 = vadd.f32 %v641_v13, %v627_v28  ;;  %v602_v39 = vadd.f32 %v595_v17, %v576_v11  ;;  %v3604_v8 = vld [vmem:[#allocation20_spill] sm:$0xff]  ;;  %v3606_v17 = vld [vmem:[#allocation22_spill] sm:$0xff] }
 0x19a   :  { %v2835_v20 = vpop.permute.xlu0 %732  ;;  %v1250_v3 = vmul.f32 %v3588_v29, %v3604_v8  ;;  %v678_v48 = vadd.f32 %v672_v0, %v652_v42  ;;  %v655_v47 = vadd.f32 %v645_v44, %v629_v43  ;;  %v1302_v43 = vmul.f32 %v3596_v51, %v2056_v2 }
 0x19b   :  { %v671_v30 = vpop.permute.xlu1 %670  ;;  %v679_v40 = vadd.f32 %v667_v23, %v653_v49  ;;  %v628_v13 = vadd.f32 %v621_v60, %v602_v39  ;;  %v3610_v49 = vmax.f32 %v2683_v59, %v2685_v12  ;;  %v1215_v39 = vmul.f32 %v3601_v26, %v3591_v58 }
 0x19c   :  { %1229 = vrot.lane.b32.xlu0 %v1218_v56, %s1889_s27  ;;  %v673_v61 = vsel %vm228_vm1, %v2758_v21, %v671_v30  ;;  %v681_v7 = vadd.f32 %v671_v30, %v655_v47  ;;  %v3605_v56 = vmax.f32 %v2645_v45, %v2652_v10  ;;  %v1252_v21 = vmul.f32 %v3588_v29, %v3606_v17 }
 0x19d   :  { %1167 = vrot.lane.b32.xlu1 %v1157_v16, %s1891_s5  ;;  %v654_v23 = vadd.f32 %v647_v31, %v628_v13  ;;  %v3608_v16 = vmax.f32 %v2675_v27, %v2679_v52  ;;  %v1217_v59 = vmul.f32 %v3601_v26, %v3594_v1  ;;  %v3611_v13 = vld [vmem:[#allocation19_spill] sm:$0xff] }
 0x19e   :  { %v2850_v57 = vpop.permute.xlu0 %754 }
 0x19f   :  { %v693_v62 = vpop.permute.xlu1 %692  ;;  %v680_v28 = vadd.f32 %v673_v61, %v654_v23  ;;  %v3612_v61 = vld [vmem:[#allocation21_spill] sm:$0xff]  ;;  %v3613_v23 = vld [vmem:[#allocation10_spill] sm:$0xff] }
 0x1a0   :  { %v698_v18 = vsel %vm297_vm2, %v2770_v63, %v693_v62  ;;  %v705_v19 = vadd.f32 %v693_v62, %v679_v40  ;;  %1259 = vrot.lane.b32.xlu0 %v1250_v3, %s1889_s27  ;;  %v3607_v63 = vmax.f32 %v2656_v46, %v2658_v53  ;;  %v3609_v53 = vld [vmem:[#allocation9_spill] sm:$0xff]  ;;  %v1249_v40 = vmul.f32 %v3597_v4, %v3604_v8 }
 0x1a1   :  { %v704_v55 = vadd.f32 %v698_v18, %v678_v48  ;;  %1197 = vrot.lane.b32.xlu1 %v1189_v6, %s1889_s27  ;;  %v1276_v60 = vmul.f32 %v3609_v53, %v3587_v15  ;;  %v1278_v52 = vmul.f32 %v3609_v53, %v3589_v50  ;;  %v1304_v48 = vmul.f32 %v3596_v51, %v3611_v13 }
 0x1a2   :  { %v2865_v9 = vmax.f32 %v3605_v56, %v705_v19  ;;  %v2867_v44 = vpop.permute.xlu0 %758  ;;  %v1251_v6 = vmul.f32 %v3597_v4, %v3606_v17  ;;  %v1328_v18 = vmul.f32 %v3590_v34, %v3612_v61 }
 0x1a3   :  { %v2874_v5 = vmax.f32 %v3607_v63, %v704_v55  ;;  %v697_v11 = vpop.permute.xlu1 %696  ;;  %v1275_v55 = vmul.f32 %v3613_v23, %v3587_v15  ;;  %v1354_v63 = vmul.f32 %v3596_v51, %v2104_v36 }
 0x1a4   :  { %v699_v45 = vsel %vm297_vm2, %v2789_v25, %v697_v11  ;;  %v707_v10 = vadd.f32 %v697_v11, %v681_v7  ;;  %1263 = vrot.lane.b32.xlu0 %v1252_v21, %s1889_s27  ;;  %v1330_v7 = vmul.f32 %v3590_v34, %v2082_v22 }
 0x1a5   :  { %v706_v30 = vadd.f32 %v699_v45, %v680_v28  ;;  %1201 = vrot.lane.b32.xlu1 %v1191_v24, %s1889_s27  ;;  %v1277_v28 = vmul.f32 %v3613_v23, %v3589_v50  ;;  %v1301_v24 = vmul.f32 %v3601_v26, %v2056_v2 }
 0x1a6   :  { %v2885_v37 = vmax.f32 %v3608_v16, %v707_v10  ;;  %v2887_v46 = vpop.permute.xlu0 %780  ;;  %v1356_v10 = vmul.f32 %v3596_v51, %v2028_v54  ;;  %v1303_v16 = vmul.f32 %v3601_v26, %v3611_v13 }
 0x1a7   :  { %v2894_v25 = vmax.f32 %v3610_v49, %v706_v30  ;;  %v2896_v0 = vpop.permute.xlu1 %730 }
 0x1a8   :  { %1285 = vrot.lane.b32.xlu0 %v1276_v60, %s1889_s27  ;;  %v1400_v60 = vmul.f32 %v3588_v29, %v3591_v58 }
 0x1a9   :  { %1223 = vrot.lane.b32.xlu1 %v1215_v39, %s1889_s27 }
 0x1aa   :  { %v2902_v27 = vpop.permute.xlu0 %784 }
 0x1ab   :  { %v2906_v42 = vpop.permute.xlu1 %734 }
 0x1ac   :  { %1289 = vrot.lane.b32.xlu0 %v1278_v52, %s1889_s27  ;;  %v1327_v52 = vmul.f32 %v3592_v41, %v3612_v61 }
 0x1ad   :  { %1227 = vrot.lane.b32.xlu1 %v1217_v59, %s1889_s27  ;;  %v1402_v59 = vmul.f32 %v3588_v29, %v3594_v1 }
 0x1ae   :  { %v2912_v12 = vpop.permute.xlu0 %806 }
 0x1af   :  { %v757_v31 = vpop.permute.xlu1 %756 }
 0x1b0   :  { %1311 = vrot.lane.b32.xlu0 %v1302_v43, %s1890_s0 }
 0x1b1   :  { %1257 = vrot.lane.b32.xlu1 %v1249_v40, %s1889_s27  ;;  %v1329_v40 = vmul.f32 %v3592_v41, %v2082_v22 }
 0x1b2   :  { %v2920_v3 = vpop.permute.xlu0 %810 }
 0x1b3   :  { %v2924_v62 = vpop.permute.xlu1 %760 }
 0x1b4   :  { %1315 = vrot.lane.b32.xlu0 %v1304_v48, %s1890_s0 }
 0x1b5   :  { %1261 = vrot.lane.b32.xlu1 %v1251_v6, %s1889_s27  ;;  %v3614_v6 = vld [vmem:[#allocation18_spill] sm:$0xff] }
 0x1b6   :  { %v2930_v47 = vpop.permute.xlu0 %832 }
 0x1b7   :  { %v783_v19 = vpop.permute.xlu1 %782 }
 0x1b8   :  { %1337 = vrot.lane.b32.xlu0 %v1328_v18, %s1891_s5  ;;  %v1426_v18 = vmul.f32 %v3590_v34, %v3614_v6 }
 0x1b9   :  { %1283 = vrot.lane.b32.xlu1 %v1275_v55, %s1889_s27 }
 0x1ba   :  { %v2940_v56 = vpop.permute.xlu0 %836 }
 0x1bb   :  { %v2942_v21 = vpop.permute.xlu1 %786 }
 0x1bc   :  { %1341 = vrot.lane.b32.xlu0 %v1330_v7, %s1891_s5  ;;  %v1353_v7 = vmul.f32 %v3601_v26, %v2104_v36 }
 0x1bd   :  { %1287 = vrot.lane.b32.xlu1 %v1277_v28, %s1889_s27  ;;  %v3615_v28 = vld [vmem:[#allocation24_spill] sm:$0xff] }
 0x1be   :  { %v859_v45 = vpop.permute.xlu0 %858 }
 0x1bf   :  { %v809_v11 = vpop.permute.xlu1 %808 }
 0x1c0   :  { %1363 = vrot.lane.b32.xlu0 %v1354_v63, %s1891_s5  ;;  %v713_v63 = vmul.f32 %v1938_v14, %v3615_v28 }
 0x1c1   :  { %1309 = vrot.lane.b32.xlu1 %v1301_v24, %s1890_s0  ;;  %v736_v24 = vsel %vm101_vm0, %v2813_v32, %v2896_v0  ;;  %v1355_v32 = vmul.f32 %v3601_v26, %v2028_v54 }
 0x1c2   :  { %v2964_v49 = vpop.permute.xlu0 %862 }
 0x1c3   :  { %v2956_v30 = vpop.permute.xlu1 %812 }
 0x1c4   :  { %1367 = vrot.lane.b32.xlu0 %v1356_v10, %s1891_s5  ;;  %v712_v10 = vmul.f32 %v3602_v33, %v3615_v28 }
 0x1c5   :  { %1313 = vrot.lane.b32.xlu1 %v1303_v16, %s1890_s0  ;;  %v743_v16 = vadd.f32 %v2896_v0, %v713_v63  ;;  %v814_v63 = vsel %vm297_vm2, %v2912_v12, %v809_v11 }
 0x1c6   :  { %v885_v48 = vpop.permute.xlu0 %884 }
 0x1c7   :  { %v835_v39 = vpop.permute.xlu1 %834 }
 0x1c8   :  { %1409 = vrot.lane.b32.xlu0 %v1400_v60, %s1889_s27  ;;  %v762_v60 = vsel %vm101_vm0, %v2850_v57, %v757_v31 }
 0x1c9   :  { %1335 = vrot.lane.b32.xlu1 %v1327_v52, %s1891_s5  ;;  %v3616_v52 = vld [vmem:[#allocation14_spill] sm:$0xff] }
 0x1ca   :  { %v2996_v36 = vpop.permute.xlu0 %888 }
 0x1cb   :  { %v2972_v43 = vpop.permute.xlu1 %838 }
 0x1cc   :  { %1413 = vrot.lane.b32.xlu0 %v1402_v59, %s1889_s27  ;;  %v1428_v59 = vmul.f32 %v3590_v34, %v3616_v52 }
 0x1cd   :  { %1339 = vrot.lane.b32.xlu1 %v1329_v40, %s1891_s5  ;;  %v742_v40 = vadd.f32 %v736_v24, %v712_v10  ;;  %v1452_v24 = vmul.f32 %v3596_v51, %v3604_v8 }
 0x1cf   :  { %v861_v55 = vpop.permute.xlu1 %860  ;;  %v768_v0 = vadd.f32 %v762_v60, %v742_v40  ;;  %v1454_v40 = vmul.f32 %v3596_v51, %v3606_v17 }
 0x1d0   :  { %1435 = vrot.lane.b32.xlu0 %v1426_v18, %s1890_s0  ;;  %v769_v18 = vadd.f32 %v757_v31, %v743_v16  ;;  %v1399_v31 = vmul.f32 %v3597_v4, %v3591_v58  ;;  %v866_v12 = vsel %vm228_vm1, %v859_v45, %v861_v55  ;;  %v737_v45 = vsel %vm101_vm0, %v2835_v20, %v2906_v42 }
 0x1d1   :  { %1361 = vrot.lane.b32.xlu1 %v1353_v7, %s1891_s5  ;;  %v788_v7 = vsel %vm228_vm1, %v2887_v46, %v783_v19  ;;  %v840_v46 = vsel %vm297_vm2, %v2930_v47, %v835_v39  ;;  %v763_v20 = vsel %vm101_vm0, %v2867_v44, %v2924_v62  ;;  %v1480_v44 = vmul.f32 %v3590_v34, %v3589_v50 }
 0x1d2   :  { %v795_v57 = vadd.f32 %v783_v19, %v769_v18  ;;  %v794_v10 = vadd.f32 %v788_v7, %v768_v0 }
 0x1d3   :  { %v2998_v22 = vpop.permute.xlu1 %864 }
 0x1d4   :  { %1439 = vrot.lane.b32.xlu0 %v1428_v59, %s1890_s0  ;;  %v821_v16 = vadd.f32 %v809_v11, %v795_v57  ;;  %v820_v60 = vadd.f32 %v814_v63, %v794_v10  ;;  %v911_v59 = vpop.permute.xlu0 %910  ;;  %v1401_v11 = vmul.f32 %v3597_v4, %v3594_v1  ;;  %v1478_v57 = vmul.f32 %v3590_v34, %v3587_v15  ;;  %v3617_v63 = vld [vmem:[#allocation25_spill] sm:$0xff] }
 0x1d5   :  { %1365 = vrot.lane.b32.xlu1 %v1355_v32, %s1891_s5 }
 0x1d6   :  { %v847_v19 = vadd.f32 %v835_v39, %v821_v16  ;;  %v846_v32 = vadd.f32 %v840_v46, %v820_v60  ;;  %v1425_v16 = vmul.f32 %v3592_v41, %v3614_v6 }
 0x1d7   :  { %v887_v61 = vpop.permute.xlu1 %886 }
 0x1d8   :  { %1461 = vrot.lane.b32.xlu0 %v1452_v24, %s1890_s0  ;;  %v873_v7 = vadd.f32 %v861_v55, %v847_v19  ;;  %v892_v47 = vsel %vm297_vm2, %v885_v48, %v887_v61  ;;  %v872_v0 = vadd.f32 %v866_v12, %v846_v32  ;;  %v714_v24 = vmul.f32 %v3602_v33, %v3617_v63  ;;  %v915_v48 = vpop.permute.xlu0 %914 }
 0x1d9   :  { %1407 = vrot.lane.b32.xlu1 %v1399_v31, %s1889_s27  ;;  %v715_v55 = vmul.f32 %v1938_v14, %v3617_v63  ;;  %v789_v14 = vsel %vm228_vm1, %v2902_v27, %v2942_v21 }
 0x1da   :  { %v899_v39 = vadd.f32 %v887_v61, %v873_v7  ;;  %v898_v10 = vadd.f32 %v892_v47, %v872_v0  ;;  %v744_v60 = vadd.f32 %v737_v45, %v714_v24  ;;  %v815_v7 = vsel %vm297_vm2, %v2920_v3, %v2956_v30 }
 0x1db   :  { %v3019_v18 = vpop.permute.xlu1 %890  ;;  %v745_v33 = vadd.f32 %v2906_v42, %v715_v55  ;;  %v1427_v42 = vmul.f32 %v3592_v41, %v3616_v52  ;;  %v1504_v3 = vmul.f32 %v3588_v29, %v2056_v2  ;;  %v867_v55 = vsel %vm228_vm1, %v2964_v49, %v2998_v22 }
 0x1dc   :  { %1465 = vrot.lane.b32.xlu0 %v1454_v40, %s1890_s0  ;;  %v770_v40 = vadd.f32 %v763_v20, %v744_v60  ;;  %v893_v49 = vsel %vm297_vm2, %v2996_v36, %v3019_v18  ;;  %v1453_v36 = vmul.f32 %v3601_v26, %v3606_v17 }
 0x1dd   :  { %1411 = vrot.lane.b32.xlu1 %v1401_v11, %s1889_s27 }
 0x1de   :  { %v796_v27 = vadd.f32 %v789_v14, %v770_v40  ;;  %v1051_v40 = vmul.f32 %v3588_v29, %v3616_v52 }
 0x1df   :  { %v913_v31 = vpop.permute.xlu1 %912 }
 0x1e0   :  { %v918_v61 = vsel %vm297_vm2, %v911_v59, %v913_v31  ;;  %v925_v46 = vadd.f32 %v913_v31, %v899_v39  ;;  %1487 = vrot.lane.b32.xlu0 %v1478_v57, %s1891_s5  ;;  %v771_v59 = vadd.f32 %v2924_v62, %v745_v33  ;;  %v841_v62 = vsel %vm297_vm2, %v2940_v56, %v2972_v43  ;;  %v3620_v31 = vld [vmem:[#allocation28_spill] sm:$0xff] }
 0x1e1   :  { %v924_v19 = vadd.f32 %v918_v61, %v898_v10  ;;  %1433 = vrot.lane.b32.xlu1 %v1425_v16, %s1890_s0  ;;  %v822_v45 = vadd.f32 %v815_v7, %v796_v27  ;;  %v1049_v56 = vmul.f32 %v3588_v29, %v3614_v6  ;;  %v1593_v33 = vmul.f32 %v3597_v4, %v3599_v35 }
 0x1e2   :  { %v929_v12 = vmax.f32 %v2865_v9, %v925_v46  ;;  %v797_v47 = vadd.f32 %v2942_v21, %v771_v59  ;;  %v1451_v21 = vmul.f32 %v3601_v26, %v3604_v8  ;;  %v3621_v59 = vld [vmem:[#allocation29_spill] sm:$0xff]  ;;  %v1595_v27 = vmul.f32 %v3597_v4, %v3603_v38 }
 0x1e3   :  { %v928_v32 = vmax.f32 %v2874_v5, %v924_v19  ;;  %v3052_v11 = vpop.permute.xlu0 %934  ;;  %v917_v46 = vpop.permute.xlu1 %916  ;;  %v1070_v19 = vmul.f32 %v3609_v53, %v3604_v8 }
 0x1e4   :  { %v943_v9 = vadd.f32 %v3052_v11, %v929_v12  ;;  %1491 = vrot.lane.b32.xlu0 %v1480_v44, %s1891_s5  ;;  %v823_v39 = vadd.f32 %v2956_v30, %v797_v47  ;;  %v848_v30 = vadd.f32 %v841_v62, %v822_v45  ;;  %v919_v44 = vsel %vm297_vm2, %v915_v48, %v917_v46 }
 0x1e5   :  { %v942_v5 = vadd.f32 %v3052_v11, %v928_v32  ;;  %1437 = vrot.lane.b32.xlu1 %v1427_v42, %s1890_s0  ;;  %v1072_v48 = vmul.f32 %v3609_v53, %v3606_v17 }
 0x1e6   :  { %v947_v0 = vmax.f32 %v943_v9, 0.0  ;;  %v849_v20 = vadd.f32 %v2972_v43, %v823_v39  ;;  %v874_v14 = vadd.f32 %v867_v55, %v848_v30 }
 0x1e7   :  { %v946_v57 = vmax.f32 %v942_v5, 0.0  ;;  %v1020_v24 = vpop.permute.xlu0 %1019 }
 0x1e8   :  { %v1032_v16 = vadd.f32 %v1020_v24, %v3620_v31  ;;  %1513 = vrot.lane.b32.xlu0 %v1504_v3, %s1890_s0  ;;  %v875_v12 = vadd.f32 %v2998_v22, %v849_v20  ;;  %v900_v42 = vadd.f32 %v893_v49, %v874_v14  ;;  %v1503_v20 = vmul.f32 %v3597_v4, %v2056_v2 }
 0x1e9   :  { %v1848_v61 = vpack.c.bf16 %v947_v0, %v946_v57  ;;  %1459 = vrot.lane.b32.xlu1 %v1451_v21, %s1890_s0  ;;  %v1477_v0 = vmul.f32 %v3592_v41, %v3587_v15  ;;  %v1479_v21 = vmul.f32 %v3592_v41, %v3589_v50 }
 0x1ea   :  { %v1053_v60 = vadd.f32 %v1049_v56, %v1032_v16  ;;  %v901_v7 = vadd.f32 %v3019_v18, %v875_v12  ;;  %v926_v47 = vadd.f32 %v919_v44, %v900_v42  ;;  %v1619_v18 = vmul.f32 %v3613_v23, %v3591_v58 }
 0x1eb   :  { %965 = vst.msk [vmem:[%s3474_s3] sm:$0xff] %vm3076_vm5, %v1848_v61  ;;  %v1024_v43 = vpop.permute.xlu0 %1023  ;;  %v1621_v16 = vmul.f32 %v3613_v23, %v3594_v1  ;;  %v1645_v12 = vmul.f32 %v3601_v26, %v3614_v6  ;;  %v1069_v42 = vmul.f32 %v3613_v23, %v3604_v8 }
 0x1ec   :  { %v1034_v32 = vadd.f32 %v1024_v43, %v3621_v59  ;;  %1601 = vrot.lane.b32.xlu0 %v1593_v33, %s1889_s27  ;;  %v1074_v22 = vadd.f32 %v1070_v19, %v1053_v60  ;;  %v927_v5 = vadd.f32 %v917_v46, %v901_v7  ;;  %v930_v45 = vmax.f32 %v2894_v25, %v926_v47  ;;  %v3622_v19 = vld [vmem:[#allocation30_spill] sm:$0xff] }
 0x1ed   :  { %1463 = vrot.lane.b32.xlu1 %v1453_v36, %s1890_s0  ;;  %v1048_v33 = vmul.f32 %v3597_v4, %v3614_v6  ;;  %v1050_v7 = vmul.f32 %v3597_v4, %v3616_v52 }
 0x1ee   :  { %v1055_v9 = vadd.f32 %v1051_v40, %v1034_v32  ;;  %v931_v39 = vmax.f32 %v2885_v37, %v927_v5 }
 0x1ef   :  { %v3112_v62 = vpop.permute.xlu0 %1087 }
 0x1f0   :  { %1605 = vrot.lane.b32.xlu0 %v1595_v27, %s1889_s27  ;;  %v1076_v3 = vadd.f32 %v1072_v48, %v1055_v9  ;;  %v1100_v44 = vadd.f32 %v3112_v62, %v1074_v22  ;;  %v3623_v48 = vld [vmem:[#allocation31_spill] sm:$0xff]  ;;  %v1647_v22 = vmul.f32 %v3601_v26, %v3616_v52 }
 0x1f1   :  { %1485 = vrot.lane.b32.xlu1 %v1477_v0, %s1891_s5 }
 0x1f3   :  { %v1092_v57 = vpop.permute.xlu0 %1091 }
 0x1f4   :  { %1627 = vrot.lane.b32.xlu0 %v1619_v18, %s1889_s27  ;;  %v3125_v55 = vpop.permute.xlu1 %939  ;;  %v1102_v60 = vadd.f32 %v1092_v57, %v1076_v3  ;;  %v1594_v3 = vmul.f32 %v3588_v29, %v3599_v35 }
 0x1f5   :  { %v944_v56 = vadd.f32 %v3125_v55, %v930_v45  ;;  %v945_v31 = vadd.f32 %v3125_v55, %v931_v39  ;;  %1489 = vrot.lane.b32.xlu1 %v1479_v21, %s1891_s5  ;;  %v1671_v21 = vmul.f32 %v3592_v41, %v3604_v8 }
 0x1f7   :  { %v948_v25 = vmax.f32 %v944_v56, 0.0  ;;  %v949_v30 = vmax.f32 %v945_v31, 0.0  ;;  %v1114_v37 = vpop.permute.xlu0 %1113 }
 0x1f8   :  { %1631 = vrot.lane.b32.xlu0 %v1621_v16, %s1889_s27  ;;  %v1018_v61 = vpop.permute.xlu1 %1017  ;;  %v1126_v27 = vadd.f32 %v1114_v37, %v1100_v44  ;;  %v1596_v16 = vmul.f32 %v3588_v29, %v3603_v38 }
 0x1f9   :  { %v1849_v46 = vpack.c.bf16 %v949_v30, %v948_v25  ;;  %v1025_v49 = vsel %vm101_vm0, %v1018_v61, %v1020_v24  ;;  %1511 = vrot.lane.b32.xlu1 %v1503_v20, %s1890_s0  ;;  %v1505_v24 = vmul.f32 %v3597_v4, %v3611_v13  ;;  %v1673_v30 = vmul.f32 %v3592_v41, %v3606_v17 }
 0x1fa   :  { %v1031_v14 = vadd.f32 %v1025_v49, %v3622_v19  ;;  %v1620_v61 = vmul.f32 %v3609_v53, %v3591_v58  ;;  %v1622_v19 = vmul.f32 %v3609_v53, %v3594_v1  ;;  %v1698_v1 = vmul.f32 %v3596_v51, %v3587_v15 }
 0x1fb   :  { %966 = vst.msk [vmem:[%s3474_s3 + $0x8] sm:$0xff] %vm3076_vm5, %v1849_v46  ;;  %v1118_v36 = vpop.permute.xlu0 %1117 }
 0x1fc   :  { %v1052_v40 = vadd.f32 %v1048_v33, %v1031_v14  ;;  %v1128_v59 = vadd.f32 %v1118_v36, %v1102_v60  ;;  %1653 = vrot.lane.b32.xlu0 %v1645_v12, %s1890_s0  ;;  %v1022_v32 = vpop.permute.xlu1 %1021  ;;  %v1506_v60 = vmul.f32 %v3588_v29, %v3611_v13 }
 0x1fd   :  { %v1026_v9 = vsel %vm101_vm0, %v1022_v32, %v1024_v43  ;;  %1515 = vrot.lane.b32.xlu1 %v1505_v24, %s1890_s0  ;;  %v1071_v43 = vmul.f32 %v3613_v23, %v3606_v17  ;;  %v1646_v32 = vmul.f32 %v3596_v51, %v3614_v6 }
 0x1fe   :  { %v1033_v47 = vadd.f32 %v1026_v9, %v3623_v48  ;;  %v1073_v5 = vadd.f32 %v1069_v42, %v1052_v40  ;;  %v1700_v48 = vmul.f32 %v3596_v51, %v3589_v50 }
 0x1ff   :  { %v1140_v0 = vpop.permute.xlu0 %1139 }
 0x200   :  { %v1054_v18 = vadd.f32 %v1050_v7, %v1033_v47  ;;  %v1152_v45 = vadd.f32 %v1140_v0, %v1126_v27  ;;  %1657 = vrot.lane.b32.xlu0 %v1647_v22, %s1890_s0  ;;  %v1086_v39 = vpop.permute.xlu1 %1085  ;;  %v1184_v27 = vmul.f32 %v3596_v51, %v3617_v63  ;;  %v1648_v22 = vmul.f32 %v3596_v51, %v3616_v52 }
 0x201   :  { %1603 = vrot.lane.b32.xlu1 %v1594_v3, %s1889_s27  ;;  %v1093_v33 = vsel %vm101_vm0, %v1086_v39, %v3112_v62  ;;  %v1182_v62 = vmul.f32 %v3596_v51, %v3615_v28 }
 0x202   :  { %v1075_v56 = vadd.f32 %v1071_v43, %v1054_v18  ;;  %v1099_v44 = vadd.f32 %v1093_v33, %v1073_v5  ;;  %v1244_v33 = vmul.f32 %v3609_v53, %v3616_v52 }
 0x203   :  { %v1144_v31 = vpop.permute.xlu0 %1143 }
 0x204   :  { %v1154_v25 = vadd.f32 %v1144_v31, %v1128_v59  ;;  %1679 = vrot.lane.b32.xlu0 %v1671_v21, %s1891_s5  ;;  %v1090_v35 = vpop.permute.xlu1 %1089  ;;  %v1672_v21 = vmul.f32 %v3590_v34, %v3604_v8  ;;  %v1674_v8 = vmul.f32 %v3590_v34, %v3606_v17  ;;  %v1697_v34 = vmul.f32 %v3601_v26, %v3587_v15 }
 0x205   :  { %1607 = vrot.lane.b32.xlu1 %v1596_v16, %s1889_s27  ;;  %v1094_v38 = vsel %vm101_vm0, %v1090_v35, %v1092_v57  ;;  %v1242_v16 = vmul.f32 %v3609_v53, %v3614_v6  ;;  %v3625_v35 = vld [vmem:[#allocation26_spill] sm:$0xff] }
 0x206   :  { %v1101_v58 = vadd.f32 %v1094_v38, %v1075_v56 }
 0x207   :  { %v1166_v20 = vpop.permute.xlu0 %1165 }
 0x208   :  { %v3176_v46 = vadd.f32 %v1166_v20, %v1152_v45  ;;  %1683 = vrot.lane.b32.xlu0 %v1673_v30, %s1891_s5  ;;  %v1112_v49 = vpop.permute.xlu1 %1111  ;;  %v3624_v45 = vld [vmem:[#allocation21_spill] sm:$0xff]  ;;  %v1532_v30 = vmul.f32 %v3609_v53, %v3625_v35 }
 0x209   :  { %1629 = vrot.lane.b32.xlu1 %v1620_v61, %s1889_s27  ;;  %v1119_v57 = vsel %vm228_vm1, %v1112_v49, %v1114_v37  ;;  %v1530_v39 = vmul.f32 %v3609_v53, %v3624_v45 }
 0x20a   :  { %v1125_v42 = vadd.f32 %v1119_v57, %v1099_v44 }
 0x20b   :  { %v1170_v41 = vpop.permute.xlu0 %1169 }
 0x20c   :  { %v3187_v14 = vadd.f32 %v1170_v41, %v1154_v25  ;;  %1517 = vrot.lane.b32.xlu0 %v1506_v60, %s1890_s0  ;;  %v1116_v12 = vpop.permute.xlu1 %1115 }
 0x20d   :  { %v1120_v24 = vsel %vm228_vm1, %v1116_v12, %v1118_v36  ;;  %1633 = vrot.lane.b32.xlu1 %v1622_v19, %s1889_s27 }
 0x20e   :  { %v1127_v40 = vadd.f32 %v1120_v24, %v1101_v58  ;;  %v1724_v58 = vmul.f32 %v3609_v53, %v2056_v2  ;;  %v1181_v24 = vmul.f32 %v3601_v26, %v3615_v28 }
 0x20f   :  { %v1200_v59 = vpop.permute.xlu0 %1199 }
 0x210   :  { %v1212_v7 = vadd.f32 %v1200_v59, %v1182_v62  ;;  %1707 = vrot.lane.b32.xlu0 %v1698_v1, %s1891_s5  ;;  %v1138_v37 = vpop.permute.xlu1 %1137  ;;  %v1726_v62 = vmul.f32 %v3609_v53, %v3611_v13 }
 0x211   :  { %v1145_v36 = vsel %vm228_vm1, %v1138_v37, %v1140_v0  ;;  %1655 = vrot.lane.b32.xlu1 %v1646_v32, %s1890_s0  ;;  %v1699_v32 = vmul.f32 %v3601_v26, %v3589_v50 }
 0x212   :  { %v1151_v9 = vadd.f32 %v1145_v36, %v1125_v42  ;;  %v1183_v42 = vmul.f32 %v3601_v26, %v3617_v63  ;;  %v3626_v36 = vld [vmem:[#allocation27_spill] sm:$0xff] }
 0x213   :  { %v1204_v47 = vpop.permute.xlu0 %1203 }
 0x214   :  { %v1214_v5 = vadd.f32 %v1204_v47, %v1184_v27  ;;  %1711 = vrot.lane.b32.xlu0 %v1700_v48, %s1891_s5  ;;  %v1142_v3 = vpop.permute.xlu1 %1141  ;;  %v1529_v48 = vmul.f32 %v3613_v23, %v3624_v45 }
 0x215   :  { %v1146_v18 = vsel %vm228_vm1, %v1142_v3, %v1144_v31  ;;  %1659 = vrot.lane.b32.xlu1 %v1648_v22, %s1890_s0  ;;  %v1241_v3 = vmul.f32 %v3613_v23, %v3614_v6  ;;  %v1243_v6 = vmul.f32 %v3613_v23, %v3616_v52  ;;  %v1725_v52 = vmul.f32 %v3613_v23, %v3611_v13 }
 0x216   :  { %v1153_v0 = vadd.f32 %v1146_v18, %v1127_v40 }
 0x217   :  { %v1226_v43 = vpop.permute.xlu0 %1225 }
 0x218   :  { %v1238_v56 = vadd.f32 %v1226_v43, %v1212_v7  ;;  %1539 = vrot.lane.b32.xlu0 %v1530_v39, %s1890_s0  ;;  %v1164_v51 = vpop.permute.xlu1 %1163 }
 0x219   :  { %v1171_v25 = vsel %vm297_vm2, %v1164_v51, %v1166_v20  ;;  %1681 = vrot.lane.b32.xlu1 %v1672_v21, %s1891_s5 }
 0x21a   :  { %v3220_v31 = vadd.f32 %v1171_v25, %v1151_v9  ;;  %v1246_v61 = vadd.f32 %v1242_v16, %v1238_v56  ;;  %v1556_v9 = vmul.f32 %v3588_v29, %v3626_v36  ;;  %v1750_v16 = vmul.f32 %v3588_v29, %v3624_v45 }
 0x21b   :  { %v1230_v49 = vpop.permute.xlu0 %1229 }
 0x21c   :  { %v1240_v38 = vadd.f32 %v1230_v49, %v1214_v5  ;;  %1543 = vrot.lane.b32.xlu0 %v1532_v30, %s1890_s0  ;;  %v1168_v60 = vpop.permute.xlu1 %1167  ;;  %v1723_v30 = vmul.f32 %v3613_v23, %v2056_v2 }
 0x21d   :  { %v1172_v20 = vsel %vm297_vm2, %v1168_v60, %v1170_v41  ;;  %1685 = vrot.lane.b32.xlu1 %v1674_v8, %s1891_s5 }
 0x21e   :  { %v3231_v19 = vadd.f32 %v1172_v20, %v1153_v0  ;;  %v1248_v12 = vadd.f32 %v1244_v33, %v1240_v38  ;;  %v1531_v0 = vmul.f32 %v3613_v23, %v3625_v35  ;;  %v1752_v33 = vmul.f32 %v3588_v29, %v3625_v35 }
 0x21f   :  { %v1260_v57 = vpop.permute.xlu0 %1259 }
 0x220   :  { %v1272_v17 = vadd.f32 %v1260_v57, %v1246_v61  ;;  %1733 = vrot.lane.b32.xlu0 %v1724_v58, %s1890_s0  ;;  %v1198_v44 = vpop.permute.xlu1 %1197 }
 0x221   :  { %v1205_v41 = vsel %vm101_vm0, %v1198_v44, %v1200_v59  ;;  %1705 = vrot.lane.b32.xlu1 %v1697_v34, %s1891_s5 }
 0x222   :  { %v1211_v40 = vadd.f32 %v1205_v41, %v1181_v24 }
 0x223   :  { %v1264_v1 = vpop.permute.xlu0 %1263 }
 0x224   :  { %v1274_v15 = vadd.f32 %v1264_v1, %v1248_v12  ;;  %1737 = vrot.lane.b32.xlu0 %v1726_v62, %s1890_s0  ;;  %v1202_v7 = vpop.permute.xlu1 %1201 }
 0x225   :  { %v1206_v37 = vsel %vm101_vm0, %v1202_v7, %v1204_v47  ;;  %1709 = vrot.lane.b32.xlu1 %v1699_v32, %s1891_s5  ;;  %v1558_v47 = vmul.f32 %v3588_v29, %v2028_v54  ;;  %v1555_v29 = vmul.f32 %v3597_v4, %v3626_v36 }
 0x226   :  { %v1213_v59 = vadd.f32 %v1206_v37, %v1183_v42 }
 0x227   :  { %v1286_v27 = vpop.permute.xlu0 %1285 }
 0x228   :  { %v1298_v50 = vadd.f32 %v1286_v27, %v1272_v17  ;;  %1565 = vrot.lane.b32.xlu0 %v1556_v9, %s1891_s5  ;;  %v1224_v22 = vpop.permute.xlu1 %1223 }
 0x229   :  { %v1231_v5 = vsel %vm101_vm0, %v1224_v22, %v1226_v43  ;;  %1537 = vrot.lane.b32.xlu1 %v1529_v48, %s1890_s0 }
 0x22a   :  { %v1237_v26 = vadd.f32 %v1231_v5, %v1211_v40  ;;  %v1778_v40 = vmul.f32 %v3609_v53, %v2028_v54 }
 0x22b   :  { %v1290_v18 = vpop.permute.xlu0 %1289 }
 0x22c   :  { %v1300_v39 = vadd.f32 %v1290_v18, %v1274_v15  ;;  %1569 = vrot.lane.b32.xlu0 %v1558_v47, %s1891_s5  ;;  %v1228_v21 = vpop.permute.xlu1 %1227  ;;  %v1245_v56 = vadd.f32 %v1241_v3, %v1237_v26  ;;  %v1751_v26 = vmul.f32 %v3597_v4, %v3625_v35 }
 0x22d   :  { %v1232_v43 = vsel %vm101_vm0, %v1228_v21, %v1230_v49  ;;  %1541 = vrot.lane.b32.xlu1 %v1531_v0, %s1890_s0  ;;  %v1775_v21 = vmul.f32 %v3613_v23, %v3626_v36 }
 0x22e   :  { %v1239_v51 = vadd.f32 %v1232_v43, %v1213_v59  ;;  %v1749_v59 = vmul.f32 %v3597_v4, %v3624_v45 }
 0x22f   :  { %v1312_v25 = vpop.permute.xlu0 %1311 }
 0x230   :  { %v1324_v61 = vadd.f32 %v1312_v25, %v1298_v50  ;;  %1759 = vrot.lane.b32.xlu0 %v1750_v16, %s1891_s5  ;;  %v1258_v8 = vpop.permute.xlu1 %1257  ;;  %v1247_v38 = vadd.f32 %v1243_v6, %v1239_v51  ;;  %v1777_v6 = vmul.f32 %v3613_v23, %v2028_v54 }
 0x231   :  { %v1265_v49 = vsel %vm101_vm0, %v1258_v8, %v1260_v57  ;;  %1731 = vrot.lane.b32.xlu1 %v1723_v30, %s1890_s0  ;;  %v1776_v57 = vmul.f32 %v3609_v53, %v3626_v36 }
 0x232   :  { %v1271_v60 = vadd.f32 %v1265_v49, %v1245_v56  ;;  %v3627_v56 = vld [vmem:[#allocation32_spill] sm:$0xff] }
 0x233   :  { %v1316_v20 = vpop.permute.xlu0 %1315 }
 0x234   :  { %v1326_v58 = vadd.f32 %v1316_v20, %v1300_v39  ;;  %1763 = vrot.lane.b32.xlu0 %v1752_v33, %s1891_s5  ;;  %v1262_v2 = vpop.permute.xlu1 %1261 }
 0x235   :  { %v1266_v12 = vsel %vm101_vm0, %v1262_v2, %v1264_v1  ;;  %1735 = vrot.lane.b32.xlu1 %v1725_v52, %s1890_s0  ;;  %v1557_v1 = vmul.f32 %v3597_v4, %v2028_v54 }
 0x236   :  { %v1273_v34 = vadd.f32 %v1266_v12, %v1247_v38 }
 0x237   :  { %v1338_v17 = vpop.permute.xlu0 %1337 }
 0x238   :  { %v1350_v24 = vadd.f32 %v1338_v17, %v1324_v61  ;;  %1785 = vrot.lane.b32.xlu0 %v1776_v57, %s1891_s5  ;;  %v1284_v13 = vpop.permute.xlu1 %1283 }
 0x239   :  { %v1291_v44 = vsel %vm101_vm0, %v1284_v13, %v1286_v27  ;;  %1563 = vrot.lane.b32.xlu1 %v1555_v29, %s1891_s5 }
 0x23a   :  { %v1297_v41 = vadd.f32 %v1291_v44, %v1271_v60  ;;  %v3629_v44 = vld [vmem:[#allocation34_spill] sm:$0xff] }
 0x23b   :  { %v1342_v62 = vpop.permute.xlu0 %1341 }
 0x23c   :  { %v1352_v32 = vadd.f32 %v1342_v62, %v1326_v58  ;;  %1789 = vrot.lane.b32.xlu0 %v1778_v40, %s1891_s5  ;;  %v1288_v15 = vpop.permute.xlu1 %1287 }
 0x23d   :  { %v1292_v42 = vsel %vm101_vm0, %v1288_v15, %v1290_v18  ;;  %1567 = vrot.lane.b32.xlu1 %v1557_v1, %s1891_s5  ;;  %v3630_v15 = vld [vmem:[#allocation35_spill] sm:$0xff] }
 0x23e   :  { %v1299_v7 = vadd.f32 %v1292_v42, %v1273_v34 }
 0x23f   :  { %v1364_v37 = vpop.permute.xlu0 %1363 }
 0x240   :  { %v3299_v9 = vadd.f32 %v1364_v37, %v1350_v24  ;;  %v1310_v27 = vpop.permute.xlu1 %1309 }
 0x241   :  { %v1317_v48 = vsel %vm228_vm1, %v1310_v27, %v1312_v25  ;;  %1757 = vrot.lane.b32.xlu1 %v1749_v59, %s1891_s5  ;;  %v3628_v25 = vld [vmem:[#allocation33_spill] sm:$0xff] }
 0x242   :  { %v1380_v50 = vmax.f32 %v3176_v46, %v3299_v9  ;;  %v1323_v22 = vadd.f32 %v1317_v48, %v1297_v41 }
 0x243   :  { %v1368_v5 = vpop.permute.xlu0 %1367 }
 0x244   :  { %v3307_v47 = vadd.f32 %v1368_v5, %v1352_v32  ;;  %v1314_v3 = vpop.permute.xlu1 %1313 }
 0x245   :  { %v1318_v45 = vsel %vm228_vm1, %v1314_v3, %v1316_v20  ;;  %1761 = vrot.lane.b32.xlu1 %v1751_v26, %s1891_s5 }
 0x246   :  { %v1382_v18 = vmax.f32 %v3187_v14, %v3307_v47  ;;  %v1325_v0 = vadd.f32 %v1318_v45, %v1299_v7 }
 0x247   :  { %v1410_v39 = vpop.permute.xlu0 %1409 }
 0x248   :  { %v1422_v43 = vadd.f32 %v1410_v39, %v3627_v56  ;;  %v1336_v51 = vpop.permute.xlu1 %1335 }
 0x249   :  { %v1343_v4 = vsel %vm297_vm2, %v1336_v51, %v1338_v17  ;;  %1783 = vrot.lane.b32.xlu1 %v1775_v21, %s1891_s5 }
 0x24a   :  { %v1349_v35 = vadd.f32 %v1343_v4, %v1323_v22 }
 0x24b   :  { %v1414_v16 = vpop.permute.xlu0 %1413 }
 0x24c   :  { %v1424_v30 = vadd.f32 %v1414_v16, %v3628_v25  ;;  %v1340_v61 = vpop.permute.xlu1 %1339 }
 0x24d   :  { %v1344_v8 = vsel %vm297_vm2, %v1340_v61, %v1342_v62  ;;  %1787 = vrot.lane.b32.xlu1 %v1777_v6, %s1891_s5 }
 0x24e   :  { %v1351_v36 = vadd.f32 %v1344_v8, %v1325_v0 }
 0x24f   :  { %v1436_v38 = vpop.permute.xlu0 %1435 }
 0x250   :  { %v1448_v49 = vadd.f32 %v1436_v38, %v1422_v43  ;;  %v1362_v60 = vpop.permute.xlu1 %1361 }
 0x251   :  { %v1369_v33 = vsel %vm297_vm2, %v1362_v60, %v1364_v37 }
 0x252   :  { %v3324_v20 = vadd.f32 %v1369_v33, %v1349_v35 }
 0x253   :  { %v1440_v52 = vpop.permute.xlu0 %1439 }
 0x254   :  { %v1379_v58 = vmax.f32 %v3220_v31, %v3324_v20  ;;  %v1450_v54 = vadd.f32 %v1440_v52, %v1424_v30  ;;  %v1366_v2 = vpop.permute.xlu1 %1365 }
 0x255   :  { %v1370_v12 = vsel %vm297_vm2, %v1366_v2, %v1368_v5 }
 0x256   :  { %v3329_v34 = vadd.f32 %v1370_v12, %v1351_v36 }
 0x257   :  { %v1462_v57 = vpop.permute.xlu0 %1461 }
 0x258   :  { %v1381_v17 = vmax.f32 %v3231_v19, %v3329_v34  ;;  %v1474_v29 = vadd.f32 %v1462_v57, %v1448_v49  ;;  %v1408_v24 = vpop.permute.xlu1 %1407 }
 0x259   :  { %v1415_v13 = vsel %vm101_vm0, %v1408_v24, %v1410_v39 }
 0x25a   :  { %v1421_v41 = vadd.f32 %v1415_v13, %v3629_v44 }
 0x25b   :  { %v1466_v40 = vpop.permute.xlu0 %1465 }
 0x25c   :  { %v1476_v62 = vadd.f32 %v1466_v40, %v1450_v54  ;;  %v1412_v1 = vpop.permute.xlu1 %1411 }
 0x25d   :  { %v1416_v32 = vsel %vm101_vm0, %v1412_v1, %v1414_v16 }
 0x25e   :  { %v1423_v42 = vadd.f32 %v1416_v32, %v3630_v15 }
 0x25f   :  { %v1488_v7 = vpop.permute.xlu0 %1487 }
 0x260   :  { %v1500_v37 = vadd.f32 %v1488_v7, %v1474_v29  ;;  %v1434_v59 = vpop.permute.xlu1 %1433 }
 0x261   :  { %v1441_v27 = vsel %vm228_vm1, %v1434_v59, %v1436_v38 }
 0x262   :  { %v1447_v48 = vadd.f32 %v1441_v27, %v1421_v41 }
 0x263   :  { %v1492_v22 = vpop.permute.xlu0 %1491 }
 0x264   :  { %v1502_v5 = vadd.f32 %v1492_v22, %v1476_v62  ;;  %v1438_v26 = vpop.permute.xlu1 %1437 }
 0x265   :  { %v1442_v3 = vsel %vm228_vm1, %v1438_v26, %v1440_v52 }
 0x266   :  { %v1449_v45 = vadd.f32 %v1442_v3, %v1423_v42 }
 0x267   :  { %v1514_v0 = vpop.permute.xlu0 %1513 }
 0x268   :  { %v1526_v39 = vadd.f32 %v1514_v0, %v1500_v37  ;;  %v1460_v21 = vpop.permute.xlu1 %1459 }
 0x269   :  { %v1467_v56 = vsel %vm228_vm1, %v1460_v21, %v1462_v57  ;;  %v1586_v21 = vmul.f32 %v3609_v53, %v3615_v28 }
 0x26a   :  { %v1473_v43 = vadd.f32 %v1467_v56, %v1447_v48 }
 0x26b   :  { %v3340_v51 = vpop.permute.xlu0 %1601 }
 0x26c   :  { %v1464_v4 = vpop.permute.xlu1 %1463 }
 0x26d   :  { %v1468_v35 = vsel %vm228_vm1, %v1464_v4, %v1466_v40 }
 0x26e   :  { %v1475_v16 = vadd.f32 %v1468_v35, %v1449_v45 }
 0x26f   :  { %v3343_v6 = vpop.permute.xlu0 %1605 }
 0x270   :  { %v1486_v25 = vpop.permute.xlu1 %1485 }
 0x271   :  { %v1493_v30 = vsel %vm297_vm2, %v1486_v25, %v1488_v7 }
 0x272   :  { %v1499_v61 = vadd.f32 %v1493_v30, %v1473_v43  ;;  %v1588_v30 = vmul.f32 %v3609_v53, %v3617_v63 }
 0x273   :  { %v3346_v8 = vpop.permute.xlu0 %1627 }
 0x274   :  { %v1490_v36 = vpop.permute.xlu1 %1489 }
 0x275   :  { %v1494_v38 = vsel %vm297_vm2, %v1490_v36, %v1492_v22 }
 0x276   :  { %v1501_v49 = vadd.f32 %v1494_v38, %v1475_v16 }
 0x277   :  { %v3349_v60 = vpop.permute.xlu0 %1631 }
 0x278   :  { %v1512_v33 = vpop.permute.xlu1 %1511 }
 0x279   :  { %v1519_v52 = vsel %vm228_vm1, %v1512_v33, %v1514_v0 }
 0x27a   :  { %v1525_v54 = vadd.f32 %v1519_v52, %v1499_v61 }
 0x27b   :  { %v3352_v2 = vpop.permute.xlu0 %1653 }
 0x27c   :  { %v1516_v12 = vpop.permute.xlu1 %1515 }
 0x27f   :  { %v3354_v57 = vpop.permute.xlu0 %1657 }
 0x280   :  { %v1604_v29 = vpop.permute.xlu1 %1603 }
 0x281   :  { %v1616_v4 = vadd.f32 %v1604_v29, %v1586_v21 }
 0x283   :  { %v3356_v24 = vpop.permute.xlu0 %1679 }
 0x284   :  { %v3358_v13 = vpop.permute.xlu1 %1607 }
 0x285   :  { %v1618_v33 = vadd.f32 %v3358_v13, %v1588_v30 }
 0x287   :  { %v3360_v44 = vpop.permute.xlu0 %1683 }
 0x288   :  { %v1630_v41 = vpop.permute.xlu1 %1629 }
 0x289   :  { %v1642_v61 = vadd.f32 %v1630_v41, %v1616_v4 }
 0x28b   :  { %v1518_v40 = vpop.permute.xlu0 %1517 }
 0x28c   :  { %v1520_v62 = vsel %vm228_vm1, %v1516_v12, %v1518_v40  ;;  %v3363_v1 = vpop.permute.xlu1 %1633  ;;  %v1528_v35 = vadd.f32 %v1518_v40, %v1502_v5 }
 0x28d   :  { %v1527_v32 = vadd.f32 %v1520_v62, %v1501_v49  ;;  %v1644_v5 = vadd.f32 %v3363_v1, %v1618_v33  ;;  %v1636_v31 = vsel %vm101_vm0, %v3349_v60, %v3363_v1 }
 0x28f   :  { %v3365_v15 = vpop.permute.xlu0 %1707 }
 0x290   :  { %v1656_v42 = vpop.permute.xlu1 %1655 }
 0x291   :  { %v1668_v52 = vadd.f32 %v1656_v42, %v1642_v61 }
 0x293   :  { %v3367_v7 = vpop.permute.xlu0 %1711 }
 0x294   :  { %v3369_v37 = vpop.permute.xlu1 %1659 }
 0x295   :  { %v1670_v46 = vadd.f32 %v3369_v37, %v1644_v5 }
 0x297   :  { %v1540_v59 = vpop.permute.xlu0 %1539 }
 0x298   :  { %v3371_v27 = vpop.permute.xlu1 %1681  ;;  %v1552_v56 = vadd.f32 %v1540_v59, %v1526_v39 }
 0x299   :  { %v1694_v40 = vadd.f32 %v3371_v27, %v1668_v52  ;;  %v1609_v52 = vsel %vm101_vm0, %v3340_v51, %v1604_v29  ;;  %v1687_v20 = vsel %vm297_vm2, %v3356_v24, %v3371_v27 }
 0x29b   :  { %v1544_v48 = vpop.permute.xlu0 %1543  ;;  %v1720_v21 = vadd.f32 %v3365_v15, %v1694_v40  ;;  %v1585_v40 = vmul.f32 %v3613_v23, %v3615_v28  ;;  %v1610_v28 = vsel %vm101_vm0, %v3343_v6, %v3358_v13 }
 0x29c   :  { %v3373_v22 = vpop.permute.xlu1 %1685  ;;  %v1554_v36 = vadd.f32 %v1544_v48, %v1528_v35 }
 0x29d   :  { %v1688_v24 = vsel %vm297_vm2, %v3360_v44, %v3373_v22 }
 0x29f   :  { %v3375_v26 = vpop.permute.xlu0 %1733 }
 0x2a0   :  { %v3377_v3 = vpop.permute.xlu1 %1705  ;;  %v1746_v4 = vadd.f32 %v3375_v26, %v1720_v21  ;;  %v1615_v21 = vadd.f32 %v1609_v52, %v1585_v40 }
 0x2a3   :  { %v3379_v45 = vpop.permute.xlu0 %1737 }
 0x2a4   :  { %v3381_v0 = vpop.permute.xlu1 %1709 }
 0x2a7   :  { %v1566_v43 = vpop.permute.xlu0 %1565 }
 0x2a8   :  { %v1578_v16 = vadd.f32 %v1566_v43, %v1552_v56  ;;  %v1538_v25 = vpop.permute.xlu1 %1537 }
 0x2aa   :  { %v3390_v38 = vmax.f32 %v1380_v50, %v1578_v16  ;;  %v1696_v50 = vadd.f32 %v3373_v22, %v1670_v46  ;;  %v1545_v16 = vsel %vm228_vm1, %v1538_v25, %v1540_v59 }
 0x2ab   :  { %v1570_v49 = vpop.permute.xlu0 %1569 }
 0x2ac   :  { %v1580_v39 = vadd.f32 %v1570_v49, %v1554_v36  ;;  %v1542_v12 = vpop.permute.xlu1 %1541  ;;  %v1722_v30 = vadd.f32 %v3367_v7, %v1696_v50  ;;  %v1635_v50 = vsel %vm101_vm0, %v3346_v8, %v1630_v41  ;;  %v1587_v8 = vmul.f32 %v3613_v23, %v3617_v63 }
 0x2ad   :  { %v1641_v41 = vadd.f32 %v1635_v50, %v1615_v21  ;;  %v1662_v23 = vsel %vm228_vm1, %v3354_v57, %v3369_v37  ;;  %v1713_v63 = vsel %vm297_vm2, %v3377_v3, %v3365_v15  ;;  %v1714_v57 = vsel %vm297_vm2, %v3381_v0, %v3367_v7 }
 0x2ae   :  { %v3398_v53 = vmax.f32 %v1382_v18, %v1580_v39  ;;  %v1748_v47 = vadd.f32 %v3379_v45, %v1722_v30  ;;  %v1551_v18 = vadd.f32 %v1545_v16, %v1525_v54  ;;  %v1546_v39 = vsel %vm228_vm1, %v1542_v12, %v1544_v48 }
 0x2af   :  { %v1760_v62 = vpop.permute.xlu0 %1759 }
 0x2b0   :  { %v1732_v9 = vpop.permute.xlu1 %1731  ;;  %v1772_v61 = vadd.f32 %v1760_v62, %v1746_v4  ;;  %v1553_v4 = vadd.f32 %v1546_v39, %v1527_v32 }
 0x2b3   :  { %v1764_v56 = vpop.permute.xlu0 %1763 }
 0x2b4   :  { %v1736_v35 = vpop.permute.xlu1 %1735  ;;  %v1774_v59 = vadd.f32 %v1764_v56, %v1748_v47 }
 0x2b5   :  { %v1740_v3 = vsel %vm228_vm1, %v1736_v35, %v3379_v45 }
 0x2b7   :  { %v1786_v14 = vpop.permute.xlu0 %1785 }
 0x2b8   :  { %v1798_v36 = vadd.f32 %v1786_v14, %v1772_v61  ;;  %v1564_v33 = vpop.permute.xlu1 %1563 }
 0x2b9   :  { %v1571_v5 = vsel %vm297_vm2, %v1564_v33, %v1566_v43  ;;  %v1661_v43 = vsel %vm228_vm1, %v3352_v2, %v1656_v42  ;;  %v1739_v42 = vsel %vm228_vm1, %v1732_v9, %v3375_v26 }
 0x2ba   :  { %v1802_v25 = vmax.f32 %v3390_v38, %v1798_v36  ;;  %v1577_v46 = vadd.f32 %v1571_v5, %v1551_v18  ;;  %v1667_v6 = vadd.f32 %v1661_v43, %v1641_v41 }
 0x2bb   :  { %v1790_v54 = vpop.permute.xlu0 %1789 }
 0x2bc   :  { %v1581_v51 = vmax.f32 %v1379_v58, %v1577_v46  ;;  %v1800_v29 = vadd.f32 %v1790_v54, %v1774_v59  ;;  %v1568_v48 = vpop.permute.xlu1 %1567  ;;  %v1617_v58 = vadd.f32 %v1610_v28, %v1587_v8  ;;  %v1693_v1 = vadd.f32 %v1687_v20, %v1667_v6 }
 0x2bd   :  { %v1572_v38 = vsel %vm297_vm2, %v1568_v48, %v1570_v49  ;;  %v1806_v30 = vadd.f32 %v1802_v25, %v3052_v11 }
 0x2be   :  { %v1804_v32 = vmax.f32 %v3398_v53, %v1800_v29  ;;  %v1579_v12 = vadd.f32 %v1572_v38, %v1553_v4  ;;  %v1643_v60 = vadd.f32 %v1636_v31, %v1617_v58  ;;  %v1719_v34 = vadd.f32 %v1713_v63, %v1693_v1 }
 0x2bf   :  { %v1810_v45 = vmax.f32 %v1806_v30, 0.0 }
 0x2c0   :  { %v1583_v2 = vmax.f32 %v1381_v17, %v1579_v12  ;;  %v1758_v13 = vpop.permute.xlu1 %1757  ;;  %v1669_v19 = vadd.f32 %v1662_v23, %v1643_v60  ;;  %v1745_v15 = vadd.f32 %v1739_v42, %v1719_v34  ;;  %v1808_v35 = vadd.f32 %v1804_v32, %v3125_v55 }
 0x2c1   :  { %v1765_v37 = vsel %vm297_vm2, %v1758_v13, %v1760_v62 }
 0x2c2   :  { %v1695_v27 = vadd.f32 %v1688_v24, %v1669_v19  ;;  %v1771_v53 = vadd.f32 %v1765_v37, %v1745_v15  ;;  %v1812_v52 = vmax.f32 %v1808_v35, 0.0 }
 0x2c4   :  { %v1762_v17 = vpop.permute.xlu1 %1761  ;;  %v1721_v49 = vadd.f32 %v1714_v57, %v1695_v27 }
 0x2c5   :  { %v1766_v22 = vsel %vm297_vm2, %v1762_v17, %v1764_v56 }
 0x2c6   :  { %v1747_v9 = vadd.f32 %v1740_v3, %v1721_v49 }
 0x2c8   :  { %v1784_v44 = vpop.permute.xlu1 %1783  ;;  %v1773_v61 = vadd.f32 %v1766_v22, %v1747_v9 }
 0x2c9   :  { %v1791_v26 = vsel %vm297_vm2, %v1784_v44, %v1786_v14 }
 0x2ca   :  { %v1797_v16 = vadd.f32 %v1791_v26, %v1771_v53 }
 0x2cc   :  { %v1801_v7 = vmax.f32 %v1581_v51, %v1797_v16  ;;  %v1788_v0 = vpop.permute.xlu1 %1787 }
 0x2cd   :  { %v1792_v62 = vsel %vm297_vm2, %v1788_v0, %v1790_v54 }
 0x2ce   :  { %v1805_v47 = vadd.f32 %v1801_v7, %v3052_v11  ;;  %v1799_v18 = vadd.f32 %v1792_v62, %v1773_v61 }
 0x2d0   :  { %v1809_v36 = vmax.f32 %v1805_v47, 0.0  ;;  %v1803_v33 = vmax.f32 %v1583_v2, %v1799_v18 }
 0x2d2   :  { %v1850_v56 = vpack.c.bf16 %v1810_v45, %v1809_v36  ;;  %v1807_v14 = vadd.f32 %v1803_v33, %v3125_v55 }
 0x2d4   :  { %1846 = vst.msk [vmem:[%s3474_s3 + $0x10] sm:$0xff] %vm3076_vm5, %v1850_v56  ;;  %v1811_v39 = vmax.f32 %v1807_v14, 0.0 }
 0x2d6   :  { %v1851_v5 = vpack.c.bf16 %v1812_v52, %v1811_v39 }
 0x2d8   :  { %1847 = vst.msk [vmem:[%s3474_s3 + $0x18] sm:$0xff] %vm3076_vm5, %v1851_v5 }

// kernel: net_forward.5
= control target key start
LH: loop header
LB: loop body
LE: loop exit
PB: predicated region body
PF: predicated region fallthrough
CT: control target
= control target key end

     0   :  { %vm1285_vm0 = vcmask 1043456   ;;  %vm1777_vm1 = vmmov 0   ;;  %vm1281_vm2 = vcmask 195584   ;;  %vm1329_vm3 = vcmask 80896   ;;  %s2183_s1 = inlined_call_operand.vmem [shape: bf16[1792,24], index: 1, kind: input, shape index: {}]   ;;  %s2184_s0 = inlined_call_operand.vmem [shape: bf16[8,1792], index: 0, kind: input, shape index: {}]   ;;  %s2185_s3 = inlined_call_operand.vmem [shape: bf16[24,10], index: 3, kind: input, shape index: {}]   ;;  %s2186_s2 = inlined_call_operand.vmem [shape: f32[1,24], index: 2, kind: input, shape index: {}]   ;;  %s2187_s4 = inlined_call_operand.vmem [shape: f32[1,10], index: 4, kind: input, shape index: {}]   ;;  %s2188_s5 = inlined_call_operand.vmem [shape: f32[8,10], index: 5, kind: output, shape index: {}]  }
   0x1   :  { %v1644_v0 = vld [vmem:[%s2183_s1 + $0x40] sm:$0xff]   ;;  %v1648_v4 = vld [vmem:[%s2183_s1 + $0x48] sm:$0xff]   ;;  %v1652_v8 = vld [vmem:[%s2183_s1 + $0x50] sm:$0xff]  }
   0x2   :  { %v1645_v1 = vld [vmem:[%s2183_s1] sm:$0xff]   ;;  %1477 = vmatprep.subr.bf16.mxu0 %v1644_v0  ;;  %v1649_v5 = vld [vmem:[%s2183_s1 + $0x8] sm:$0xff]   ;;  %v1653_v9 = vld [vmem:[%s2183_s1 + $0x10] sm:$0xff]  }
   0x3   :  { %v1646_v2 = vld [vmem:[%s2183_s1 + $0xc0] sm:$0xff]   ;;  %1478 = vmatpush3.bf16.msra.mxu0 %v1645_v1  ;;  %v1650_v6 = vld [vmem:[%s2183_s1 + $0xc8] sm:$0xff]   ;;  %v1654_v10 = vld [vmem:[%s2183_s1 + $0xd0] sm:$0xff]  }
   0x4   :  { %v1647_v3 = vld [vmem:[%s2183_s1 + $0x80] sm:$0xff]   ;;  %1499 = vmatprep.subr.bf16.mxu1 %v1646_v2  ;;  %1479 = vmatprep.subr.bf16.mxu0 %v1648_v4  ;;  %v1651_v7 = vld [vmem:[%s2183_s1 + $0x88] sm:$0xff]   ;;  %v1655_v11 = vld [vmem:[%s2183_s1 + $0x90] sm:$0xff]  }
   0x5   :  { %1500 = vmatpush3.bf16.msra.mxu1 %v1647_v3  ;;  %v1656_v12 = vld [vmem:[%s2183_s1 + $0x58] sm:$0xff]   ;;  %v1660_v16 = vld [vmem:[%s2183_s1 + $0x60] sm:$0xff]   ;;  %v1664_v20 = vld [vmem:[%s2183_s1 + $0x68] sm:$0xff]  }
   0x6   :  { %1501 = vmatprep.subr.bf16.mxu1 %v1650_v6  ;;  %v1657_v13 = vld [vmem:[%s2183_s1 + $0x18] sm:$0xff]   ;;  %v1661_v17 = vld [vmem:[%s2183_s1 + $0x20] sm:$0xff]   ;;  %v1665_v21 = vld [vmem:[%s2183_s1 + $0x28] sm:$0xff]  }
   0x7   :  { %1480 = vmatpush3.bf16.msra.mxu0 %v1649_v5  ;;  %v1658_v14 = vld [vmem:[%s2183_s1 + $0xd8] sm:$0xff]   ;;  %v1662_v18 = vld [vmem:[%s2183_s1 + $0xe0] sm:$0xff]   ;;  %v1666_v22 = vld [vmem:[%s2183_s1 + $0xe8] sm:$0xff]  }
   0x8   :  { %1481 = vmatprep.subr.bf16.mxu0 %v1652_v8  ;;  %v1659_v15 = vld [vmem:[%s2183_s1 + $0x98] sm:$0xff]   ;;  %v1663_v19 = vld [vmem:[%s2183_s1 + $0xa0] sm:$0xff]   ;;  %v1667_v23 = vld [vmem:[%s2183_s1 + $0xa8] sm:$0xff]  }
   0x9   :  { %1502 = vmatpush3.bf16.msra.mxu1 %v1651_v7  ;;  %v1668_v24 = vld [vmem:[%s2183_s1 + $0x70] sm:$0xff]   ;;  %v1672_v28 = vld [vmem:[%s2183_s1 + $0x78] sm:$0xff]   ;;  %v21_v31 = vld [vmem:[%s2184_s0] sm:$0xff] }
   0xa   :  { %1503 = vmatprep.subr.bf16.mxu1 %v1654_v10  ;;  %v1669_v25 = vld [vmem:[%s2183_s1 + $0x30] sm:$0xff]   ;;  %v1673_v29 = vld [vmem:[%s2183_s1 + $0x38] sm:$0xff]   ;;  %v1347_v32 = vcombine.low %v21_v31, %v21_v31  ;;  %v1348_v33 = vcombine.high %v21_v31, %v21_v31  ;;  %v1678_v35 = vld [vmem:[%s2183_s1 + $0x140] sm:$0xff]  }
   0xb   :  { %1482 = vmatpush3.bf16.msra.mxu0 %v1653_v9  ;;  %v1670_v26 = vld [vmem:[%s2183_s1 + $0xf0] sm:$0xff]   ;;  %v1674_v30 = vld [vmem:[%s2183_s1 + $0xf8] sm:$0xff]   ;;  %v22_v36 = vld [vmem:[%s2184_s0 + $0x8] sm:$0xff] }
   0xc   :  { %1483 = vmatprep.subr.bf16.mxu0 %v1656_v12  ;;  %v1671_v27 = vld [vmem:[%s2183_s1 + $0xb0] sm:$0xff]   ;;  %v1677_v34 = vld [vmem:[%s2183_s1 + $0xb8] sm:$0xff]   ;;  %1012 = vmatprep.mubr.bf16.mxu0 %v1348_v33  ;;  %v1349_v37 = vcombine.low %v22_v36, %v22_v36  ;;  %v1350_v38 = vcombine.high %v22_v36, %v22_v36  ;;  %v1681_v39 = vld [vmem:[%s2183_s1 + $0x100] sm:$0xff]  }
   0xd   :  { %1504 = vmatpush3.bf16.msra.mxu1 %v1655_v11  ;;  %v1682_v40 = vld [vmem:[%s2183_s1 + $0x1c0] sm:$0xff]   ;;  %v1684_v42 = vld [vmem:[%s2183_s1 + $0x148] sm:$0xff]   ;;  %v1688_v46 = vld [vmem:[%s2183_s1 + $0x150] sm:$0xff]  }
   0xe   :  { %1505 = vmatprep.subr.bf16.mxu1 %v1658_v14  ;;  %1052 = vmatprep.mubr.bf16.mxu1 %v1350_v38  ;;  %v1683_v41 = vld [vmem:[%s2183_s1 + $0x180] sm:$0xff]   ;;  %v1685_v43 = vld [vmem:[%s2183_s1 + $0x108] sm:$0xff]   ;;  %v1689_v47 = vld [vmem:[%s2183_s1 + $0x110] sm:$0xff]  }
   0xf   :  { %1484 = vmatpush3.bf16.msra.mxu0 %v1657_v13  ;;  %v1686_v44 = vld [vmem:[%s2183_s1 + $0x1c8] sm:$0xff]   ;;  %v1690_v48 = vld [vmem:[%s2183_s1 + $0x1d0] sm:$0xff]   ;;  %v1692_v50 = vld [vmem:[%s2183_s1 + $0x158] sm:$0xff]  }
  0x10   :  { %1485 = vmatprep.subr.bf16.mxu0 %v1660_v16  ;;  %v1687_v45 = vld [vmem:[%s2183_s1 + $0x188] sm:$0xff]   ;;  %v1691_v49 = vld [vmem:[%s2183_s1 + $0x190] sm:$0xff]   ;;  %v1693_v51 = vld [vmem:[%s2183_s1 + $0x118] sm:$0xff]  }
  0x11   :  { %1506 = vmatpush3.bf16.msra.mxu1 %v1659_v15  ;;  %v1694_v52 = vld [vmem:[%s2183_s1 + $0x1d8] sm:$0xff]   ;;  %v1696_v54 = vld [vmem:[%s2183_s1 + $0x160] sm:$0xff]   ;;  %v1700_v58 = vld [vmem:[%s2183_s1 + $0x168] sm:$0xff]  }
  0x12   :  { %1507 = vmatprep.subr.bf16.mxu1 %v1662_v18  ;;  %v1695_v53 = vld [vmem:[%s2183_s1 + $0x198] sm:$0xff]   ;;  %v1697_v55 = vld [vmem:[%s2183_s1 + $0x120] sm:$0xff]   ;;  %v1701_v59 = vld [vmem:[%s2183_s1 + $0x128] sm:$0xff]  }
  0x13   :  { %1486 = vmatpush3.bf16.msra.mxu0 %v1661_v17  ;;  %v1698_v56 = vld [vmem:[%s2183_s1 + $0x1e0] sm:$0xff]   ;;  %v1702_v60 = vld [vmem:[%s2183_s1 + $0x1e8] sm:$0xff]   ;;  %v1704_v62 = vld [vmem:[%s2183_s1 + $0x170] sm:$0xff]  }
  0x14   :  { %1487 = vmatprep.subr.bf16.mxu0 %v1664_v20  ;;  %v1699_v57 = vld [vmem:[%s2183_s1 + $0x1a0] sm:$0xff]   ;;  %v1703_v61 = vld [vmem:[%s2183_s1 + $0x1a8] sm:$0xff]   ;;  %v1705_v63 = vld [vmem:[%s2183_s1 + $0x130] sm:$0xff]  }
  0x15   :  { %1508 = vmatpush3.bf16.msra.mxu1 %v1663_v19  ;;  %v1706_v0 = vld [vmem:[%s2183_s1 + $0x1f0] sm:$0xff]   ;;  %v1708_v2 = vld [vmem:[%s2183_s1 + $0x178] sm:$0xff]   ;;  %v1714_v9 = vld [vmem:[%s2183_s1 + $0x240] sm:$0xff]  }
  0x16   :  { %1509 = vmatprep.subr.bf16.mxu1 %v1666_v22  ;;  %v1707_v1 = vld [vmem:[%s2183_s1 + $0x1b0] sm:$0xff]   ;;  %v1709_v3 = vld [vmem:[%s2183_s1 + $0x138] sm:$0xff]   ;;  %v1717_v13 = vld [vmem:[%s2183_s1 + $0x200] sm:$0xff]  }
  0x17   :  { %1488 = vmatpush3.bf16.msra.mxu0 %v1665_v21  ;;  %v1710_v4 = vld [vmem:[%s2183_s1 + $0x1f8] sm:$0xff]   ;;  %v23_v5 = vld [vmem:[%s2184_s0 + $0x10] sm:$0xff]  ;;  %v1718_v14 = vld [vmem:[%s2183_s1 + $0x2c0] sm:$0xff]  }
  0x18   :  { %1489 = vmatprep.subr.bf16.mxu0 %v1668_v24  ;;  %v1351_v6 = vcombine.low %v23_v5, %v23_v5  ;;  %v1352_v7 = vcombine.high %v23_v5, %v23_v5  ;;  %v1713_v8 = vld [vmem:[%s2183_s1 + $0x1b8] sm:$0xff]   ;;  %v1719_v15 = vld [vmem:[%s2183_s1 + $0x280] sm:$0xff]   ;;  %v1720_v16 = vld [vmem:[%s2183_s1 + $0x248] sm:$0xff]  }
  0x19   :  { %1510 = vmatpush3.bf16.msra.mxu1 %v1667_v23  ;;  %v24_v10 = vld [vmem:[%s2184_s0 + $0x18] sm:$0xff]  ;;  %v1721_v17 = vld [vmem:[%s2183_s1 + $0x208] sm:$0xff]   ;;  %v1724_v20 = vld [vmem:[%s2183_s1 + $0x250] sm:$0xff]  }
  0x1a   :  { %1511 = vmatprep.subr.bf16.mxu1 %v1670_v26  ;;  %v1353_v11 = vcombine.low %v24_v10, %v24_v10  ;;  %v1354_v12 = vcombine.high %v24_v10, %v24_v10  ;;  %v1722_v18 = vld [vmem:[%s2183_s1 + $0x2c8] sm:$0xff]   ;;  %v1725_v21 = vld [vmem:[%s2183_s1 + $0x210] sm:$0xff]   ;;  %v1728_v24 = vld [vmem:[%s2183_s1 + $0x258] sm:$0xff]  }
  0x1b   :  { %1490 = vmatpush3.bf16.msra.mxu0 %v1669_v25  ;;  %v1723_v19 = vld [vmem:[%s2183_s1 + $0x288] sm:$0xff]   ;;  %v1726_v22 = vld [vmem:[%s2183_s1 + $0x2d0] sm:$0xff]   ;;  %v1729_v25 = vld [vmem:[%s2183_s1 + $0x218] sm:$0xff]  }
  0x1c   :  { %1491 = vmatprep.subr.bf16.mxu0 %v1672_v28  ;;  %v1727_v23 = vld [vmem:[%s2183_s1 + $0x290] sm:$0xff]   ;;  %v1730_v26 = vld [vmem:[%s2183_s1 + $0x2d8] sm:$0xff]   ;;  %v1732_v28 = vld [vmem:[%s2183_s1 + $0x260] sm:$0xff]  }
  0x1d   :  { %1512 = vmatpush3.bf16.msra.mxu1 %v1671_v27  ;;  %v1731_v27 = vld [vmem:[%s2183_s1 + $0x298] sm:$0xff]   ;;  %v1735_v31 = vld [vmem:[%s2183_s1 + $0x2a0] sm:$0xff]   ;;  %v1737_v33 = vld [vmem:[%s2183_s1 + $0x228] sm:$0xff]  }
  0x1e   :  { %1513 = vmatprep.subr.bf16.mxu1 %v1674_v30  ;;  %v1734_v30 = vld [vmem:[%s2183_s1 + $0x2e0] sm:$0xff]   ;;  %v1740_v36 = vld [vmem:[%s2183_s1 + $0x270] sm:$0xff]  }
  0x1f   :  { %1492 = vmatpush3.bf16.msra.mxu0 %v1673_v29  ;;  %v1733_v29 = vld [vmem:[%s2183_s1 + $0x220] sm:$0xff]   ;;  %v1742_v38 = vld [vmem:[%s2183_s1 + $0x2f0] sm:$0xff]  }
  0x20   :  { %1521 = vmatprep.subr.bf16.mxu0 %v1678_v35  ;;  %v1739_v35 = vld [vmem:[%s2183_s1 + $0x2a8] sm:$0xff]   ;;  %v1770_v5 = vld [vmem:[%s2185_s3] sm:$0xff]  }
  0x21   :  { %1514 = vmatpush3.bf16.msra.mxu1 %v1677_v34  ;;  %v1738_v34 = vld [vmem:[%s2183_s1 + $0x2e8] sm:$0xff]   ;;  %v1346_v10 = vld [vmem:[%s2186_s2] ss:$0 sm:$0xff] }
  0x22   :  { %1013 = vmatmul.mubr.bf16.vlgmr.msra.gmra.mrb[0].mxu0 %v1347_v32  ;;  %1543 = vmatprep.subr.bf16.mxu1 %v1682_v40  ;;  %v1736_v32 = vld [vmem:[%s2183_s1 + $0x268] sm:$0xff]   ;;  %v1744_v40 = vld [vmem:[%s2183_s1 + $0x278] sm:$0xff]  }
  0x23   :  { %1522 = vmatpush3.bf16.msra.mxu0 %v1681_v39  ;;  %1092 = vmatprep.mubr.bf16.mxu0 %v1352_v7  ;;  %v1743_v39 = vld [vmem:[%s2183_s1 + $0x2b0] sm:$0xff]   ;;  %v1771_v7 = vld [vmem:[%s2185_s3 + $0x8] ss:$0 sps:$4 sm:$0xff]  }
  0x24   :  { %1053 = vmatmul.mubr.bf16.vlgmr.msra.gmra.mrb[0].mxu1 %v1349_v37  ;;  %1523 = vmatprep.subr.bf16.mxu0 %v1684_v42  ;;  %v1741_v37 = vld [vmem:[%s2183_s1 + $0x230] sm:$0xff]   ;;  %v1746_v42 = vld [vmem:[%s2183_s1 + $0x2f8] sm:$0xff]  }
  0x25   :  { %1544 = vmatpush3.bf16.msra.mxu1 %v1683_v41  ;;  %1132 = vmatprep.mubr.bf16.mxu1 %v1354_v12  ;;  %v1745_v41 = vld [vmem:[%s2183_s1 + $0x238] sm:$0xff]  }
  0x26   :  { %1545 = vmatprep.subr.bf16.mxu1 %v1686_v44 }
  0x27   :  { %1524 = vmatpush3.bf16.msra.mxu0 %v1685_v43  ;;  %v25_v43 = vld [vmem:[%s2184_s0 + $0x20] sm:$0xff] }
  0x28   :  { %1525 = vmatprep.subr.bf16.mxu0 %v1688_v46  ;;  %v1355_v44 = vcombine.low %v25_v43, %v25_v43  ;;  %v1749_v46 = vld [vmem:[%s2183_s1 + $0x2b8] sm:$0xff]  }
  0x29   :  { %1546 = vmatpush3.bf16.msra.mxu1 %v1687_v45  ;;  %v1356_v45 = vcombine.high %v25_v43, %v25_v43 }
  0x2a   :  { %1547 = vmatprep.subr.bf16.mxu1 %v1690_v48  ;;  %v26_v48 = vld [vmem:[%s2184_s0 + $0x28] sm:$0xff] }
  0x2b   :  { %1526 = vmatpush3.bf16.msra.mxu0 %v1689_v47  ;;  %v1750_v47 = vld [vmem:[%s2183_s1 + $0x340] sm:$0xff]  }
  0x2c   :  { %1527 = vmatprep.subr.bf16.mxu0 %v1692_v50  ;;  %v1358_v50 = vcombine.high %v26_v48, %v26_v48 }
  0x2d   :  { %1548 = vmatpush3.bf16.msra.mxu1 %v1691_v49  ;;  %v1357_v49 = vcombine.low %v26_v48, %v26_v48 }
  0x2e   :  { %1549 = vmatprep.subr.bf16.mxu1 %v1694_v52  ;;  %v1754_v52 = vld [vmem:[%s2183_s1 + $0x348] sm:$0xff]  }
  0x2f   :  { %1528 = vmatpush3.bf16.msra.mxu0 %v1693_v51  ;;  %v1753_v51 = vld [vmem:[%s2183_s1 + $0x300] sm:$0xff]  }
  0x30   :  { %1529 = vmatprep.subr.bf16.mxu0 %v1696_v54  ;;  %v1756_v54 = vld [vmem:[%s2183_s1 + $0x350] sm:$0xff]  }
  0x31   :  { %1550 = vmatpush3.bf16.msra.mxu1 %v1695_v53  ;;  %v1755_v53 = vld [vmem:[%s2183_s1 + $0x308] sm:$0xff]  }
  0x32   :  { %1551 = vmatprep.subr.bf16.mxu1 %v1698_v56  ;;  %v1758_v56 = vld [vmem:[%s2183_s1 + $0x358] sm:$0xff]  }
  0x33   :  { %1530 = vmatpush3.bf16.msra.mxu0 %v1697_v55  ;;  %v1757_v55 = vld [vmem:[%s2183_s1 + $0x310] sm:$0xff]  }
  0x34   :  { %1531 = vmatprep.subr.bf16.mxu0 %v1700_v58  ;;  %v1760_v58 = vld [vmem:[%s2183_s1 + $0x360] sm:$0xff]  }
  0x35   :  { %1552 = vmatpush3.bf16.msra.mxu1 %v1699_v57  ;;  %v1759_v57 = vld [vmem:[%s2183_s1 + $0x318] sm:$0xff]  }
  0x36   :  { %1553 = vmatprep.subr.bf16.mxu1 %v1702_v60  ;;  %v1762_v60 = vld [vmem:[%s2183_s1 + $0x368] sm:$0xff]  }
  0x37   :  { %1532 = vmatpush3.bf16.msra.mxu0 %v1701_v59  ;;  %v1761_v59 = vld [vmem:[%s2183_s1 + $0x320] sm:$0xff]  }
  0x38   :  { %1533 = vmatprep.subr.bf16.mxu0 %v1704_v62 }
  0x39   :  { %1554 = vmatpush3.bf16.msra.mxu1 %v1703_v61  ;;  %v27_v61 = vld [vmem:[%s2184_s0 + $0x30] sm:$0xff] }
  0x3a   :  { %1555 = vmatprep.subr.bf16.mxu1 %v1706_v0  ;;  %v1360_v62 = vcombine.high %v27_v61, %v27_v61  ;;  %v1764_v0 = vld [vmem:[%s2183_s1 + $0x370] sm:$0xff]  }
  0x3b   :  { %1534 = vmatpush3.bf16.msra.mxu0 %v1705_v63  ;;  %v1763_v63 = vld [vmem:[%s2183_s1 + $0x328] sm:$0xff]  }
  0x3c   :  { %1535 = vmatprep.subr.bf16.mxu0 %v1708_v2  ;;  %v1766_v2 = vld [vmem:[%s2183_s1 + $0x378] sm:$0xff]  }
  0x3d   :  { %1556 = vmatpush3.bf16.msra.mxu1 %v1707_v1  ;;  %v1765_v1 = vld [vmem:[%s2183_s1 + $0x330] sm:$0xff]  }
  0x3e   :  { %1557 = vmatprep.subr.bf16.mxu1 %v1710_v4  ;;  %v1359_v4 = vcombine.low %v27_v61, %v27_v61 }
  0x3f   :  { %1536 = vmatpush3.bf16.msra.mxu0 %v1709_v3  ;;  %v1767_v3 = vld [vmem:[%s2183_s1 + $0x338] sm:$0xff]  }
  0x40   :  { %1565 = vmatprep.subr.bf16.mxu0 %v1714_v9 }
  0x41   :  { %1558 = vmatpush3.bf16.msra.mxu1 %v1713_v8  ;;  %v1287_v8 = vsel %vm1285_vm0, %v1771_v7, 0 }
  0x42   :  { %1093 = vmatmul.mubr.bf16.vlgmr.msra.gmra.mrb[4].mxu0 %v1351_v6  ;;  %1587 = vmatprep.subr.bf16.mxu1 %v1718_v14  ;;  %v1776_v6 = vmov 0.0  }
  0x43   :  { %1566 = vmatpush3.bf16.msra.mxu0 %v1717_v13  ;;  %1172 = vmatprep.mubr.bf16.mxu0 %v1356_v45 }
  0x44   :  { %1133 = vmatmul.mubr.bf16.vlgmr.msra.gmra.mrb[4].mxu1 %v1353_v11  ;;  %1567 = vmatprep.subr.bf16.mxu0 %v1720_v16 }
  0x45   :  { %1588 = vmatpush3.bf16.msra.mxu1 %v1719_v15  ;;  %1212 = vmatprep.mubr.bf16.mxu1 %v1358_v50 }
  0x46   :  { %1589 = vmatprep.subr.bf16.mxu1 %v1722_v18 }
  0x47   :  { %1568 = vmatpush3.bf16.msra.mxu0 %v1721_v17 }
  0x48   :  { %1569 = vmatprep.subr.bf16.mxu0 %v1724_v20 }
  0x49   :  { %1590 = vmatpush3.bf16.msra.mxu1 %v1723_v19 }
  0x4a   :  { %1591 = vmatprep.subr.bf16.mxu1 %v1726_v22 }
  0x4b   :  { %1570 = vmatpush3.bf16.msra.mxu0 %v1725_v21 }
  0x4c   :  { %1571 = vmatprep.subr.bf16.mxu0 %v1728_v24 }
  0x4d   :  { %1592 = vmatpush3.bf16.msra.mxu1 %v1727_v23 }
  0x4e   :  { %1593 = vmatprep.subr.bf16.mxu1 %v1730_v26 }
  0x4f   :  { %1572 = vmatpush3.bf16.msra.mxu0 %v1729_v25 }
  0x50   :  { %1573 = vmatprep.subr.bf16.mxu0 %v1732_v28 }
  0x51   :  { %1594 = vmatpush3.bf16.msra.mxu1 %v1731_v27 }
  0x52   :  { %1595 = vmatprep.subr.bf16.mxu1 %v1734_v30 }
  0x53   :  { %1574 = vmatpush3.bf16.msra.mxu0 %v1733_v29 }
  0x54   :  { %1575 = vmatprep.subr.bf16.mxu0 %v1736_v32 }
  0x55   :  { %1596 = vmatpush3.bf16.msra.mxu1 %v1735_v31 }
  0x56   :  { %1597 = vmatprep.subr.bf16.mxu1 %v1738_v34 }
  0x57   :  { %1576 = vmatpush3.bf16.msra.mxu0 %v1737_v33 }
  0x58   :  { %1577 = vmatprep.subr.bf16.mxu0 %v1740_v36 }
  0x59   :  { %1598 = vmatpush3.bf16.msra.mxu1 %v1739_v35 }
  0x5a   :  { %1599 = vmatprep.subr.bf16.mxu1 %v1742_v38 }
  0x5b   :  { %1578 = vmatpush3.bf16.msra.mxu0 %v1741_v37 }
  0x5c   :  { %1579 = vmatprep.subr.bf16.mxu0 %v1744_v40 }
  0x5d   :  { %1600 = vmatpush3.bf16.msra.mxu1 %v1743_v39 }
  0x5e   :  { %1601 = vmatprep.subr.bf16.mxu1 %v1746_v42 }
  0x5f   :  { %1580 = vmatpush3.bf16.msra.mxu0 %v1745_v41 }
  0x60   :  { %1609 = vmatprep.subr.bf16.mxu0 %v1750_v47 }
  0x61   :  { %1602 = vmatpush3.bf16.msra.mxu1 %v1749_v46 }
  0x62   :  { %1173 = vmatmul.mubr.bf16.vlgmr.msra.gmra.mrb[8].mxu0 %v1355_v44  ;;  %1634 = vmatprep.subr.bf16.mxu1 %v1776_v6 }
  0x63   :  { %1610 = vmatpush3.bf16.msra.mxu0 %v1753_v51  ;;  %1252 = vmatprep.mubr.bf16.mxu0 %v1360_v62 }
  0x64   :  { %1213 = vmatmul.mubr.bf16.vlgmr.msra.gmra.mrb[8].mxu1 %v1357_v49  ;;  %1611 = vmatprep.subr.bf16.mxu0 %v1754_v52 }
  0x65   :  { %1635 = vmatpush3.bf16.msra.mxu1 %v1770_v5  ;;  %1638 = vmatprep.mubr.msk.bf16.mxu1 %vm1777_vm1, %v1776_v6 }
  0x66   :  { %1636 = vmatprep.subr.bf16.mxu1 %v1776_v6 }
  0x67   :  { %1612 = vmatpush3.bf16.msra.mxu0 %v1755_v53 }
  0x68   :  { %1613 = vmatprep.subr.bf16.mxu0 %v1756_v54  ;;  %v1473_v54 = vld [vmem:[%s2187_s4] ss:$0 sm:$0xff] }
  0x69   :  { %1637 = vmatpush3.bf16.msra.mxu1 %v1287_v8 }
  0x6b   :  { %1614 = vmatpush3.bf16.msra.mxu0 %v1757_v55 }
  0x6c   :  { %1615 = vmatprep.subr.bf16.mxu0 %v1758_v56 }
  0x6f   :  { %1616 = vmatpush3.bf16.msra.mxu0 %v1759_v57 }
  0x70   :  { %1617 = vmatprep.subr.bf16.mxu0 %v1760_v58 }
  0x73   :  { %1618 = vmatpush3.bf16.msra.mxu0 %v1761_v59 }
  0x74   :  { %1619 = vmatprep.subr.bf16.mxu0 %v1762_v60 }
  0x77   :  { %1620 = vmatpush3.bf16.msra.mxu0 %v1763_v63 }
  0x78   :  { %1621 = vmatprep.subr.bf16.mxu0 %v1764_v0 }
  0x7b   :  { %1622 = vmatpush3.bf16.msra.mxu0 %v1765_v1 }
  0x7c   :  { %1623 = vmatprep.subr.bf16.mxu0 %v1766_v2 }
  0x7f   :  { %1624 = vmatpush3.bf16.msra.mxu0 %v1767_v3 }
  0x82   :  { %1253 = vmatmul.mubr.bf16.vlgmr.msra.gmra.mrb[12].mxu0 %v1359_v4 }
  0xf5   :  { %v1493_v9 = vpop.f32.mrb[0].mxu0 }
  0xf6   :  { %v1494_v11 = vpop.f32.mrb[1].mxu0 }
  0xf7   :  { %v1495_v12 = vadd.f32 %v1494_v11, %v1493_v9  ;;  %v1496_v13 = vpop.f32.mrb[2].mxu0  ;;  %v1515_v14 = vpop.f32.mrb[0].mxu1 }
  0xf8   :  { %v1497_v15 = vpop.f32.mrb[3].mxu0  ;;  %v1516_v16 = vpop.f32.mrb[1].mxu1 }
  0xf9   :  { %v1015_v17 = vadd.f32 %v1495_v12, %v1346_v10  ;;  %v1517_v18 = vadd.f32 %v1516_v16, %v1515_v14  ;;  %v1518_v19 = vpop.f32.mrb[2].mxu1 }
  0xfa   :  { %v1519_v20 = vpop.f32.mrb[3].mxu1 }
  0xfb   :  { %v1055_v21 = vadd.f32 %v1517_v18, %v1015_v17 }
 0x115   :  { %v1537_v22 = vpop.f32.mrb[4].mxu0 }
 0x116   :  { %v1538_v23 = vpop.f32.mrb[5].mxu0 }
 0x117   :  { %v1539_v24 = vadd.f32 %v1538_v23, %v1537_v22  ;;  %v1540_v25 = vpop.f32.mrb[6].mxu0  ;;  %v1559_v26 = vpop.f32.mrb[4].mxu1 }
 0x118   :  { %v1541_v27 = vpop.f32.mrb[7].mxu0  ;;  %v1560_v29 = vpop.f32.mrb[5].mxu1 }
 0x119   :  { %v1095_v28 = vadd.f32 %v1539_v24, %v1055_v21  ;;  %v1561_v30 = vadd.f32 %v1560_v29, %v1559_v26  ;;  %v1562_v31 = vpop.f32.mrb[6].mxu1 }
 0x11a   :  { %v1563_v32 = vpop.f32.mrb[7].mxu1 }
 0x11b   :  { %v1135_v33 = vadd.f32 %v1561_v30, %v1095_v28 }
 0x135   :  { %v1581_v34 = vpop.f32.mrb[8].mxu0 }
 0x136   :  { %v1582_v35 = vpop.f32.mrb[9].mxu0 }
 0x137   :  { %v1583_v36 = vadd.f32 %v1582_v35, %v1581_v34  ;;  %v1584_v37 = vpop.f32.mrb[10].mxu0  ;;  %v1603_v38 = vpop.f32.mrb[8].mxu1 }
 0x138   :  { %v1585_v39 = vpop.f32.mrb[11].mxu0  ;;  %v1604_v40 = vpop.f32.mrb[9].mxu1 }
 0x139   :  { %v1175_v41 = vadd.f32 %v1583_v36, %v1135_v33  ;;  %v1605_v42 = vadd.f32 %v1604_v40, %v1603_v38  ;;  %v1606_v43 = vpop.f32.mrb[10].mxu1 }
 0x13a   :  { %v1607_v44 = vpop.f32.mrb[11].mxu1 }
 0x13b   :  { %v1215_v45 = vadd.f32 %v1605_v42, %v1175_v41 }
 0x155   :  { %v1625_v46 = vpop.f32.mrb[12].mxu0 }
 0x156   :  { %v1626_v47 = vpop.f32.mrb[13].mxu0 }
 0x157   :  { %v1627_v48 = vadd.f32 %v1626_v47, %v1625_v46  ;;  %v1628_v49 = vpop.f32.mrb[14].mxu0 }
 0x158   :  { %v1629_v50 = vpop.f32.mrb[15].mxu0 }
 0x159   :  { %v1255_v51 = vadd.f32 %v1627_v48, %v1215_v45 }
 0x15b   :  { %v1260_v52 = vmax.f32 %v1255_v51, 0.0 }
 0x15d   :  { %v1261_v53 = vpack.c.bf16 %v1260_v52, %v1260_v52 }
 0x15f   :  { %1639 = vmatmul.mubr.msk.bf16.vlgmr.msra.gmra.mrb[12].mxu1 %vm1281_vm2, %v1261_v53 }
 0x232   :  { %v1323_v55 = vpop.f32.mrb[12].mxu1 }
 0x233   :  { %v1324_v56 = vadd.f32 %v1473_v54, %v1323_v55  ;;  %v1640_v57 = vpop.f32.mrb[13].mxu1 }
 0x234   :  { %v1326_v58 = vpop.f32.mrb[14].mxu1 }
 0x235   :  { %v1641_v59 = vpop.f32.mrb[15].mxu1  ;;  %v1330_v60 = vsel %vm1329_vm3, %v1324_v56, -inf }
 0x236   :  { %1331 = vmax.xlane.f32.xlu0 %v1330_v60 }
 0x2c3   :  { %v1332_v61 = vpop.xlane.xlu0 %1331 }
 0x2c4   :  { %v1333_v62 = vsub.f32 %v1324_v56, %v1332_v61 }
 0x2c6   :  { %v1334_v63 = vmul.f32 1.442695, %v1333_v62 }
 0x2c8   :  { %1772 = vpow2.f32 %v1334_v63 }
 0x2d2   :  { %v1773_v0 = vpop.eup %1772 }
 0x2d3   :  { %v1336_v1 = vsel %vm1329_vm3, %v1773_v0, 0.0 }
 0x2d4   :  { %1337 = vadd.xlane.f32.xlu0 %v1336_v1 }
 0x361   :  { %v1338_v2 = vpop.xlane.xlu0 %1337 }
 0x362   :  { %1774 = vrcp.f32 %v1338_v2 }
 0x36c   :  { %v1775_v3 = vpop.eup %1774 }
 0x36d   :  { %v1340_v4 = vmul.f32 %v1775_v3, %v1773_v0 }
 0x36f   :  { %1341 = vst.msk [vmem:[%s2188_s5] sm:$0xff] %vm1329_vm3, %v1340_v4 }

// kernel: net_forward.4
= control target key start
LH: loop header
LB: loop body
LE: loop exit
PB: predicated region body
PF: predicated region fallthrough
CT: control target
= control target key end

     0   :  { %v1702_v1 = vmov 0   ;;  %s1703_s16 = smov 127   ;;  %s1704_s25 = smov 120   ;;  %vm31_vm0 = vcmask 457728   ;;  %vm145_vm1 = vcmask 130048   ;;  %vm718_vm2 = vcmask 453632   ;;  %s2324_s0 = inlined_call_operand.vmem [shape: bf16[2,4,16,128], index: 0, kind: input, shape index: {}]   ;;  %s2325_s1 = inlined_call_operand.vmem [shape: bf16[32,144], index: 1, kind: input, shape index: {}]   ;;  %s2326_s2 = inlined_call_operand.vmem [shape: f32[32,1], index: 2, kind: input, shape index: {}]   ;;  %s2327_s3 = inlined_call_operand.vmem [shape: bf16[2,32,56], index: 3, kind: output, shape index: {}]  }
   0x1   :  { %v1626_v0 = vld [vmem:[%s2324_s0] sm:$0xff]   ;;  %152 = vmatprep.subr.bf16.mxu0 %v1702_v1  ;;  %305 = vmatprep.subr.bf16.mxu1 %v1702_v1  ;;  %v1628_v3 = vld [vmem:[%s2324_s0 + $0x8] sm:$0xff]   ;;  %v1629_v4 = vld [vmem:[%s2324_s0 + $0x10] sm:$0xff]   ;;  %s1705_s7 = smov 119  }
   0x2   :  { %v1627_v2 = vld [vmem:[%s2324_s0] sm:$0xff]   ;;  %1624 = vset.pattern.permute.xlu0 %v1702_v1  ;;  %1625 = vset.pattern.permute.xlu1 %v1702_v1  ;;  %v1630_v6 = vld [vmem:[%s2324_s0 + $0x10] sm:$0xff]   ;;  %v1633_v7 = vld [vmem:[%s2324_s0 + $0x8] sm:$0xff]  }
   0x3   :  { %50 = vrot.lane.b32.xlu0 %v1626_v0, %s1703_s16  ;;  %228 = vrot.lane.b32.xlu1 %v1628_v3, %s1703_s16  ;;  %v1631_v5 = vld [vmem:[%s2324_s0] sm:$0xff]   ;;  %v1632_v8 = vld [vmem:[%s2324_s0 + $0x18] sm:$0xff]  }
   0x4   :  { %v1635_v9 = vld [vmem:[%s2324_s0] sm:$0xff]   ;;  %v1634_v10 = vld [vmem:[%s2324_s0 + $0x8] sm:$0xff]   ;;  %v1638_v13 = vld [vmem:[%s2324_s0 + $0x10] sm:$0xff]  }
   0x5   :  { %v1636_v11 = vld [vmem:[%s2324_s0] sm:$0xff]   ;;  %v1637_v12 = vld [vmem:[%s2324_s0 + $0x8] sm:$0xff]   ;;  %v1640_v15 = vld [vmem:[%s2324_s0 + $0x10] sm:$0xff]  }
   0x6   :  { %v1639_v14 = vld [vmem:[%s2324_s0] sm:$0xff]   ;;  %v1641_v16 = vld [vmem:[%s2324_s0 + $0x8] sm:$0xff]   ;;  %v1642_v17 = vld [vmem:[%s2324_s0 + $0x18] sm:$0xff]  }
   0x7   :  { %217 = vrot.lane.b32.xlu0 %v1627_v2, %s1703_s16  ;;  %81 = vrot.lane.b32.xlu1 %v1629_v4, %s1703_s16  ;;  %v1643_v18 = vld [vmem:[%s2324_s0] sm:$0xff]   ;;  %v1644_v19 = vld [vmem:[%s2324_s0 + $0x8] sm:$0xff]  }
   0x8   :  { %v1645_v20 = vld [vmem:[%s2324_s0 + $0x10] sm:$0xff]   ;;  %v1646_v21 = vld [vmem:[%s2324_s0] sm:$0xff]   ;;  %v1647_v22 = vld [vmem:[%s2324_s0 + $0x18] sm:$0xff]  }
   0x9   :  { %v1648_v23 = vld [vmem:[%s2324_s0 + $0x8] sm:$0xff]   ;;  %v1668_v24 = vld [vmem:[%s2324_s0] sm:$0xff]   ;;  %v1649_v25 = vld [vmem:[%s2324_s0 + $0x10] sm:$0xff]  }
   0xa   :  { %32 = vst.msk [vmem:[#allocation2] sm:$0xff] %vm31_vm0, %v1668_v24  ;;  %v1650_v26 = vld [vmem:[%s2324_s0 + $0x18] sm:$0xff]   ;;  %v1672_v27 = vld [vmem:[%s2324_s0 + $0x8] sm:$0xff]   ;;  %v1651_v28 = vld [vmem:[%s2324_s0 + $0x10] sm:$0xff]  }
   0xb   :  { %92 = vrot.lane.b32.xlu0 %v1631_v5, %s1704_s25  ;;  %248 = vrot.lane.b32.xlu1 %v1630_v6, %s1703_s16  ;;  %v1669_v29 = vld [vmem:[%s2324_s0 + $0x8] sm:$0xff]   ;;  %42 = vst.msk [vmem:[#allocation2 + $0x8] sm:$0xff] %vm31_vm0, %v1672_v27  ;;  %v1652_v30 = vld [vmem:[%s2324_s0 + $0x18] sm:$0xff]  }
   0xc   :  { %v1653_v32 = vld [vmem:[%s2324_s0 + $0x20] sm:$0xff]   ;;  %v1678_v33 = vld [vmem:[%s2324_s0 + $0x10] sm:$0xff]   ;;  %v1655_v35 = vld [vmem:[%s2324_s0 + $0x28] sm:$0xff]  }
   0xd   :  { %v1654_v34 = vld [vmem:[%s2324_s0 + $0x20] sm:$0xff]   ;;  %63 = vst.msk [vmem:[#allocation2 + $0x18] sm:$0xff] %vm31_vm0, %v1678_v33  ;;  %v1675_v37 = vld [vmem:[%s2324_s0 + $0x10] sm:$0xff]   ;;  %v1683_v39 = vld [vmem:[%s2324_s0 + $0x18] sm:$0xff]  }
   0xe   :  { %v1656_v38 = vld [vmem:[%s2324_s0 + $0x30] sm:$0xff]   ;;  %v1679_v41 = vld [vmem:[%s2324_s0 + $0x18] sm:$0xff]   ;;  %v1657_v42 = vld [vmem:[%s2324_s0 + $0x20] sm:$0xff]   ;;  %73 = vst.msk [vmem:[#allocation2 + $0x20] sm:$0xff] %vm31_vm0, %v1683_v39 }
   0xf   :  { %103 = vrot.lane.b32.xlu0 %v1633_v7, %s1704_s25  ;;  %259 = vrot.lane.b32.xlu1 %v1632_v8, %s1703_s16  ;;  %v1658_v43 = vld [vmem:[%s2324_s0 + $0x30] sm:$0xff]   ;;  %v1659_v45 = vld [vmem:[%s2324_s0 + $0x28] sm:$0xff]  }
  0x10   :  { %v1900_v46 = vld [vmem:[%s2325_s1 + $0x4] ss:$8 sps:$4 sm:$0xff]   ;;  %v1690_v47 = vld [vmem:[%s2324_s0 + $0x18] sm:$0xff]   ;;  %v1665_v56 = vld [vmem:[%s2324_s0 + $0x30] sm:$0xff]  }
  0x11   :  { %v118_v31 = vld [vmem:[#allocation2] sm:$0xff]  ;;  %v1660_v48 = vld [vmem:[%s2324_s0 + $0x38] sm:$0xff]   ;;  %1405 = vmatprep.mubr.msk.bf16.mxu0 %vm145_vm1, %v1900_v46  ;;  %1430 = vmatprep.mubr.msk.bf16.mxu1 %vm145_vm1, %v1900_v46  ;;  %v1662_v51 = vld [vmem:[%s2324_s0 + $0x28] sm:$0xff]  }
  0x12   :  { %153 = vmatpush1.bf16.msra.mxu0 %v118_v31  ;;  %209 = vst.msk [vmem:[#allocation2] sm:$0xff] %vm31_vm0, %v1669_v29  ;;  %v119_v36 = vld [vmem:[#allocation2 + $0x8] sm:$0xff]  ;;  %v1661_v50 = vld [vmem:[%s2324_s0 + $0x20] sm:$0xff]   ;;  %v1666_v58 = vld [vmem:[%s2324_s0 + $0x30] sm:$0xff]  }
  0x13   :  { %114 = vrot.lane.b32.xlu0 %v1635_v9, %s1705_s7  ;;  %270 = vrot.lane.b32.xlu1 %v1634_v10, %s1704_s25  ;;  %v1663_v52 = vld [vmem:[%s2324_s0 + $0x20] sm:$0xff]   ;;  %v1664_v54 = vld [vmem:[%s2324_s0 + $0x28] sm:$0xff]  }
  0x14   :  { %154 = vmatprep.subr.bf16.mxu0 %v1702_v1  ;;  %v1890_v44 = vld [vmem:[#allocation2 + $0x18] sm:$0xff]  ;;  %v1691_v53 = vld [vmem:[%s2324_s0 + $0x20] sm:$0xff]   ;;  %v1695_v59 = vld [vmem:[%s2324_s0 + $0x28] sm:$0xff]  }
  0x15   :  { %240 = vst.msk [vmem:[#allocation2 + $0x18] sm:$0xff] %vm31_vm0, %v1679_v41  ;;  %v1667_v57 = vld [vmem:[%s2324_s0 + $0x20] sm:$0xff]   ;;  %v1671_v60 = vld [vmem:[%s2324_s0 + $0x28] sm:$0xff]   ;;  %v1670_v62 = vld [vmem:[%s2324_s0 + $0x38] sm:$0xff]  }
  0x16   :  { %155 = vmatpush1.bf16.msra.mxu0 %v119_v36  ;;  %v1674_v63 = vld [vmem:[%s2324_s0 + $0x20] sm:$0xff]   ;;  %v1673_v0 = vld [vmem:[%s2324_s0 + $0x28] sm:$0xff]   ;;  %v1697_v2 = vld [vmem:[%s2324_s0 + $0x30] sm:$0xff]  }
  0x17   :  { %281 = vrot.lane.b32.xlu0 %v1636_v11, %s1705_s7  ;;  %292 = vrot.lane.b32.xlu1 %v1637_v12, %s1705_s7  ;;  %v1677_v3 = vld [vmem:[%s2324_s0 + $0x30] sm:$0xff]   ;;  %v1676_v5 = vld [vmem:[%s2324_s0 + $0x20] sm:$0xff]  }
  0x18   :  { %156 = vmatprep.subr.bf16.mxu0 %v1702_v1  ;;  %v1682_v6 = vld [vmem:[%s2324_s0 + $0x38] sm:$0xff]   ;;  %v1681_v7 = vld [vmem:[%s2324_s0 + $0x28] sm:$0xff]   ;;  %v1685_v9 = vld [vmem:[%s2324_s0 + $0x30] sm:$0xff]  }
  0x19   :  { %v296_v40 = vld [vmem:[#allocation2] sm:$0xff]  ;;  %v1700_v8 = vld [vmem:[%s2324_s0 + $0x38] sm:$0xff]   ;;  %v1686_v12 = vld [vmem:[%s2324_s0 + $0x30] sm:$0xff]  }
  0x1a   :  { %306 = vmatpush1.bf16.msra.mxu1 %v296_v40  ;;  %366 = vst.msk [vmem:[#allocation2] sm:$0xff] %vm31_vm0, %v1675_v37  ;;  %v1684_v11 = vld [vmem:[%s2324_s0 + $0x38] sm:$0xff]  }
  0x1b   :  { %383 = vrot.lane.b32.xlu0 %v1638_v13, %s1703_s16  ;;  %394 = vrot.lane.b32.xlu1 %v1639_v14, %s1704_s25  ;;  %v1687_v13 = vld [vmem:[%s2324_s0 + $0x38] sm:$0xff]  }
  0x1c   :  { %307 = vmatprep.subr.bf16.mxu1 %v1702_v1 }
  0x1f   :  { %531 = vrot.lane.b32.xlu0 %v1640_v15, %s1703_s16  ;;  %405 = vrot.lane.b32.xlu1 %v1641_v16, %s1704_s25 }
  0x21   :  { %v1911_v49 = vld [vmem:[#allocation2] sm:$0xff] }
  0x22   :  { %523 = vst.msk [vmem:[#allocation2] sm:$0xff] %vm31_vm0, %v1690_v47 }
  0x23   :  { %542 = vrot.lane.b32.xlu0 %v1642_v17, %s1703_s16  ;;  %416 = vrot.lane.b32.xlu1 %v1643_v18, %s1705_s7 }
  0x27   :  { %553 = vrot.lane.b32.xlu0 %v1644_v19, %s1704_s25  ;;  %427 = vrot.lane.b32.xlu1 %v1645_v20, %s1704_s25  ;;  %v122_v20 = vld [vmem:[#allocation2 + $0x20] sm:$0xff] }
  0x29   :  { %v1935_v55 = vld [vmem:[#allocation2] sm:$0xff] }
  0x2a   :  { %732 = vst.msk [vmem:[#allocation2] sm:$0xff] %vm31_vm0, %v1691_v53  ;;  %v16_v53 = vld [vmem:[%s2326_s2 + $0x8] sm:$0xff] }
  0x2b   :  { %564 = vrot.lane.b32.xlu0 %v1646_v21, %s1705_s7  ;;  %438 = vrot.lane.b32.xlu1 %v1647_v22, %s1704_s25  ;;  %v1680_v21 = vld [vmem:[%s2324_s0 + $0x18] sm:$0xff]  }
  0x2f   :  { %575 = vrot.lane.b32.xlu0 %v1648_v23, %s1705_s7  ;;  %449 = vrot.lane.b32.xlu1 %v1649_v25, %s1705_s7 }
  0x31   :  { %v1957_v61 = vld [vmem:[#allocation2] sm:$0xff] }
  0x32   :  { %884 = vst.msk [vmem:[#allocation2] sm:$0xff] %vm31_vm0, %v1695_v59 }
  0x33   :  { %586 = vrot.lane.b32.xlu0 %v1650_v26, %s1704_s25  ;;  %597 = vrot.lane.b32.xlu1 %v1651_v28, %s1705_s7 }
  0x37   :  { %608 = vrot.lane.b32.xlu0 %v1652_v30, %s1705_s7  ;;  %750 = vrot.lane.b32.xlu1 %v1653_v32, %s1703_s16  ;;  %v299_v30 = vld [vmem:[#allocation2 + $0x18] sm:$0xff] }
  0x39   :  { %v1979_v4 = vld [vmem:[#allocation2] sm:$0xff] }
  0x3a   :  { %1041 = vst.msk [vmem:[#allocation2] sm:$0xff] %vm31_vm0, %v1697_v2  ;;  %v18_v2 = vld [vmem:[%s2326_s2 + $0x18] sm:$0xff] }
  0x3b   :  { %892 = vrot.lane.b32.xlu0 %v1654_v34, %s1703_s16  ;;  %903 = vrot.lane.b32.xlu1 %v1655_v35, %s1703_s16 }
  0x3f   :  { %781 = vrot.lane.b32.xlu0 %v1656_v38, %s1703_s16  ;;  %792 = vrot.lane.b32.xlu1 %v1657_v42, %s1704_s25  ;;  %v19_v42 = vld [vmem:[%s2325_s1] sm:$0xff] }
  0x41   :  { %v2001_v10 = vld [vmem:[#allocation2] sm:$0xff] }
  0x42   :  { %1198 = vst.msk [vmem:[#allocation2] sm:$0xff] %vm31_vm0, %v1700_v8  ;;  %v1692_v8 = vld [vmem:[%s2324_s0 + $0x30] sm:$0xff]  }
  0x43   :  { %923 = vrot.lane.b32.xlu0 %v1658_v43, %s1703_s16  ;;  %803 = vrot.lane.b32.xlu1 %v1659_v45, %s1704_s25  ;;  %v20_v43 = vld [vmem:[%s2325_s1 + $0x8] sm:$0xff] }
  0x44   :  { %v2056_v47 = vcombine.low %v19_v42, %v20_v43 }
  0x47   :  { %934 = vrot.lane.b32.xlu0 %v1660_v48, %s1703_s16  ;;  %814 = vrot.lane.b32.xlu1 %v1661_v50, %s1705_s7 }
  0x4b   :  { %945 = vrot.lane.b32.xlu0 %v1662_v51, %s1704_s25  ;;  %956 = vrot.lane.b32.xlu1 %v1663_v52, %s1705_s7  ;;  %v1696_v51 = vld [vmem:[%s2324_s0 + $0x28] sm:$0xff]   ;;  %v15_v52 = vld [vmem:[%s2326_s2] sm:$0xff] }
  0x4f   :  { %967 = vrot.lane.b32.xlu0 %v1664_v54, %s1705_s7  ;;  %1058 = vrot.lane.b32.xlu1 %v1665_v56, %s1703_s16 }
  0x53   :  { %1069 = vrot.lane.b32.xlu0 %v1667_v57, %s1704_s25  ;;  %1206 = vrot.lane.b32.xlu1 %v1666_v58, %s1703_s16  ;;  %v2074_v58 = vld [vmem:[%s2325_s1 + $0x14] ss:$8 sps:$4 sm:$0xff]  }
  0x57   :  { %1080 = vrot.lane.b32.xlu0 %v1671_v60, %s1704_s25  ;;  %1217 = vrot.lane.b32.xlu1 %v1670_v62, %s1703_s16  ;;  %v17_v62 = vld [vmem:[%s2326_s2 + $0x10] sm:$0xff] }
  0x5b   :  { %1091 = vrot.lane.b32.xlu0 %v1674_v63, %s1705_s7  ;;  %1228 = vrot.lane.b32.xlu1 %v1673_v0, %s1704_s25  ;;  %v21_v63 = vld [vmem:[%s2325_s1 + $0x10] sm:$0xff]  ;;  %v22_v0 = vld [vmem:[%s2325_s1 + $0x18] sm:$0xff] }
  0x5f   :  { %1102 = vrot.lane.b32.xlu0 %v1677_v3, %s1704_s25  ;;  %1239 = vrot.lane.b32.xlu1 %v1676_v5, %s1705_s7 }
  0x63   :  { %1113 = vrot.lane.b32.xlu0 %v1682_v6, %s1704_s25  ;;  %1250 = vrot.lane.b32.xlu1 %v1681_v7, %s1705_s7  ;;  %v2097_v7 = vcombine.low %v21_v63, %v22_v0 }
  0x67   :  { %1124 = vrot.lane.b32.xlu0 %v1685_v9, %s1705_s7  ;;  %1261 = vrot.lane.b32.xlu1 %v1684_v11, %s1704_s25 }
  0x6b   :  { %1272 = vrot.lane.b32.xlu0 %v1686_v12, %s1705_s7  ;;  %1283 = vrot.lane.b32.xlu1 %v1687_v13, %s1705_s7 }
  0x6f   :  { %676 = vperm.xlu0 %1624, %v15_v52   ;;  %681 = vperm.xlu1 %1625, %v16_v53  }
  0x73   :  { %686 = vperm.xlu1 %1625, %v17_v62   ;;  %691 = vperm.xlu0 %1624, %v18_v2  }
  0x75   :  { %v51_v14 = vpop.permute.xlu0 %50  ;;  %v229_v15 = vpop.permute.xlu1 %228 }
  0x76   :  { %53 = vst.msk [vmem:[#allocation2 + $0x10] sm:$0xff] %vm31_vm0, %v51_v14  ;;  %v1699_v14 = vld [vmem:[%s2324_s0 + $0x38] sm:$0xff]  }
  0x79   :  { %v218_v16 = vpop.permute.xlu0 %217  ;;  %v82_v17 = vpop.permute.xlu1 %81 }
  0x7a   :  { %220 = vst.msk [vmem:[#allocation2 + $0x8] sm:$0xff] %vm31_vm0, %v218_v16  ;;  %84 = vst.msk [vmem:[#allocation2 + $0x28] sm:$0xff] %vm31_vm0, %v82_v17 }
  0x7d   :  { %v120_v18 = vld [vmem:[#allocation2 + $0x10] sm:$0xff]  ;;  %v93_v19 = vpop.permute.xlu0 %92  ;;  %v249_v22 = vpop.permute.xlu1 %248 }
  0x7e   :  { %157 = vmatpush1.bf16.msra.mxu0 %v120_v18  ;;  %231 = vst.msk [vmem:[#allocation2 + $0x10] sm:$0xff] %vm31_vm0, %v229_v15  ;;  %95 = vst.msk [vmem:[#allocation2 + $0x30] sm:$0xff] %vm31_vm0, %v93_v19  ;;  %v1698_v18 = vld [vmem:[%s2324_s0 + $0x38] sm:$0xff]  }
  0x7f   :  { %158 = vmatprep.subr.bf16.mxu0 %v1702_v1  ;;  %251 = vst.msk [vmem:[#allocation2 + $0x20] sm:$0xff] %vm31_vm0, %v249_v22 }
  0x81   :  { %v297_v23 = vld [vmem:[#allocation2 + $0x8] sm:$0xff]  ;;  %v104_v24 = vpop.permute.xlu0 %103  ;;  %v260_v25 = vpop.permute.xlu1 %259 }
  0x82   :  { %159 = vmatpush1.bf16.msra.mxu0 %v1890_v44  ;;  %308 = vmatpush1.bf16.msra.mxu1 %v297_v23  ;;  %375 = vst.msk [vmem:[#allocation2 + $0x8] sm:$0xff] %vm31_vm0, %v1680_v21  ;;  %106 = vst.msk [vmem:[#allocation2 + $0x38] sm:$0xff] %vm31_vm0, %v104_v24  ;;  %v123_v26 = vld [vmem:[#allocation2 + $0x28] sm:$0xff] }
  0x83   :  { %160 = vmatprep.subr.bf16.mxu0 %v1702_v1  ;;  %309 = vmatprep.subr.bf16.mxu1 %v1702_v1  ;;  %262 = vst.msk [vmem:[#allocation2 + $0x28] sm:$0xff] %vm31_vm0, %v260_v25 }
  0x85   :  { %v298_v27 = vld [vmem:[#allocation2 + $0x10] sm:$0xff]  ;;  %v115_v28 = vpop.permute.xlu0 %114  ;;  %v271_v31 = vpop.permute.xlu1 %270 }
  0x86   :  { %v124_v29 = vld [vmem:[#allocation2 + $0x30] sm:$0xff]  ;;  %161 = vmatpush1.bf16.msra.mxu0 %v122_v20  ;;  %310 = vmatpush1.bf16.msra.mxu1 %v298_v27  ;;  %117 = vst.msk [vmem:[#allocation2 + $0x40] sm:$0xff] %vm31_vm0, %v115_v28  ;;  %v300_v34 = vld [vmem:[#allocation2 + $0x20] sm:$0xff] }
  0x87   :  { %162 = vmatprep.subr.bf16.mxu0 %v1702_v1  ;;  %311 = vmatprep.subr.bf16.mxu1 %v1702_v1  ;;  %273 = vst.msk [vmem:[#allocation2 + $0x30] sm:$0xff] %vm31_vm0, %v271_v31  ;;  %v1701_v31 = vld [vmem:[%s2324_s0 + $0x38] sm:$0xff]  }
  0x89   :  { %v282_v32 = vpop.permute.xlu0 %281  ;;  %v125_v33 = vld [vmem:[#allocation2 + $0x38] sm:$0xff]  ;;  %v293_v35 = vpop.permute.xlu1 %292  ;;  %v454_v40 = vld [vmem:[#allocation2 + $0x8] sm:$0xff] }
  0x8a   :  { %163 = vmatpush1.bf16.msra.mxu0 %v123_v26  ;;  %312 = vmatpush1.bf16.msra.mxu1 %v299_v30  ;;  %284 = vst.msk [vmem:[#allocation2 + $0x38] sm:$0xff] %vm31_vm0, %v282_v32  ;;  %v301_v38 = vld [vmem:[#allocation2 + $0x28] sm:$0xff] }
  0x8b   :  { %164 = vmatprep.subr.bf16.mxu0 %v1702_v1  ;;  %313 = vmatprep.subr.bf16.mxu1 %v1702_v1 }
  0x8d   :  { %v126_v36 = vld [vmem:[#allocation2 + $0x40] sm:$0xff]  ;;  %v384_v37 = vpop.permute.xlu0 %383  ;;  %v395_v39 = vpop.permute.xlu1 %394 }
  0x8e   :  { %165 = vmatpush1.bf16.msra.mxu0 %v124_v29  ;;  %314 = vmatpush1.bf16.msra.mxu1 %v300_v34  ;;  %295 = vst.msk [vmem:[#allocation2 + $0x40] sm:$0xff] %vm31_vm0, %v293_v35  ;;  %386 = vst.msk [vmem:[#allocation2 + $0x10] sm:$0xff] %vm31_vm0, %v384_v37  ;;  %v302_v44 = vld [vmem:[#allocation2 + $0x30] sm:$0xff] }
  0x8f   :  { %166 = vmatprep.subr.bf16.mxu0 %v1702_v1  ;;  %315 = vmatprep.subr.bf16.mxu1 %v1702_v1  ;;  %397 = vst.msk [vmem:[#allocation2 + $0x18] sm:$0xff] %vm31_vm0, %v395_v39 }
  0x91   :  { %v532_v41 = vpop.permute.xlu0 %531  ;;  %v406_v45 = vpop.permute.xlu1 %405  ;;  %v303_v54 = vld [vmem:[#allocation2 + $0x38] sm:$0xff] }
  0x92   :  { %167 = vmatpush1.bf16.msra.mxu0 %v125_v33  ;;  %316 = vmatpush1.bf16.msra.mxu1 %v301_v38  ;;  %534 = vst.msk [vmem:[#allocation2 + $0x8] sm:$0xff] %vm31_vm0, %v532_v41  ;;  %408 = vst.msk [vmem:[#allocation2 + $0x20] sm:$0xff] %vm31_vm0, %v406_v45 }
  0x93   :  { %168 = vmatprep.subr.bf16.mxu0 %v1702_v1  ;;  %317 = vmatprep.subr.bf16.mxu1 %v1702_v1 }
  0x95   :  { %v455_v48 = vld [vmem:[#allocation2 + $0x10] sm:$0xff]  ;;  %v543_v50 = vpop.permute.xlu0 %542  ;;  %v417_v56 = vpop.permute.xlu1 %416 }
  0x96   :  { %169 = vmatpush1.bf16.msra.mxu0 %v126_v36  ;;  %318 = vmatpush1.bf16.msra.mxu1 %v302_v44  ;;  %545 = vst.msk [vmem:[#allocation2 + $0x10] sm:$0xff] %vm31_vm0, %v543_v50  ;;  %v456_v57 = vld [vmem:[#allocation2 + $0x18] sm:$0xff]  ;;  %419 = vst.msk [vmem:[#allocation2 + $0x28] sm:$0xff] %vm31_vm0, %v417_v56 }
  0x97   :  { %319 = vmatprep.subr.bf16.mxu1 %v1702_v1  ;;  %462 = vmatprep.subr.bf16.mxu0 %v1702_v1 }
  0x99   :  { %185 = vmatmul.mubr.bf16.vlgmr.msra.gmra.mrb[0].mxu0 %v2056_v47  ;;  %v554_v59 = vpop.permute.xlu0 %553  ;;  %v613_v60 = vld [vmem:[#allocation2 + $0x8] sm:$0xff]  ;;  %v428_v3 = vpop.permute.xlu1 %427  ;;  %v457_v5 = vld [vmem:[#allocation2 + $0x20] sm:$0xff] }
  0x9a   :  { %320 = vmatpush1.bf16.msra.mxu1 %v303_v54  ;;  %463 = vmatpush1.bf16.msra.mxu0 %v1911_v49  ;;  %556 = vst.msk [vmem:[#allocation2 + $0x18] sm:$0xff] %vm31_vm0, %v554_v59  ;;  %742 = vst.msk [vmem:[#allocation2 + $0x8] sm:$0xff] %vm31_vm0, %v1696_v51  ;;  %v304_v49 = vld [vmem:[#allocation2 + $0x40] sm:$0xff] }
  0x9b   :  { %321 = vmatprep.subr.bf16.mxu1 %v1702_v1  ;;  %464 = vmatprep.subr.bf16.mxu0 %v1702_v1  ;;  %430 = vst.msk [vmem:[#allocation2 + $0x30] sm:$0xff] %vm31_vm0, %v428_v3 }
  0x9c   :  { %1406 = vmatprep.mubr.msk.bf16.mxu0 %vm145_vm1, %v2074_v58 }
  0x9d   :  { %v565_v6 = vpop.permute.xlu0 %564  ;;  %v439_v9 = vpop.permute.xlu1 %438  ;;  %v458_v11 = vld [vmem:[#allocation2 + $0x28] sm:$0xff]  ;;  %v614_v19 = vld [vmem:[#allocation2 + $0x10] sm:$0xff] }
  0x9e   :  { %322 = vmatpush1.bf16.msra.mxu1 %v304_v49  ;;  %465 = vmatpush1.bf16.msra.mxu0 %v454_v40  ;;  %567 = vst.msk [vmem:[#allocation2 + $0x20] sm:$0xff] %vm31_vm0, %v565_v6  ;;  %441 = vst.msk [vmem:[#allocation2 + $0x38] sm:$0xff] %vm31_vm0, %v439_v9 }
  0x9f   :  { %466 = vmatprep.subr.bf16.mxu0 %v1702_v1  ;;  %621 = vmatprep.subr.bf16.mxu1 %v1702_v1 }
  0xa1   :  { %338 = vmatmul.mubr.bf16.vlgmr.msra.gmra.mrb[0].mxu1 %v2056_v47  ;;  %v576_v12 = vpop.permute.xlu0 %575  ;;  %v615_v13 = vld [vmem:[#allocation2 + $0x18] sm:$0xff]  ;;  %193 = vmatmul.mubr.bf16.gmra.mrb[4].mxu0 %v2097_v7  ;;  %v450_v15 = vpop.permute.xlu1 %449  ;;  %v819_v26 = vld [vmem:[#allocation2 + $0x8] sm:$0xff] }
  0xa2   :  { %467 = vmatpush1.bf16.msra.mxu0 %v455_v48  ;;  %622 = vmatpush1.bf16.msra.mxu1 %v1935_v55  ;;  %578 = vst.msk [vmem:[#allocation2 + $0x28] sm:$0xff] %vm31_vm0, %v576_v12  ;;  %763 = vst.msk [vmem:[#allocation2 + $0x18] sm:$0xff] %vm31_vm0, %v1692_v8  ;;  %v459_v16 = vld [vmem:[#allocation2 + $0x30] sm:$0xff] }
  0xa3   :  { %468 = vmatprep.subr.bf16.mxu0 %v1702_v1  ;;  %623 = vmatprep.subr.bf16.mxu1 %v1702_v1  ;;  %452 = vst.msk [vmem:[#allocation2 + $0x40] sm:$0xff] %vm31_vm0, %v450_v15 }
  0xa4   :  { %1431 = vmatprep.mubr.msk.bf16.mxu1 %vm145_vm1, %v2074_v58  ;;  %1455 = vmatprep.mubr.msk.bf16.mxu0 %vm145_vm1, %v1900_v46 }
  0xa5   :  { %v587_v55 = vpop.permute.xlu0 %586  ;;  %v616_v17 = vld [vmem:[#allocation2 + $0x20] sm:$0xff]  ;;  %v598_v20 = vpop.permute.xlu1 %597  ;;  %v460_v21 = vld [vmem:[#allocation2 + $0x38] sm:$0xff] }
  0xa6   :  { %469 = vmatpush1.bf16.msra.mxu0 %v456_v57  ;;  %624 = vmatpush1.bf16.msra.mxu1 %v613_v60  ;;  %589 = vst.msk [vmem:[#allocation2 + $0x30] sm:$0xff] %vm31_vm0, %v587_v55  ;;  %773 = vst.msk [vmem:[#allocation2 + $0x20] sm:$0xff] %vm31_vm0, %v1699_v14 }
  0xa7   :  { %470 = vmatprep.subr.bf16.mxu0 %v1702_v1  ;;  %625 = vmatprep.subr.bf16.mxu1 %v1702_v1  ;;  %600 = vst.msk [vmem:[#allocation2 + $0x38] sm:$0xff] %vm31_vm0, %v598_v20 }
  0xa9   :  { %v609_v22 = vpop.permute.xlu0 %608  ;;  %346 = vmatmul.mubr.bf16.gmra.mrb[4].mxu1 %v2097_v7  ;;  %v2130_v23 = vld [vmem:[#allocation2 + $0x18] sm:$0xff]  ;;  %v751_v25 = vpop.permute.xlu1 %750  ;;  %v617_v29 = vld [vmem:[#allocation2 + $0x28] sm:$0xff] }
  0xaa   :  { %471 = vmatpush1.bf16.msra.mxu0 %v457_v5  ;;  %626 = vmatpush1.bf16.msra.mxu1 %v614_v19  ;;  %915 = vst.msk [vmem:[#allocation2 + $0x18] sm:$0xff] %vm31_vm0, %v1698_v18  ;;  %v461_v24 = vld [vmem:[#allocation2 + $0x40] sm:$0xff]  ;;  %753 = vst.msk [vmem:[#allocation2 + $0x10] sm:$0xff] %vm31_vm0, %v751_v25 }
  0xab   :  { %472 = vmatprep.subr.bf16.mxu0 %v1702_v1  ;;  %627 = vmatprep.subr.bf16.mxu1 %v1702_v1  ;;  %611 = vst.msk [vmem:[#allocation2 + $0x40] sm:$0xff] %vm31_vm0, %v609_v22  ;;  %v1287_v22 = vld [vmem:[#allocation2] sm:$0xff] }
  0xac   :  { %1482 = vmatprep.mubr.msk.bf16.mxu1 %vm145_vm1, %v1900_v46 }
  0xad   :  { %v893_v27 = vpop.permute.xlu0 %892  ;;  %v904_v28 = vpop.permute.xlu1 %903  ;;  %v618_v32 = vld [vmem:[#allocation2 + $0x30] sm:$0xff]  ;;  %v2148_v35 = vld [vmem:[#allocation2 + $0x20] sm:$0xff] }
  0xae   :  { %473 = vmatpush1.bf16.msra.mxu0 %v458_v11  ;;  %628 = vmatpush1.bf16.msra.mxu1 %v615_v13  ;;  %895 = vst.msk [vmem:[#allocation2 + $0x8] sm:$0xff] %vm31_vm0, %v893_v27  ;;  %v619_v38 = vld [vmem:[#allocation2 + $0x38] sm:$0xff] }
  0xaf   :  { %474 = vmatprep.subr.bf16.mxu0 %v1702_v1  ;;  %629 = vmatprep.subr.bf16.mxu1 %v1702_v1 }
  0xb1   :  { %v782_v30 = vpop.permute.xlu0 %781  ;;  %v820_v33 = vld [vmem:[#allocation2 + $0x10] sm:$0xff]  ;;  %v793_v34 = vpop.permute.xlu1 %792  ;;  %v974_v54 = vld [vmem:[#allocation2 + $0x18] sm:$0xff] }
  0xb2   :  { %475 = vmatpush1.bf16.msra.mxu0 %v459_v16  ;;  %630 = vmatpush1.bf16.msra.mxu1 %v616_v17  ;;  %784 = vst.msk [vmem:[#allocation2 + $0x28] sm:$0xff] %vm31_vm0, %v782_v30  ;;  %906 = vst.msk [vmem:[#allocation2 + $0x10] sm:$0xff] %vm31_vm0, %v904_v28  ;;  %v620_v42 = vld [vmem:[#allocation2 + $0x40] sm:$0xff] }
  0xb3   :  { %476 = vmatprep.subr.bf16.mxu0 %v1702_v1  ;;  %631 = vmatprep.subr.bf16.mxu1 %v1702_v1  ;;  %795 = vst.msk [vmem:[#allocation2 + $0x30] sm:$0xff] %vm31_vm0, %v793_v34 }
  0xb5   :  { %v972_v36 = vld [vmem:[#allocation2 + $0x8] sm:$0xff]  ;;  %v924_v37 = vpop.permute.xlu0 %923  ;;  %v804_v39 = vpop.permute.xlu1 %803 }
  0xb6   :  { %477 = vmatpush1.bf16.msra.mxu0 %v460_v21  ;;  %632 = vmatpush1.bf16.msra.mxu1 %v617_v29  ;;  %926 = vst.msk [vmem:[#allocation2 + $0x20] sm:$0xff] %vm31_vm0, %v924_v37  ;;  %1050 = vst.msk [vmem:[#allocation2 + $0x8] sm:$0xff] %vm31_vm0, %v1701_v31 }
  0xb7   :  { %478 = vmatprep.subr.bf16.mxu0 %v1702_v1  ;;  %633 = vmatprep.subr.bf16.mxu1 %v1702_v1  ;;  %806 = vst.msk [vmem:[#allocation2 + $0x38] sm:$0xff] %vm31_vm0, %v804_v39 }
  0xb9   :  { %v2157_v40 = vld [vmem:[#allocation2 + $0x28] sm:$0xff]  ;;  %v935_v41 = vpop.permute.xlu0 %934  ;;  %v815_v43 = vpop.permute.xlu1 %814 }
  0xba   :  { %479 = vmatpush1.bf16.msra.mxu0 %v461_v24  ;;  %634 = vmatpush1.bf16.msra.mxu1 %v618_v32  ;;  %937 = vst.msk [vmem:[#allocation2 + $0x28] sm:$0xff] %vm31_vm0, %v935_v41  ;;  %v2162_v44 = vld [vmem:[#allocation2 + $0x30] sm:$0xff]  ;;  %817 = vst.msk [vmem:[#allocation2 + $0x40] sm:$0xff] %vm31_vm0, %v815_v43 }
  0xbb   :  { %635 = vmatprep.subr.bf16.mxu1 %v1702_v1  ;;  %827 = vmatprep.subr.bf16.mxu0 %v1702_v1 }
  0xbd   :  { %495 = vmatmul.mubr.bf16.vlgmr.msra.gmra.mrb[8].mxu0 %v2056_v47  ;;  %v946_v45 = vpop.permute.xlu0 %945  ;;  %v957_v48 = vpop.permute.xlu1 %956  ;;  %v2183_v56 = vld [vmem:[#allocation2 + $0x8] sm:$0xff]  ;;  %v975_v60 = vld [vmem:[#allocation2 + $0x20] sm:$0xff] }
  0xbe   :  { %636 = vmatpush1.bf16.msra.mxu1 %v619_v38  ;;  %828 = vmatpush1.bf16.msra.mxu0 %v1957_v61  ;;  %948 = vst.msk [vmem:[#allocation2 + $0x30] sm:$0xff] %vm31_vm0, %v946_v45  ;;  %v2170_v50 = vld [vmem:[#allocation2 + $0x38] sm:$0xff]  ;;  %v973_v61 = vld [vmem:[#allocation2 + $0x10] sm:$0xff] }
  0xbf   :  { %637 = vmatprep.subr.bf16.mxu1 %v1702_v1  ;;  %829 = vmatprep.subr.bf16.mxu0 %v1702_v1  ;;  %959 = vst.msk [vmem:[#allocation2 + $0x38] sm:$0xff] %vm31_vm0, %v957_v48 }
  0xc0   :  { %1456 = vmatprep.mubr.msk.bf16.mxu0 %vm145_vm1, %v2074_v58 }
  0xc1   :  { %v968_v51 = vpop.permute.xlu0 %967  ;;  %v2177_v52 = vld [vmem:[#allocation2 + $0x40] sm:$0xff]  ;;  %v1059_v53 = vpop.permute.xlu1 %1058  ;;  %v976_v0 = vld [vmem:[#allocation2 + $0x28] sm:$0xff] }
  0xc2   :  { %638 = vmatpush1.bf16.msra.mxu1 %v620_v42  ;;  %830 = vmatpush1.bf16.msra.mxu0 %v819_v26  ;;  %970 = vst.msk [vmem:[#allocation2 + $0x40] sm:$0xff] %vm31_vm0, %v968_v51  ;;  %1061 = vst.msk [vmem:[#allocation2 + $0x10] sm:$0xff] %vm31_vm0, %v1059_v53 }
  0xc3   :  { %831 = vmatprep.subr.bf16.mxu0 %v1702_v1  ;;  %980 = vmatprep.subr.bf16.mxu1 %v1702_v1 }
  0xc5   :  { %503 = vmatmul.mubr.bf16.gmra.mrb[12].mxu0 %v2097_v7  ;;  %654 = vmatmul.mubr.bf16.vlgmr.msra.gmra.mrb[8].mxu1 %v2056_v47  ;;  %v1070_v57 = vpop.permute.xlu0 %1069  ;;  %v1207_v59 = vpop.permute.xlu1 %1206  ;;  %v977_v5 = vld [vmem:[#allocation2 + $0x30] sm:$0xff] }
  0xc6   :  { %832 = vmatpush1.bf16.msra.mxu0 %v820_v33  ;;  %981 = vmatpush1.bf16.msra.mxu1 %v1979_v4  ;;  %1072 = vst.msk [vmem:[#allocation2 + $0x18] sm:$0xff] %vm31_vm0, %v1070_v57  ;;  %1209 = vst.msk [vmem:[#allocation2 + $0x8] sm:$0xff] %vm31_vm0, %v1207_v59  ;;  %v978_v11 = vld [vmem:[#allocation2 + $0x38] sm:$0xff] }
  0xc7   :  { %833 = vmatprep.subr.bf16.mxu0 %v1702_v1  ;;  %982 = vmatprep.subr.bf16.mxu1 %v1702_v1 }
  0xc8   :  { %1483 = vmatprep.mubr.msk.bf16.mxu1 %vm145_vm1, %v2074_v58  ;;  %1515 = vmatprep.mubr.msk.bf16.mxu0 %vm145_vm1, %v1900_v46 }
  0xc9   :  { %v1081_v62 = vpop.permute.xlu0 %1080  ;;  %v1218_v4 = vpop.permute.xlu1 %1217  ;;  %v2198_v63 = vld [vmem:[#allocation2 + $0x10] sm:$0xff]  ;;  %v979_v15 = vld [vmem:[#allocation2 + $0x40] sm:$0xff] }
  0xca   :  { %834 = vmatpush1.bf16.msra.mxu0 %v2130_v23  ;;  %983 = vmatpush1.bf16.msra.mxu1 %v972_v36  ;;  %1083 = vst.msk [vmem:[#allocation2 + $0x20] sm:$0xff] %vm31_vm0, %v1081_v62  ;;  %1220 = vst.msk [vmem:[#allocation2 + $0x10] sm:$0xff] %vm31_vm0, %v1218_v4 }
  0xcb   :  { %835 = vmatprep.subr.bf16.mxu0 %v1702_v1  ;;  %984 = vmatprep.subr.bf16.mxu1 %v1702_v1 }
  0xcd   :  { %662 = vmatmul.mubr.bf16.gmra.mrb[12].mxu1 %v2097_v7  ;;  %v2202_v2 = vld [vmem:[#allocation2 + $0x18] sm:$0xff]  ;;  %v1092_v49 = vpop.permute.xlu0 %1091  ;;  %v1229_v3 = vpop.permute.xlu1 %1228 }
  0xce   :  { %836 = vmatpush1.bf16.msra.mxu0 %v2148_v35  ;;  %985 = vmatpush1.bf16.msra.mxu1 %v973_v61  ;;  %1094 = vst.msk [vmem:[#allocation2 + $0x28] sm:$0xff] %vm31_vm0, %v1092_v49  ;;  %1231 = vst.msk [vmem:[#allocation2 + $0x18] sm:$0xff] %vm31_vm0, %v1229_v3 }
  0xcf   :  { %837 = vmatprep.subr.bf16.mxu0 %v1702_v1  ;;  %986 = vmatprep.subr.bf16.mxu1 %v1702_v1 }
  0xd0   :  { %1544 = vmatprep.mubr.msk.bf16.mxu1 %vm145_vm1, %v1900_v46 }
  0xd1   :  { %v2211_v6 = vld [vmem:[#allocation2 + $0x20] sm:$0xff]  ;;  %v1103_v8 = vpop.permute.xlu0 %1102  ;;  %v1240_v9 = vpop.permute.xlu1 %1239  ;;  %v1289_v23 = vld [vmem:[#allocation2 + $0x10] sm:$0xff] }
  0xd2   :  { %838 = vmatpush1.bf16.msra.mxu0 %v2157_v40  ;;  %987 = vmatpush1.bf16.msra.mxu1 %v974_v54  ;;  %1105 = vst.msk [vmem:[#allocation2 + $0x30] sm:$0xff] %vm31_vm0, %v1103_v8  ;;  %1242 = vst.msk [vmem:[#allocation2 + $0x20] sm:$0xff] %vm31_vm0, %v1240_v9 }
  0xd3   :  { %839 = vmatprep.subr.bf16.mxu0 %v1702_v1  ;;  %988 = vmatprep.subr.bf16.mxu1 %v1702_v1 }
  0xd5   :  { %v1133_v12 = vld [vmem:[#allocation2 + $0x28] sm:$0xff]  ;;  %v1114_v13 = vpop.permute.xlu0 %1113  ;;  %v1251_v14 = vpop.permute.xlu1 %1250  ;;  %v1290_v24 = vld [vmem:[#allocation2 + $0x18] sm:$0xff] }
  0xd6   :  { %840 = vmatpush1.bf16.msra.mxu0 %v2162_v44  ;;  %989 = vmatpush1.bf16.msra.mxu1 %v975_v60  ;;  %1116 = vst.msk [vmem:[#allocation2 + $0x38] sm:$0xff] %vm31_vm0, %v1114_v13  ;;  %1253 = vst.msk [vmem:[#allocation2 + $0x28] sm:$0xff] %vm31_vm0, %v1251_v14 }
  0xd7   :  { %841 = vmatprep.subr.bf16.mxu0 %v1702_v1  ;;  %990 = vmatprep.subr.bf16.mxu1 %v1702_v1 }
  0xd9   :  { %v1134_v16 = vld [vmem:[#allocation2 + $0x30] sm:$0xff]  ;;  %v1125_v55 = vpop.permute.xlu0 %1124  ;;  %v1262_v17 = vpop.permute.xlu1 %1261  ;;  %v1291_v25 = vld [vmem:[#allocation2 + $0x20] sm:$0xff] }
  0xda   :  { %842 = vmatpush1.bf16.msra.mxu0 %v2170_v50  ;;  %991 = vmatpush1.bf16.msra.mxu1 %v976_v0  ;;  %1127 = vst.msk [vmem:[#allocation2 + $0x40] sm:$0xff] %vm31_vm0, %v1125_v55  ;;  %1264 = vst.msk [vmem:[#allocation2 + $0x30] sm:$0xff] %vm31_vm0, %v1262_v17 }
  0xdb   :  { %843 = vmatprep.subr.bf16.mxu0 %v1702_v1  ;;  %992 = vmatprep.subr.bf16.mxu1 %v1702_v1 }
  0xdd   :  { %v1135_v18 = vld [vmem:[#allocation2 + $0x38] sm:$0xff]  ;;  %v1273_v19 = vpop.permute.xlu0 %1272  ;;  %v1284_v20 = vpop.permute.xlu1 %1283  ;;  %v1292_v26 = vld [vmem:[#allocation2 + $0x28] sm:$0xff] }
  0xde   :  { %844 = vmatpush1.bf16.msra.mxu0 %v2177_v52  ;;  %993 = vmatpush1.bf16.msra.mxu1 %v977_v5  ;;  %1275 = vst.msk [vmem:[#allocation2 + $0x38] sm:$0xff] %vm31_vm0, %v1273_v19 }
  0xdf   :  { %994 = vmatprep.subr.bf16.mxu1 %v1702_v1  ;;  %1137 = vmatprep.subr.bf16.mxu0 %v1702_v1 }
  0xe1   :  { %860 = vmatmul.mubr.bf16.vlgmr.msra.gmra.mrb[16].mxu0 %v2056_v47  ;;  %v1136_v21 = vld [vmem:[#allocation2 + $0x40] sm:$0xff] }
  0xe2   :  { %995 = vmatpush1.bf16.msra.mxu1 %v978_v11  ;;  %1138 = vmatpush1.bf16.msra.mxu0 %v2001_v10  ;;  %1286 = vst.msk [vmem:[#allocation2 + $0x40] sm:$0xff] %vm31_vm0, %v1284_v20  ;;  %v1288_v10 = vld [vmem:[#allocation2 + $0x8] sm:$0xff] }
  0xe3   :  { %996 = vmatprep.subr.bf16.mxu1 %v1702_v1  ;;  %1139 = vmatprep.subr.bf16.mxu0 %v1702_v1 }
  0xe4   :  { %1516 = vmatprep.mubr.msk.bf16.mxu0 %vm145_vm1, %v2074_v58 }
  0xe5   :  { %v1294_v27 = vld [vmem:[#allocation2 + $0x38] sm:$0xff] }
  0xe6   :  { %997 = vmatpush1.bf16.msra.mxu1 %v979_v15  ;;  %1140 = vmatpush1.bf16.msra.mxu0 %v2183_v56 }
  0xe7   :  { %1141 = vmatprep.subr.bf16.mxu0 %v1702_v1  ;;  %1296 = vmatprep.subr.bf16.mxu1 %v1702_v1 }
  0xe9   :  { %1013 = vmatmul.mubr.bf16.vlgmr.msra.gmra.mrb[16].mxu1 %v2056_v47  ;;  %868 = vmatmul.mubr.bf16.gmra.mrb[20].mxu0 %v2097_v7  ;;  %v1295_v28 = vld [vmem:[#allocation2 + $0x40] sm:$0xff] }
  0xea   :  { %1142 = vmatpush1.bf16.msra.mxu0 %v2198_v63  ;;  %1297 = vmatpush1.bf16.msra.mxu1 %v1287_v22 }
  0xeb   :  { %1143 = vmatprep.subr.bf16.mxu0 %v1702_v1  ;;  %1298 = vmatprep.subr.bf16.mxu1 %v1702_v1 }
  0xec   :  { %1545 = vmatprep.mubr.msk.bf16.mxu1 %vm145_vm1, %v2074_v58  ;;  %1573 = vmatprep.mubr.msk.bf16.mxu0 %vm145_vm1, %v1900_v46 }
  0xee   :  { %1144 = vmatpush1.bf16.msra.mxu0 %v2202_v2  ;;  %1299 = vmatpush1.bf16.msra.mxu1 %v1288_v10  ;;  %v2276_v53 = vpop.permute.xlu0 %676  ;;  %v2278_v54 = vpop.permute.xlu1 %681 }
  0xef   :  { %1145 = vmatprep.subr.bf16.mxu0 %v1702_v1  ;;  %1300 = vmatprep.subr.bf16.mxu1 %v1702_v1 }
  0xf1   :  { %1021 = vmatmul.mubr.bf16.gmra.mrb[20].mxu1 %v2097_v7 }
  0xf2   :  { %1146 = vmatpush1.bf16.msra.mxu0 %v2211_v6  ;;  %1301 = vmatpush1.bf16.msra.mxu1 %v1289_v23  ;;  %v2282_v14 = vpop.permute.xlu1 %686 }
  0xf3   :  { %1147 = vmatprep.subr.bf16.mxu0 %v1702_v1  ;;  %1302 = vmatprep.subr.bf16.mxu1 %v1702_v1 }
  0xf4   :  { %1602 = vmatprep.mubr.msk.bf16.mxu1 %vm145_vm1, %v1900_v46  ;;  %v1293_v46 = vld [vmem:[#allocation2 + $0x30] sm:$0xff] }
  0xf6   :  { %1148 = vmatpush1.bf16.msra.mxu0 %v1133_v12  ;;  %1303 = vmatpush1.bf16.msra.mxu1 %v1290_v24 }
  0xf7   :  { %1149 = vmatprep.subr.bf16.mxu0 %v1702_v1  ;;  %1304 = vmatprep.subr.bf16.mxu1 %v1702_v1 }
  0xfa   :  { %1150 = vmatpush1.bf16.msra.mxu0 %v1134_v16  ;;  %1305 = vmatpush1.bf16.msra.mxu1 %v1291_v25 }
  0xfb   :  { %1151 = vmatprep.subr.bf16.mxu0 %v1702_v1  ;;  %1306 = vmatprep.subr.bf16.mxu1 %v1702_v1 }
  0xfe   :  { %1152 = vmatpush1.bf16.msra.mxu0 %v1135_v18  ;;  %1307 = vmatpush1.bf16.msra.mxu1 %v1292_v26  ;;  %v2288_v18 = vpop.permute.xlu0 %691 }
  0xff   :  { %1153 = vmatprep.subr.bf16.mxu0 %v1702_v1  ;;  %1308 = vmatprep.subr.bf16.mxu1 %v1702_v1 }
 0x102   :  { %1154 = vmatpush1.bf16.msra.mxu0 %v1136_v21  ;;  %1309 = vmatpush1.bf16.msra.mxu1 %v1293_v46 }
 0x103   :  { %1310 = vmatprep.subr.bf16.mxu1 %v1702_v1 }
 0x105   :  { %1170 = vmatmul.mubr.bf16.vlgmr.msra.gmra.mrb[24].mxu0 %v2056_v47 }
 0x106   :  { %1311 = vmatpush1.bf16.msra.mxu1 %v1294_v27  ;;  %1574 = vmatprep.mubr.msk.bf16.mxu0 %vm145_vm1, %v2074_v58 }
 0x107   :  { %1312 = vmatprep.subr.bf16.mxu1 %v1702_v1 }
 0x10a   :  { %1313 = vmatpush1.bf16.msra.mxu1 %v1295_v28 }
 0x10d   :  { %1178 = vmatmul.mubr.bf16.gmra.mrb[28].mxu0 %v2097_v7  ;;  %1329 = vmatmul.mubr.bf16.vlgmr.msra.gmra.mrb[24].mxu1 %v2056_v47 }
 0x10e   :  { %1603 = vmatprep.mubr.msk.bf16.mxu1 %vm145_vm1, %v2074_v58 }
 0x115   :  { %1337 = vmatmul.mubr.bf16.gmra.mrb[28].mxu1 %v2097_v7 }
 0x16c   :  { %v186_v29 = vpop.f32.mrb[0].mxu0 }
 0x16d   :  { %v188_v30 = vpop.f32.mrb[1].mxu0 }
 0x16e   :  { %v189_v31 = vpop.f32.mrb[2].mxu0 }
 0x16f   :  { %v191_v32 = vpop.f32.mrb[3].mxu0 }
 0x174   :  { %v339_v33 = vpop.f32.mrb[0].mxu1  ;;  %v194_v34 = vpop.f32.mrb[4].mxu0 }
 0x175   :  { %v354_v35 = vmax.f32 %v186_v29, %v339_v33  ;;  %v341_v36 = vpop.f32.mrb[1].mxu1  ;;  %v196_v1 = vpop.f32.mrb[5].mxu0 }
 0x176   :  { %v342_v37 = vpop.f32.mrb[2].mxu1  ;;  %v197_v38 = vpop.f32.mrb[6].mxu0 }
 0x177   :  { %v355_v39 = vmax.f32 %v189_v31, %v342_v37  ;;  %v344_v40 = vpop.f32.mrb[3].mxu1  ;;  %v199_v41 = vpop.f32.mrb[7].mxu0 }
 0x17c   :  { %v347_v47 = vpop.f32.mrb[4].mxu1 }
 0x17d   :  { %v356_v42 = vmax.f32 %v194_v34, %v347_v47  ;;  %v349_v43 = vpop.f32.mrb[5].mxu1 }
 0x17e   :  { %v350_v58 = vpop.f32.mrb[6].mxu1 }
 0x17f   :  { %v357_v44 = vmax.f32 %v197_v38, %v350_v58  ;;  %v352_v7 = vpop.f32.mrb[7].mxu1 }
 0x190   :  { %v496_v45 = vpop.f32.mrb[8].mxu0 }
 0x191   :  { %v511_v48 = vmax.f32 %v354_v35, %v496_v45  ;;  %v498_v50 = vpop.f32.mrb[9].mxu0 }
 0x192   :  { %v499_v51 = vpop.f32.mrb[10].mxu0 }
 0x193   :  { %v512_v61 = vmax.f32 %v355_v39, %v499_v51  ;;  %v501_v52 = vpop.f32.mrb[11].mxu0 }
 0x198   :  { %v504_v56 = vpop.f32.mrb[12].mxu0  ;;  %v655_v57 = vpop.f32.mrb[8].mxu1 }
 0x199   :  { %v513_v59 = vmax.f32 %v356_v42, %v504_v56  ;;  %v670_v60 = vmax.f32 %v511_v48, %v655_v57  ;;  %v506_v62 = vpop.f32.mrb[13].mxu0  ;;  %v657_v4 = vpop.f32.mrb[9].mxu1 }
 0x19a   :  { %v507_v63 = vpop.f32.mrb[14].mxu0  ;;  %v658_v0 = vpop.f32.mrb[10].mxu1 }
 0x19b   :  { %v694_v2 = vadd.f32 %v2276_v53, %v670_v60  ;;  %v514_v49 = vmax.f32 %v357_v44, %v507_v63  ;;  %v671_v3 = vmax.f32 %v512_v61, %v658_v0  ;;  %v660_v5 = vpop.f32.mrb[11].mxu1  ;;  %v509_v6 = vpop.f32.mrb[15].mxu0 }
 0x19d   :  { %v698_v8 = vmax.f32 %v694_v2, 0.0  ;;  %v695_v9 = vadd.f32 %v2278_v54, %v671_v3 }
 0x19f   :  { %v1612_v11 = vpack.c.bf16 %v698_v8, %v698_v8  ;;  %v699_v12 = vmax.f32 %v695_v9, 0.0 }
 0x1a0   :  { %v663_v13 = vpop.f32.mrb[12].mxu1 }
 0x1a1   :  { %719 = vst.msk [vmem:[%s2327_s3] sm:$0xf] %vm718_vm2, %v1612_v11  ;;  %v1613_v15 = vpack.c.bf16 %v699_v12, %v699_v12  ;;  %v672_v16 = vmax.f32 %v513_v59, %v663_v13  ;;  %v665_v55 = vpop.f32.mrb[13].mxu1 }
 0x1a2   :  { %v666_v17 = vpop.f32.mrb[14].mxu1 }
 0x1a3   :  { %720 = vst.msk [vmem:[%s2327_s3 + $0x4] sm:$0xf] %vm718_vm2, %v1613_v15  ;;  %v696_v19 = vadd.f32 %v2282_v14, %v672_v16  ;;  %v673_v20 = vmax.f32 %v514_v49, %v666_v17  ;;  %v668_v21 = vpop.f32.mrb[15].mxu1 }
 0x1a5   :  { %v700_v22 = vmax.f32 %v696_v19, 0.0  ;;  %v697_v10 = vadd.f32 %v2288_v18, %v673_v20 }
 0x1a7   :  { %v1614_v23 = vpack.c.bf16 %v700_v22, %v700_v22  ;;  %v701_v24 = vmax.f32 %v697_v10, 0.0 }
 0x1a9   :  { %721 = vst.msk [vmem:[%s2327_s3 + $0x8] sm:$0xf] %vm718_vm2, %v1614_v23  ;;  %v1615_v25 = vpack.c.bf16 %v701_v24, %v701_v24 }
 0x1ab   :  { %722 = vst.msk [vmem:[%s2327_s3 + $0xc] sm:$0xf] %vm718_vm2, %v1615_v25 }
 0x1b4   :  { %v861_v26 = vpop.f32.mrb[16].mxu0 }
 0x1b5   :  { %v863_v46 = vpop.f32.mrb[17].mxu0 }
 0x1b6   :  { %v864_v27 = vpop.f32.mrb[18].mxu0 }
 0x1b7   :  { %v866_v28 = vpop.f32.mrb[19].mxu0 }
 0x1bc   :  { %v1014_v29 = vpop.f32.mrb[16].mxu1  ;;  %v869_v30 = vpop.f32.mrb[20].mxu0 }
 0x1bd   :  { %v1029_v31 = vmax.f32 %v861_v26, %v1014_v29  ;;  %v1016_v32 = vpop.f32.mrb[17].mxu1  ;;  %v871_v33 = vpop.f32.mrb[21].mxu0 }
 0x1be   :  { %v1017_v34 = vpop.f32.mrb[18].mxu1  ;;  %v872_v35 = vpop.f32.mrb[22].mxu0 }
 0x1bf   :  { %v1030_v36 = vmax.f32 %v864_v27, %v1017_v34  ;;  %v1019_v1 = vpop.f32.mrb[19].mxu1  ;;  %v874_v37 = vpop.f32.mrb[23].mxu0 }
 0x1c4   :  { %v1022_v38 = vpop.f32.mrb[20].mxu1 }
 0x1c5   :  { %v1031_v39 = vmax.f32 %v869_v30, %v1022_v38  ;;  %v1024_v40 = vpop.f32.mrb[21].mxu1 }
 0x1c6   :  { %v1025_v41 = vpop.f32.mrb[22].mxu1 }
 0x1c7   :  { %v1032_v47 = vmax.f32 %v872_v35, %v1025_v41  ;;  %v1027_v42 = vpop.f32.mrb[23].mxu1 }
 0x1d8   :  { %v1171_v43 = vpop.f32.mrb[24].mxu0 }
 0x1d9   :  { %v1186_v58 = vmax.f32 %v1029_v31, %v1171_v43  ;;  %v1173_v44 = vpop.f32.mrb[25].mxu0 }
 0x1da   :  { %v1174_v7 = vpop.f32.mrb[26].mxu0 }
 0x1db   :  { %v1187_v45 = vmax.f32 %v1030_v36, %v1174_v7  ;;  %v1176_v48 = vpop.f32.mrb[27].mxu0 }
 0x1e0   :  { %v1179_v50 = vpop.f32.mrb[28].mxu0  ;;  %v1330_v51 = vpop.f32.mrb[24].mxu1 }
 0x1e1   :  { %v1188_v61 = vmax.f32 %v1031_v39, %v1179_v50  ;;  %v1345_v52 = vmax.f32 %v1186_v58, %v1330_v51  ;;  %v1181_v56 = vpop.f32.mrb[29].mxu0  ;;  %v1332_v57 = vpop.f32.mrb[25].mxu1 }
 0x1e2   :  { %v1182_v59 = vpop.f32.mrb[30].mxu0  ;;  %v1333_v60 = vpop.f32.mrb[26].mxu1 }
 0x1e3   :  { %v1349_v62 = vadd.f32 %v1345_v52, %v2276_v53  ;;  %v1189_v4 = vmax.f32 %v1032_v47, %v1182_v59  ;;  %v1346_v63 = vmax.f32 %v1187_v45, %v1333_v60  ;;  %v1335_v0 = vpop.f32.mrb[27].mxu1  ;;  %v1184_v2 = vpop.f32.mrb[31].mxu0 }
 0x1e5   :  { %v1353_v49 = vmax.f32 %v1349_v62, 0.0  ;;  %v1350_v3 = vadd.f32 %v1346_v63, %v2278_v54 }
 0x1e7   :  { %v1616_v5 = vpack.c.bf16 %v1353_v49, %v1353_v49  ;;  %v1354_v6 = vmax.f32 %v1350_v3, 0.0 }
 0x1e8   :  { %v1338_v8 = vpop.f32.mrb[28].mxu1 }
 0x1e9   :  { %1608 = vst.msk [vmem:[%s2327_s3 + $0x10] sm:$0xf] %vm718_vm2, %v1616_v5  ;;  %v1617_v9 = vpack.c.bf16 %v1354_v6, %v1354_v6  ;;  %v1347_v11 = vmax.f32 %v1188_v61, %v1338_v8  ;;  %v1340_v12 = vpop.f32.mrb[29].mxu1 }
 0x1ea   :  { %v1341_v13 = vpop.f32.mrb[30].mxu1 }
 0x1eb   :  { %1609 = vst.msk [vmem:[%s2327_s3 + $0x14] sm:$0xf] %vm718_vm2, %v1617_v9  ;;  %v1351_v53 = vadd.f32 %v1347_v11, %v2282_v14  ;;  %v1348_v54 = vmax.f32 %v1189_v4, %v1341_v13  ;;  %v1343_v15 = vpop.f32.mrb[31].mxu1 }
 0x1ed   :  { %v1355_v16 = vmax.f32 %v1351_v53, 0.0  ;;  %v1352_v55 = vadd.f32 %v1348_v54, %v2288_v18 }
 0x1ef   :  { %v1618_v17 = vpack.c.bf16 %v1355_v16, %v1355_v16  ;;  %v1356_v19 = vmax.f32 %v1352_v55, 0.0 }
 0x1f1   :  { %1610 = vst.msk [vmem:[%s2327_s3 + $0x18] sm:$0xf] %vm718_vm2, %v1618_v17  ;;  %v1619_v20 = vpack.c.bf16 %v1356_v19, %v1356_v19 }
 0x1f3   :  { %1611 = vst.msk [vmem:[%s2327_s3 + $0x1c] sm:$0xf] %vm718_vm2, %v1619_v20 }

</bundles_post_ra>
